<compile_context>
chip_gen: v7x
topology: tpu7x:2x2x1
jax: 0.10.0
libtpu: 0.0.40
codegen_flags: <defaults>
</compile_context>

<pallas_src>
import math

import jax
import jax.numpy as jnp
from jax.experimental import pallas as pl
from jax.experimental.pallas import tpu as pltpu


NUM_AGE_BINS = 33          # EqualizedLinear(33, 512) -> 33 age classes
IN_PAD = 128               # first-layer input padded to one full lane tile
HIDDEN = 512
N_HIDDEN_LAYERS = 7        # n_mlp
LEAKY_SLOPE = 0.2


# -----------------------------------------------------------------------------
# Fused Pallas kernel: one-hot -> 8 x (Linear + LeakyReLU)
# -----------------------------------------------------------------------------
def _mapping_kernel(ages_ref, w0_ref, b0_ref, wh_ref, bh_ref, o_ref):
    tm = o_ref.shape[0]

    # age_to_onehot: iota compare, built directly in bf16 (0/1 are exact in
    # bf16).  Padded batch rows carry age = -1 -> all-zero row.  F.normalize
    # is an exact no-op on one-hot / zero rows, so it is omitted.
    ages = ages_ref[...]                                          # (tm, 1) i32
    lane = jax.lax.broadcasted_iota(jnp.int32, (tm, IN_PAD), 1)
    x = (lane == ages).astype(jnp.bfloat16)                       # (tm, 128)

    def linear_lrelu(h_bf16, w_bf16, b_f32):
        # bf16 MXU operands, f32 accumulation; bias + LeakyReLU in f32.
        y = jnp.dot(h_bf16, w_bf16,
                    preferred_element_type=jnp.float32) + b_f32
        return jnp.where(y >= 0.0, y, LEAKY_SLOPE * y)            # f32

    # Layer 0: (tm, 128) @ (128, 512); carry activation in bf16.
    h = linear_lrelu(x, w0_ref[...], b0_ref[...]).astype(jnp.bfloat16)

    # Hidden layers 1..6: fori_loop bounds live ranges to one layer's
    # temporaries; unroll=True keeps LLO scheduling visibility.
    def body(i, h_bf16):
        return linear_lrelu(h_bf16, wh_ref[i], bh_ref[i]).astype(jnp.bfloat16)

    h = jax.lax.fori_loop(0, N_HIDDEN_LAYERS - 1, body, h, unroll=True)

    # Final hidden layer: keep f32 for the lane-dense store.
    o_ref[...] = linear_lrelu(h, wh_ref[N_HIDDEN_LAYERS - 1],
                              bh_ref[N_HIDDEN_LAYERS - 1])


# -----------------------------------------------------------------------------
# Wrapper
# -----------------------------------------------------------------------------
def _round_up(x, m):
    return ((x + m - 1) // m) * m


def mapping_network_forward(params, ages):
    """ages: (N,) integer age bins. Returns (N, 512) f32 latent codes."""
    ages = jnp.clip(ages.astype(jnp.int32), 0, NUM_AGE_BINS - 1)
    n = ages.shape[0]

    # Batch tiling: tiny batches -> single step; batches >= 512 rows -> at
    # least 2 steps (tm ~ n/2, multiple of 8, >= 256, capped at 512) so the
    # "parallel" grid axis can shard across v7x's two TensorCores.
    n_pad8 = max(8, _round_up(n, 8))
    if n_pad8 < 512:
        tm = n_pad8
        n_pad = n_pad8
    else:
        tm = min(512, _round_up((n_pad8 + 1) // 2, 8))
        n_pad = _round_up(n, tm)
    grid = (n_pad // tm,)

    ages_p = jnp.full((n_pad, 1), -1, jnp.int32)
    ages_p = ages_p.at[:n, 0].set(ages)      # padded rows -> all-zero one-hot

    const_spec = dict(pipeline_mode=pl.Buffered(1))   # grid-invariant blocks

    out = pl.pallas_call(
        _mapping_kernel,
        out_shape=jax.ShapeDtypeStruct((n_pad, HIDDEN), jnp.float32),
        grid=grid,
        in_specs=[
            pl.BlockSpec((tm, 1), lambda i: (i, 0)),                       # ages
            pl.BlockSpec((IN_PAD, HIDDEN), lambda i: (0, 0), **const_spec),  # w0
            pl.BlockSpec((1, HIDDEN), lambda i: (0, 0), **const_spec),       # b0
            pl.BlockSpec((N_HIDDEN_LAYERS, HIDDEN, HIDDEN),
                         lambda i: (0, 0, 0), **const_spec),                 # wh
            pl.BlockSpec((N_HIDDEN_LAYERS, 1, HIDDEN),
                         lambda i: (0, 0, 0), **const_spec),                 # bh
        ],
        out_specs=pl.BlockSpec((tm, HIDDEN), lambda i: (i, 0)),
        compiler_params=pltpu.CompilerParams(
            dimension_semantics=("parallel",),
            vmem_limit_bytes=32 * 1024 * 1024),
    )(ages_p, params["w0"], params["b0"], params["wh"], params["bh"])
    return out[:n]


# -----------------------------------------------------------------------------
# Parameters (fresh-init PyTorch semantics)
# -----------------------------------------------------------------------------
def init_params(key):
    """EqualizedLinear: weight ~ N(0,1) * 1/sqrt(in_features) (scale folded
    into the stored weight), bias = 0.  Weights stored (in, out), cast to bf16
    for the MXU; biases stay f32."""
    keys = jax.random.split(key, 1 + N_HIDDEN_LAYERS)

    c0 = 1.0 / math.sqrt(NUM_AGE_BINS)
    w0 = jax.random.normal(keys[0], (NUM_AGE_BINS, HIDDEN), jnp.float32) * c0
    w0_pad = jnp.zeros((IN_PAD, HIDDEN), jnp.float32).at[:NUM_AGE_BINS].set(w0)

    ch = 1.0 / math.sqrt(HIDDEN)
    wh = jnp.stack([
        jax.random.normal(keys[1 + i], (HIDDEN, HIDDEN), jnp.float32) * ch
        for i in range(N_HIDDEN_LAYERS)])

    return {
        "w0": w0_pad.astype(jnp.bfloat16),
        "b0": jnp.zeros((1, HIDDEN), jnp.float32),
        "wh": wh.astype(jnp.bfloat16),
        "bh": jnp.zeros((N_HIDDEN_LAYERS, 1, HIDDEN), jnp.float32),
    }


# -----------------------------------------------------------------------------
# Pure-JAX reference (same bf16 rounding points, f32 accumulation)
# -----------------------------------------------------------------------------
def reference_forward(params, ages):
    ages = jnp.clip(ages.astype(jnp.int32), 0, NUM_AGE_BINS - 1)
    onehot = jax.nn.one_hot(ages, IN_PAD, dtype=jnp.float32)
    norm = jnp.sqrt(jnp.sum(onehot * onehot, axis=1, keepdims=True))
    x = onehot / jnp.maximum(norm, 1e-12)   # no-op for one-hot; kept for spec

    def layer(h, w_bf16, b):
        hb = h.astype(jnp.bfloat16).astype(jnp.float32)
        y = jnp.dot(hb, w_bf16.astype(jnp.float32)) + b
        return jnp.where(y >= 0.0, y, LEAKY_SLOPE * y)

    h = layer(x, params["w0"], params["b0"])
    for i in range(N_HIDDEN_LAYERS):
        h = layer(h, params["wh"][i], params["bh"][i])
    return h


# -----------------------------------------------------------------------------
if __name__ == "__main__":
    key = jax.random.PRNGKey(0)
    kp, ka = jax.random.split(key)
    params = init_params(kp)

    N = 2
    ages = jax.random.randint(ka, (N,), 0, NUM_AGE_BINS)

    fwd = jax.jit(mapping_network_forward)
    out = fwd(params, ages)
    jax.block_until_ready(out)

    assert out.shape == (N, HIDDEN), out.shape
    assert bool(jnp.all(jnp.isfinite(out)))

    ref = reference_forward(params, ages)
    max_err = float(jnp.max(jnp.abs(out - ref)))
    assert bool(jnp.allclose(out, ref, atol=2e-2, rtol=2e-2)), max_err

    print("KERNEL_OK")
</pallas_src>

<mosaic_0001>
module attributes {stable_mosaic.version = 11 : i64} {
  func.func @_mapping_kernel(%arg0: i32, %arg1: memref<8x1xi32, #tpu.memory_space<vmem>>, %arg2: memref<128x512xbf16, #tpu.memory_space<vmem>>, %arg3: memref<1x512xf32, #tpu.memory_space<vmem>>, %arg4: memref<7x512x512xbf16, #tpu.memory_space<vmem>>, %arg5: memref<7x1x512xf32, #tpu.memory_space<vmem>>, %arg6: memref<8x512xf32, #tpu.memory_space<vmem>>) attributes {dimension_semantics = [#tpu.dimension_semantics<parallel>], iteration_bounds = array<i64: 1>, scalar_prefetch = 0 : i64, scratch_operands = 0 : i64, tpu.core_type = #tpu.core_type<tc>, window_params = [{transform_indices = @transform_0, window_bounds = array<i64: 8, 1>}, {pipeline_mode = #tpu.pipeline_mode<synchronous>, transform_indices = @transform_1, window_bounds = array<i64: 128, 512>}, {pipeline_mode = #tpu.pipeline_mode<synchronous>, transform_indices = @transform_2, window_bounds = array<i64: 1, 512>}, {pipeline_mode = #tpu.pipeline_mode<synchronous>, transform_indices = @transform_3, window_bounds = array<i64: 7, 512, 512>}, {pipeline_mode = #tpu.pipeline_mode<synchronous>, transform_indices = @transform_4, window_bounds = array<i64: 7, 1, 512>}, {transform_indices = @transform_5, window_bounds = array<i64: 8, 512>}]} {
    %c0 = arith.constant 0 : index
    %c0_0 = arith.constant 0 : index
    %0 = vector.load %arg1[%c0, %c0_0] : memref<8x1xi32, #tpu.memory_space<vmem>>, vector<8x1xi32>
    %1 = tpu.iota {dimensions = array<i32: 1>} : vector<8x128xi32>
    %2 = vector.broadcast %0 : vector<8x1xi32> to vector<8x128xi32>
    %3 = arith.cmpi eq, %1, %2 : vector<8x128xi32>
    %4 = arith.extui %3 : vector<8x128xi1> to vector<8x128xi32>
    %5 = arith.sitofp %4 : vector<8x128xi32> to vector<8x128xf32>
    %6 = arith.truncf %5 : vector<8x128xf32> to vector<8x128xbf16>
    %c0_1 = arith.constant 0 : index
    %c0_2 = arith.constant 0 : index
    %7 = vector.load %arg2[%c0_1, %c0_2] : memref<128x512xbf16, #tpu.memory_space<vmem>>, vector<128x512xbf16>
    %c0_3 = arith.constant 0 : index
    %c0_4 = arith.constant 0 : index
    %8 = vector.load %arg3[%c0_3, %c0_4] : memref<1x512xf32, #tpu.memory_space<vmem>>, vector<1x512xf32>
    %cst = arith.constant dense<0.000000e+00> : vector<8x512xf32>
    %9 = tpu.matmul %6, %7, %cst {dimension_numbers = #tpu.dot_dimension_numbers<[1], [0], [0], [1], [0, 0, 1, 1], [], []>} : vector<8x128xbf16>, vector<128x512xbf16>, vector<8x512xf32> -> vector<8x512xf32>
    %10 = vector.broadcast %8 : vector<1x512xf32> to vector<8x512xf32>
    %11 = arith.addf %9, %10 : vector<8x512xf32>
    %cst_5 = arith.constant 0.000000e+00 : f32
    %12 = vector.broadcast %cst_5 : f32 to vector<8x512xf32>
    %13 = arith.cmpf oge, %11, %12 : vector<8x512xf32>
    %cst_6 = arith.constant 2.000000e-01 : f32
    %14 = vector.broadcast %cst_6 : f32 to vector<8x512xf32>
    %15 = arith.mulf %14, %11 : vector<8x512xf32>
    %16 = arith.select %13, %11, %15 : vector<8x512xi1>, vector<8x512xf32>
    %17 = arith.truncf %16 : vector<8x512xf32> to vector<8x512xbf16>
    %c0_i32 = arith.constant 0 : i32
    %18 = arith.index_cast %c0_i32 : i32 to index
    %c0_7 = arith.constant 0 : index
    %c0_8 = arith.constant 0 : index
    %19 = vector.load %arg4[%18, %c0_7, %c0_8] : memref<7x512x512xbf16, #tpu.memory_space<vmem>>, vector<1x512x512xbf16>
    %20 = vector.shape_cast %19 : vector<1x512x512xbf16> to vector<512x512xbf16>
    %21 = arith.index_cast %c0_i32 : i32 to index
    %c0_9 = arith.constant 0 : index
    %c0_10 = arith.constant 0 : index
    %22 = vector.load %arg5[%21, %c0_9, %c0_10] : memref<7x1x512xf32, #tpu.memory_space<vmem>>, vector<1x1x512xf32>
    %23 = vector.shape_cast %22 : vector<1x1x512xf32> to vector<1x512xf32>
    %cst_11 = arith.constant dense<0.000000e+00> : vector<8x512xf32>
    %24 = tpu.matmul %17, %20, %cst_11 {dimension_numbers = #tpu.dot_dimension_numbers<[1], [0], [0], [1], [0, 0, 1, 1], [], []>} : vector<8x512xbf16>, vector<512x512xbf16>, vector<8x512xf32> -> vector<8x512xf32>
    %25 = vector.broadcast %23 : vector<1x512xf32> to vector<8x512xf32>
    %26 = arith.addf %24, %25 : vector<8x512xf32>
    %cst_12 = arith.constant 0.000000e+00 : f32
    %27 = vector.broadcast %cst_12 : f32 to vector<8x512xf32>
    %28 = arith.cmpf oge, %26, %27 : vector<8x512xf32>
    %cst_13 = arith.constant 2.000000e-01 : f32
    %29 = vector.broadcast %cst_13 : f32 to vector<8x512xf32>
    %30 = arith.mulf %29, %26 : vector<8x512xf32>
    %31 = arith.select %28, %26, %30 : vector<8x512xi1>, vector<8x512xf32>
    %32 = arith.truncf %31 : vector<8x512xf32> to vector<8x512xbf16>
    %c1_i32 = arith.constant 1 : i32
    %33 = arith.index_cast %c1_i32 : i32 to index
    %c0_14 = arith.constant 0 : index
    %c0_15 = arith.constant 0 : index
    %34 = vector.load %arg4[%33, %c0_14, %c0_15] : memref<7x512x512xbf16, #tpu.memory_space<vmem>>, vector<1x512x512xbf16>
    %35 = vector.shape_cast %34 : vector<1x512x512xbf16> to vector<512x512xbf16>
    %36 = arith.index_cast %c1_i32 : i32 to index
    %c0_16 = arith.constant 0 : index
    %c0_17 = arith.constant 0 : index
    %37 = vector.load %arg5[%36, %c0_16, %c0_17] : memref<7x1x512xf32, #tpu.memory_space<vmem>>, vector<1x1x512xf32>
    %38 = vector.shape_cast %37 : vector<1x1x512xf32> to vector<1x512xf32>
    %cst_18 = arith.constant dense<0.000000e+00> : vector<8x512xf32>
    %39 = tpu.matmul %32, %35, %cst_18 {dimension_numbers = #tpu.dot_dimension_numbers<[1], [0], [0], [1], [0, 0, 1, 1], [], []>} : vector<8x512xbf16>, vector<512x512xbf16>, vector<8x512xf32> -> vector<8x512xf32>
    %40 = vector.broadcast %38 : vector<1x512xf32> to vector<8x512xf32>
    %41 = arith.addf %39, %40 : vector<8x512xf32>
    %cst_19 = arith.constant 0.000000e+00 : f32
    %42 = vector.broadcast %cst_19 : f32 to vector<8x512xf32>
    %43 = arith.cmpf oge, %41, %42 : vector<8x512xf32>
    %cst_20 = arith.constant 2.000000e-01 : f32
    %44 = vector.broadcast %cst_20 : f32 to vector<8x512xf32>
    %45 = arith.mulf %44, %41 : vector<8x512xf32>
    %46 = arith.select %43, %41, %45 : vector<8x512xi1>, vector<8x512xf32>
    %47 = arith.truncf %46 : vector<8x512xf32> to vector<8x512xbf16>
    %c2_i32 = arith.constant 2 : i32
    %48 = arith.index_cast %c2_i32 : i32 to index
    %c0_21 = arith.constant 0 : index
    %c0_22 = arith.constant 0 : index
    %49 = vector.load %arg4[%48, %c0_21, %c0_22] : memref<7x512x512xbf16, #tpu.memory_space<vmem>>, vector<1x512x512xbf16>
    %50 = vector.shape_cast %49 : vector<1x512x512xbf16> to vector<512x512xbf16>
    %51 = arith.index_cast %c2_i32 : i32 to index
    %c0_23 = arith.constant 0 : index
    %c0_24 = arith.constant 0 : index
    %52 = vector.load %arg5[%51, %c0_23, %c0_24] : memref<7x1x512xf32, #tpu.memory_space<vmem>>, vector<1x1x512xf32>
    %53 = vector.shape_cast %52 : vector<1x1x512xf32> to vector<1x512xf32>
    %cst_25 = arith.constant dense<0.000000e+00> : vector<8x512xf32>
    %54 = tpu.matmul %47, %50, %cst_25 {dimension_numbers = #tpu.dot_dimension_numbers<[1], [0], [0], [1], [0, 0, 1, 1], [], []>} : vector<8x512xbf16>, vector<512x512xbf16>, vector<8x512xf32> -> vector<8x512xf32>
    %55 = vector.broadcast %53 : vector<1x512xf32> to vector<8x512xf32>
    %56 = arith.addf %54, %55 : vector<8x512xf32>
    %cst_26 = arith.constant 0.000000e+00 : f32
    %57 = vector.broadcast %cst_26 : f32 to vector<8x512xf32>
    %58 = arith.cmpf oge, %56, %57 : vector<8x512xf32>
    %cst_27 = arith.constant 2.000000e-01 : f32
    %59 = vector.broadcast %cst_27 : f32 to vector<8x512xf32>
    %60 = arith.mulf %59, %56 : vector<8x512xf32>
    %61 = arith.select %58, %56, %60 : vector<8x512xi1>, vector<8x512xf32>
    %62 = arith.truncf %61 : vector<8x512xf32> to vector<8x512xbf16>
    %c3_i32 = arith.constant 3 : i32
    %63 = arith.index_cast %c3_i32 : i32 to index
    %c0_28 = arith.constant 0 : index
    %c0_29 = arith.constant 0 : index
    %64 = vector.load %arg4[%63, %c0_28, %c0_29] : memref<7x512x512xbf16, #tpu.memory_space<vmem>>, vector<1x512x512xbf16>
    %65 = vector.shape_cast %64 : vector<1x512x512xbf16> to vector<512x512xbf16>
    %66 = arith.index_cast %c3_i32 : i32 to index
    %c0_30 = arith.constant 0 : index
    %c0_31 = arith.constant 0 : index
    %67 = vector.load %arg5[%66, %c0_30, %c0_31] : memref<7x1x512xf32, #tpu.memory_space<vmem>>, vector<1x1x512xf32>
    %68 = vector.shape_cast %67 : vector<1x1x512xf32> to vector<1x512xf32>
    %cst_32 = arith.constant dense<0.000000e+00> : vector<8x512xf32>
    %69 = tpu.matmul %62, %65, %cst_32 {dimension_numbers = #tpu.dot_dimension_numbers<[1], [0], [0], [1], [0, 0, 1, 1], [], []>} : vector<8x512xbf16>, vector<512x512xbf16>, vector<8x512xf32> -> vector<8x512xf32>
    %70 = vector.broadcast %68 : vector<1x512xf32> to vector<8x512xf32>
    %71 = arith.addf %69, %70 : vector<8x512xf32>
    %cst_33 = arith.constant 0.000000e+00 : f32
    %72 = vector.broadcast %cst_33 : f32 to vector<8x512xf32>
    %73 = arith.cmpf oge, %71, %72 : vector<8x512xf32>
    %cst_34 = arith.constant 2.000000e-01 : f32
    %74 = vector.broadcast %cst_34 : f32 to vector<8x512xf32>
    %75 = arith.mulf %74, %71 : vector<8x512xf32>
    %76 = arith.select %73, %71, %75 : vector<8x512xi1>, vector<8x512xf32>
    %77 = arith.truncf %76 : vector<8x512xf32> to vector<8x512xbf16>
    %c4_i32 = arith.constant 4 : i32
    %78 = arith.index_cast %c4_i32 : i32 to index
    %c0_35 = arith.constant 0 : index
    %c0_36 = arith.constant 0 : index
    %79 = vector.load %arg4[%78, %c0_35, %c0_36] : memref<7x512x512xbf16, #tpu.memory_space<vmem>>, vector<1x512x512xbf16>
    %80 = vector.shape_cast %79 : vector<1x512x512xbf16> to vector<512x512xbf16>
    %81 = arith.index_cast %c4_i32 : i32 to index
    %c0_37 = arith.constant 0 : index
    %c0_38 = arith.constant 0 : index
    %82 = vector.load %arg5[%81, %c0_37, %c0_38] : memref<7x1x512xf32, #tpu.memory_space<vmem>>, vector<1x1x512xf32>
    %83 = vector.shape_cast %82 : vector<1x1x512xf32> to vector<1x512xf32>
    %cst_39 = arith.constant dense<0.000000e+00> : vector<8x512xf32>
    %84 = tpu.matmul %77, %80, %cst_39 {dimension_numbers = #tpu.dot_dimension_numbers<[1], [0], [0], [1], [0, 0, 1, 1], [], []>} : vector<8x512xbf16>, vector<512x512xbf16>, vector<8x512xf32> -> vector<8x512xf32>
    %85 = vector.broadcast %83 : vector<1x512xf32> to vector<8x512xf32>
    %86 = arith.addf %84, %85 : vector<8x512xf32>
    %cst_40 = arith.constant 0.000000e+00 : f32
    %87 = vector.broadcast %cst_40 : f32 to vector<8x512xf32>
    %88 = arith.cmpf oge, %86, %87 : vector<8x512xf32>
    %cst_41 = arith.constant 2.000000e-01 : f32
    %89 = vector.broadcast %cst_41 : f32 to vector<8x512xf32>
    %90 = arith.mulf %89, %86 : vector<8x512xf32>
    %91 = arith.select %88, %86, %90 : vector<8x512xi1>, vector<8x512xf32>
    %92 = arith.truncf %91 : vector<8x512xf32> to vector<8x512xbf16>
    %c5_i32 = arith.constant 5 : i32
    %93 = arith.index_cast %c5_i32 : i32 to index
    %c0_42 = arith.constant 0 : index
    %c0_43 = arith.constant 0 : index
    %94 = vector.load %arg4[%93, %c0_42, %c0_43] : memref<7x512x512xbf16, #tpu.memory_space<vmem>>, vector<1x512x512xbf16>
    %95 = vector.shape_cast %94 : vector<1x512x512xbf16> to vector<512x512xbf16>
    %96 = arith.index_cast %c5_i32 : i32 to index
    %c0_44 = arith.constant 0 : index
    %c0_45 = arith.constant 0 : index
    %97 = vector.load %arg5[%96, %c0_44, %c0_45] : memref<7x1x512xf32, #tpu.memory_space<vmem>>, vector<1x1x512xf32>
    %98 = vector.shape_cast %97 : vector<1x1x512xf32> to vector<1x512xf32>
    %cst_46 = arith.constant dense<0.000000e+00> : vector<8x512xf32>
    %99 = tpu.matmul %92, %95, %cst_46 {dimension_numbers = #tpu.dot_dimension_numbers<[1], [0], [0], [1], [0, 0, 1, 1], [], []>} : vector<8x512xbf16>, vector<512x512xbf16>, vector<8x512xf32> -> vector<8x512xf32>
    %100 = vector.broadcast %98 : vector<1x512xf32> to vector<8x512xf32>
    %101 = arith.addf %99, %100 : vector<8x512xf32>
    %cst_47 = arith.constant 0.000000e+00 : f32
    %102 = vector.broadcast %cst_47 : f32 to vector<8x512xf32>
    %103 = arith.cmpf oge, %101, %102 : vector<8x512xf32>
    %cst_48 = arith.constant 2.000000e-01 : f32
    %104 = vector.broadcast %cst_48 : f32 to vector<8x512xf32>
    %105 = arith.mulf %104, %101 : vector<8x512xf32>
    %106 = arith.select %103, %101, %105 : vector<8x512xi1>, vector<8x512xf32>
    %107 = arith.truncf %106 : vector<8x512xf32> to vector<8x512xbf16>
    %c6_i32 = arith.constant 6 : i32
    %c6 = arith.constant 6 : index
    %c0_49 = arith.constant 0 : index
    %c0_50 = arith.constant 0 : index
    %108 = vector.load %arg4[%c6, %c0_49, %c0_50] : memref<7x512x512xbf16, #tpu.memory_space<vmem>>, vector<1x512x512xbf16>
    %109 = vector.shape_cast %108 : vector<1x512x512xbf16> to vector<512x512xbf16>
    %c6_51 = arith.constant 6 : index
    %c0_52 = arith.constant 0 : index
    %c0_53 = arith.constant 0 : index
    %110 = vector.load %arg5[%c6_51, %c0_52, %c0_53] : memref<7x1x512xf32, #tpu.memory_space<vmem>>, vector<1x1x512xf32>
    %111 = vector.shape_cast %110 : vector<1x1x512xf32> to vector<1x512xf32>
    %cst_54 = arith.constant dense<0.000000e+00> : vector<8x512xf32>
    %112 = tpu.matmul %107, %109, %cst_54 {dimension_numbers = #tpu.dot_dimension_numbers<[1], [0], [0], [1], [0, 0, 1, 1], [], []>} : vector<8x512xbf16>, vector<512x512xbf16>, vector<8x512xf32> -> vector<8x512xf32>
    %113 = vector.broadcast %111 : vector<1x512xf32> to vector<8x512xf32>
    %114 = arith.addf %112, %113 : vector<8x512xf32>
    %cst_55 = arith.constant 0.000000e+00 : f32
    %115 = vector.broadcast %cst_55 : f32 to vector<8x512xf32>
    %116 = arith.cmpf oge, %114, %115 : vector<8x512xf32>
    %cst_56 = arith.constant 2.000000e-01 : f32
    %117 = vector.broadcast %cst_56 : f32 to vector<8x512xf32>
    %118 = arith.mulf %117, %114 : vector<8x512xf32>
    %119 = arith.select %116, %114, %118 : vector<8x512xi1>, vector<8x512xf32>
    %c0_57 = arith.constant 0 : index
    %c0_58 = arith.constant 0 : index
    %120 = vector.load %arg6[%c0_57, %c0_58] : memref<8x512xf32, #tpu.memory_space<vmem>>, vector<8x512xf32>
    tpu.vector_store %arg6[%c0_57, %c0_58], %119 {strides = array<i32>} : memref<8x512xf32, #tpu.memory_space<vmem>>, vector<8x512xf32>,
    return
  }
  func.func @transform_0(%arg0: i32) -> (i32, i32) {
    %c0_i32 = arith.constant 0 : i32
    %c0_i32_0 = arith.constant 0 : i32
    return %arg0, %c0_i32 : i32, i32
  }
  func.func @transform_1(%arg0: i32) -> (i32, i32) {
    %c0_i32 = arith.constant 0 : i32
    %c0_i32_0 = arith.constant 0 : i32
    %c0_i32_1 = arith.constant 0 : i32
    return %c0_i32, %c0_i32_0 : i32, i32
  }
  func.func @transform_2(%arg0: i32) -> (i32, i32) {
    %c0_i32 = arith.constant 0 : i32
    %c0_i32_0 = arith.constant 0 : i32
    %c0_i32_1 = arith.constant 0 : i32
    return %c0_i32, %c0_i32_0 : i32, i32
  }
  func.func @transform_3(%arg0: i32) -> (i32, i32, i32) {
    %c0_i32 = arith.constant 0 : i32
    %c0_i32_0 = arith.constant 0 : i32
    %c0_i32_1 = arith.constant 0 : i32
    %c0_i32_2 = arith.constant 0 : i32
    return %c0_i32, %c0_i32_0, %c0_i32_1 : i32, i32, i32
  }
  func.func @transform_4(%arg0: i32) -> (i32, i32, i32) {
    %c0_i32 = arith.constant 0 : i32
    %c0_i32_0 = arith.constant 0 : i32
    %c0_i32_1 = arith.constant 0 : i32
    %c0_i32_2 = arith.constant 0 : i32
    return %c0_i32, %c0_i32_0, %c0_i32_1 : i32, i32, i32
  }
  func.func @transform_5(%arg0: i32) -> (i32, i32) {
    %c0_i32 = arith.constant 0 : i32
    %c0_i32_0 = arith.constant 0 : i32
    return %arg0, %c0_i32 : i32, i32
  }
}

</mosaic_0001>

<bundles_post_ra>
// kernel: mapping_network_forward.1
= control target key start
LH: loop header
LB: loop body
LE: loop exit
PB: predicated region body
PF: predicated region fallthrough
CT: control target
= control target key end

     0   :  { %10 = vsyncpa [#allocation3], 0  ;;  %s9947_s0 = inlined_call_operand.vmem [shape: s32[8,1], index: 0, kind: input, shape index: {}]   ;;  %s9948_s1 = inlined_call_operand.hbm [shape: bf16[128,512], index: 1, kind: input, shape index: {}]   ;;  %s9949_s2 = inlined_call_operand.hbm [shape: f32[1,512], index: 2, kind: input, shape index: {}]   ;;  %s9950_s3 = inlined_call_operand.hbm [shape: bf16[7,512,512], index: 3, kind: input, shape index: {}]   ;;  %s9951_s4 = inlined_call_operand.hbm [shape: f32[7,1,512], index: 4, kind: input, shape index: {}]   ;;  %s9952_s5 = inlined_call_operand.vmem [shape: f32[8,512], index: 5, kind: output, shape index: {}]  }
   0x1   :  { %11 = vsyncpa [#allocation5], 0 }
   0x2   :  { %12 = vsyncpa [#allocation8], 0  ;;  %s9719_s18 = smov [#allocation4]   ;;  %s9720_s20 = smov [#allocation2]  }
   0x3   :  { %s33_s19 = sshll.u32 %s9719_s18, 4  ;;  %s20_s21 = sshll.u32 %s9720_s20, 4  ;;  %s34_s19 = int_to_ptr.vmem [resolvable:$true] %s33_s19  ;;  %s9759_s21 = int_to_ptr.vmem [resolvable:$true] %s20_s21 }
   0x4   :  { %s9625_s24 = scalar_lea.hbm %s9949_s2, 64 }
   0x5   :  { %p9626_p0 = scmp.ne.s32.totalorder %s9949_s2, %s9625_s24  ;;  %p9629_p1 = scmp.lt.u32.totalorder %s9625_s24, %s9949_s2 }
   0x7   :  { %p9631_p2 = pnand %p9629_p1, %p9626_p0 }
   0x9   :  { %9634 = shalt.err (!%p9631_p2)
}
   0xa   :  { %s9635_s29 = scalar_lea.vmem %s34_s19, 64  ;;  %p9640_p4 = scmp.lt.s32.totalorder %s34_s19, %s34_s19 }
   0xb   :  { %p9636_p3 = scmp.ne.s32.totalorder %s34_s19, %s9635_s29  ;;  %p9641_p5 = scmp.lt.s32.totalorder %s9635_s29, %s9635_s29 }
   0xd   :  { %p9642_p6 = por %p9641_p5, %p9640_p4 }
   0xf   :  { %p9643_p7 = pnand %p9642_p6, %p9636_p3 }
  0x11   :  { %9646 = shalt.err (!%p9643_p7)
}
  0x12   :  { %36 = dma.hbm_to_vmem [thread:$0]  %s9949_s2, 64, %s34_s19, [#allocation5]  }
  0x13   :  { %s9647_s9 = scalar_lea.hbm %s9948_s1, 4096 }
  0x14   :  { %p9648_p8 = scmp.ne.s32.totalorder %s9948_s1, %s9647_s9  ;;  %p9651_p9 = scmp.lt.u32.totalorder %s9647_s9, %s9948_s1 }
  0x16   :  { %p9653_p10 = pnand %p9651_p9, %p9648_p8 }
  0x18   :  { %9656 = shalt.err (!%p9653_p10)
}
  0x19   :  { %s9657_s14 = scalar_lea.vmem %s9759_s21, 4096  ;;  %p9662_p12 = scmp.lt.s32.totalorder %s9759_s21, %s9759_s21 }
  0x1a   :  { %p9658_p11 = scmp.ne.s32.totalorder %s9759_s21, %s9657_s14  ;;  %p9663_p13 = scmp.lt.s32.totalorder %s9657_s14, %s9657_s14 }
  0x1c   :  { %p9664_p0 = por %p9663_p13, %p9662_p12 }
  0x1e   :  { %p9665_p1 = pnand %p9664_p0, %p9658_p11 }
  0x20   :  { %9668 = shalt.err (!%p9665_p1)
}
  0x21   :  { %s9721_s2 = smov 256   ;;  %s9722_s15 = smov 16  }
  0x22   :  { %26 = dma.hbm_to_vmem [thread:$0]  %s9948_s1, 4096, %s9759_s21, [#allocation3], %s9721_s2, %s9721_s2, %s9722_s15  }
  0x23   :  { %s9723_s18 = smov [#allocation6]   ;;  %s9724_s20 = smov [#allocation7]  }
  0x24   :  { %s42_s19 = sshll.u32 %s9723_s18, 4  ;;  %s54_s22 = sshll.u32 %s9724_s20, 4  ;;  %s43_s19 = int_to_ptr.vmem [resolvable:$true] %s42_s19  ;;  %s9790_s22 = int_to_ptr.vmem [resolvable:$true] %s54_s22 }
  0x25   :  { %s9669_s25 = scalar_lea.hbm %s9950_s3, 114688 }
  0x26   :  { %p9670_p2 = scmp.ne.s32.totalorder %s9950_s3, %s9669_s25  ;;  %p9673_p3 = scmp.lt.u32.totalorder %s9669_s25, %s9950_s3 }
  0x28   :  { %p9675_p4 = pnand %p9673_p3, %p9670_p2 }
  0x2a   :  { %9678 = shalt.err (!%p9675_p4)
}
  0x2b   :  { %s9679_s1 = scalar_lea.vmem %s43_s19, 114688  ;;  %p9684_p6 = scmp.lt.s32.totalorder %s43_s19, %s43_s19 }
  0x2c   :  { %p9680_p5 = scmp.ne.s32.totalorder %s43_s19, %s9679_s1  ;;  %p9685_p7 = scmp.lt.s32.totalorder %s9679_s1, %s9679_s1 }
  0x2e   :  { %p9686_p8 = por %p9685_p7, %p9684_p6 }
  0x30   :  { %p9687_p9 = pnand %p9686_p8, %p9680_p5 }
  0x32   :  { %9690 = shalt.err (!%p9687_p9)
}
  0x33   :  { %48 = dma.hbm_to_vmem [thread:$0]  %s9950_s3, 114688, %s43_s19, [#allocation5], %s9721_s2, %s9721_s2, %s9722_s15  }
  0x34   :  { %s9691_s8 = scalar_lea.hbm %s9951_s4, 448 }
  0x35   :  { %p9692_p10 = scmp.ne.s32.totalorder %s9951_s4, %s9691_s8  ;;  %p9695_p11 = scmp.lt.u32.totalorder %s9691_s8, %s9951_s4 }
  0x37   :  { %p9697_p12 = pnand %p9695_p11, %p9692_p10 }
  0x39   :  { %9700 = shalt.err (!%p9697_p12)
}
  0x3a   :  { %s9701_s13 = scalar_lea.vmem %s9790_s22, 448  ;;  %p9706_p0 = scmp.lt.s32.totalorder %s9790_s22, %s9790_s22 }
  0x3b   :  { %p9702_p13 = scmp.ne.s32.totalorder %s9790_s22, %s9701_s13  ;;  %p9707_p1 = scmp.lt.s32.totalorder %s9701_s13, %s9701_s13 }
  0x3d   :  { %p9708_p2 = por %p9707_p1, %p9706_p0 }
  0x3f   :  { %p9709_p3 = pnand %p9708_p2, %p9702_p13 }
  0x41   :  { %9712 = shalt.err (!%p9709_p3)
}
  0x42   :  { %s9725_s3 = smov 64   ;;  %s9726_s14 = smov 4  }
  0x43   :  { %60 = dma.hbm_to_vmem [thread:$0]  %s9951_s4, 448, %s9790_s22, [#allocation8], %s9725_s3, %s9725_s3, %s9726_s14  }
  0x44   :  { %9713 = dma.done.wait [#allocation3], 4096  }
  0x45   :  { %9714 = vsyncadd [#allocation3], 4294963200 }
  0x46   :  { %9715 = dma.done.wait [#allocation5], 114752  }
  0x47   :  { %9716 = vsyncadd [#allocation5], 4294852544 }
  0x48   :  { %9717 = dma.done.wait [#allocation8], 448  }
  0x49   :  { %9718 = vsyncadd [#allocation8], 4294966848  ;;  %v9727_v0 = vmov 0   ;;  %v74_v1 = vld [vmem:[%s9947_s0] sm:$0xff]  ;;  %v8235_v3 = vld [vmem:[#allocation2 + $0xc] ss:$16 sps:$4 sm:$0xff]   ;;  %v75_v36 = vlaneseq }
  0x4a   :  { %8232 = vset.pattern.permute.xlu0 %v9727_v0  ;;  %330 = vmatprep.mubr.bf16.mxu0 %v9727_v0  ;;  %v8233_v2 = vld [vmem:[#allocation2 + $0x4] ss:$16 sps:$4 sm:$0xff]   ;;  %v8237_v4 = vld [vmem:[#allocation2] ss:$16 sps:$4 sm:$0xff]   ;;  %v8238_v5 = vld [vmem:[#allocation2 + $0x8] ss:$16 sps:$4 sm:$0xff]  }
  0x4b   :  { %371 = vmatprep.mubr.bf16.mxu1 %v9727_v0  ;;  %78 = vperm.xlu0 %8232, %v74_v1   ;;  %v8239_v6 = vld [vmem:[#allocation2 + $0x24] ss:$16 sps:$4 sm:$0xff]   ;;  %v8241_v7 = vld [vmem:[#allocation2 + $0x2c] ss:$16 sps:$4 sm:$0xff]   ;;  %v8243_v8 = vld [vmem:[#allocation2 + $0x20] ss:$16 sps:$4 sm:$0xff]  }
  0x4c   :  { %298 = vmatprep.subr.bf16.mxu0 %v8233_v2  ;;  %339 = vmatprep.subr.bf16.mxu1 %v8235_v3  ;;  %v8244_v9 = vld [vmem:[#allocation2 + $0x28] ss:$16 sps:$4 sm:$0xff]   ;;  %v8245_v10 = vld [vmem:[#allocation2 + $0x44] ss:$16 sps:$4 sm:$0xff]   ;;  %v8247_v11 = vld [vmem:[#allocation2 + $0x4c] ss:$16 sps:$4 sm:$0xff]  }
  0x4d   :  { %299 = vmatpush1.bf16.msra.mxu0 %v8237_v4  ;;  %340 = vmatpush1.bf16.msra.mxu1 %v8238_v5  ;;  %v8249_v12 = vld [vmem:[#allocation2 + $0x40] ss:$16 sps:$4 sm:$0xff]   ;;  %v8250_v13 = vld [vmem:[#allocation2 + $0x48] ss:$16 sps:$4 sm:$0xff]   ;;  %v8251_v14 = vld [vmem:[#allocation2 + $0x64] ss:$16 sps:$4 sm:$0xff]  }
  0x4e   :  { %300 = vmatprep.subr.bf16.mxu0 %v8239_v6  ;;  %341 = vmatprep.subr.bf16.mxu1 %v8241_v7  ;;  %v8253_v15 = vld [vmem:[#allocation2 + $0x6c] ss:$16 sps:$4 sm:$0xff]   ;;  %v8255_v16 = vld [vmem:[#allocation2 + $0x60] ss:$16 sps:$4 sm:$0xff]   ;;  %v8256_v17 = vld [vmem:[#allocation2 + $0x68] ss:$16 sps:$4 sm:$0xff]  }
  0x4f   :  { %v8257_v18 = vld [vmem:[#allocation2 + $0x84] ss:$16 sps:$4 sm:$0xff]   ;;  %v8259_v19 = vld [vmem:[#allocation2 + $0x8c] ss:$16 sps:$4 sm:$0xff]   ;;  %v8261_v20 = vld [vmem:[#allocation2 + $0x80] ss:$16 sps:$4 sm:$0xff]  }
  0x50   :  { %v8262_v21 = vld [vmem:[#allocation2 + $0x88] ss:$16 sps:$4 sm:$0xff]   ;;  %v8263_v22 = vld [vmem:[#allocation2 + $0xa4] ss:$16 sps:$4 sm:$0xff]   ;;  %v8265_v23 = vld [vmem:[#allocation2 + $0xac] ss:$16 sps:$4 sm:$0xff]  }
  0x51   :  { %301 = vmatpush1.bf16.msra.mxu0 %v8243_v8  ;;  %342 = vmatpush1.bf16.msra.mxu1 %v8244_v9  ;;  %v8267_v24 = vld [vmem:[#allocation2 + $0xa0] ss:$16 sps:$4 sm:$0xff]   ;;  %v8268_v25 = vld [vmem:[#allocation2 + $0xa8] ss:$16 sps:$4 sm:$0xff]   ;;  %v8269_v26 = vld [vmem:[#allocation2 + $0xc4] ss:$16 sps:$4 sm:$0xff]  }
  0x52   :  { %302 = vmatprep.subr.bf16.mxu0 %v8245_v10  ;;  %343 = vmatprep.subr.bf16.mxu1 %v8247_v11  ;;  %v8271_v27 = vld [vmem:[#allocation2 + $0xcc] ss:$16 sps:$4 sm:$0xff]   ;;  %v8273_v28 = vld [vmem:[#allocation2 + $0xc0] ss:$16 sps:$4 sm:$0xff]   ;;  %v8274_v29 = vld [vmem:[#allocation2 + $0xc8] ss:$16 sps:$4 sm:$0xff]  }
  0x53   :  { %v8275_v30 = vld [vmem:[#allocation2 + $0xe4] ss:$16 sps:$4 sm:$0xff]   ;;  %v8277_v31 = vld [vmem:[#allocation2 + $0xec] ss:$16 sps:$4 sm:$0xff]   ;;  %v8279_v32 = vld [vmem:[#allocation2 + $0xe0] ss:$16 sps:$4 sm:$0xff]  }
  0x54   :  { %v8280_v33 = vld [vmem:[#allocation2 + $0xe8] ss:$16 sps:$4 sm:$0xff]   ;;  %v8286_v35 = vld [vmem:[#allocation6 + $0xc] ss:$16 sps:$4 sm:$0xff]   ;;  %v76_v37 = vand.u32 127, %v75_v36 }
  0x55   :  { %303 = vmatpush1.bf16.msra.mxu0 %v8249_v12  ;;  %344 = vmatpush1.bf16.msra.mxu1 %v8250_v13  ;;  %v8283_v34 = vld [vmem:[#allocation6 + $0x4] ss:$16 sps:$4 sm:$0xff]   ;;  %v8281_v38 = vld [vmem:[#allocation6] ss:$16 sps:$4 sm:$0xff]   ;;  %v8284_v39 = vld [vmem:[#allocation6 + $0x8] ss:$16 sps:$4 sm:$0xff]  }
  0x56   :  { %304 = vmatprep.subr.bf16.mxu0 %v8251_v14  ;;  %345 = vmatprep.subr.bf16.mxu1 %v8253_v15  ;;  %v8289_v40 = vld [vmem:[#allocation6 + $0x24] ss:$16 sps:$4 sm:$0xff]   ;;  %v8292_v41 = vld [vmem:[#allocation6 + $0x2c] ss:$16 sps:$4 sm:$0xff]   ;;  %v8287_v43 = vld [vmem:[#allocation6 + $0x20] ss:$16 sps:$4 sm:$0xff]  }
  0x57   :  { %v8290_v44 = vld [vmem:[#allocation6 + $0x28] ss:$16 sps:$4 sm:$0xff]   ;;  %v9728_v45 = vmov 1.0|1.0   ;;  %v8295_v46 = vld [vmem:[#allocation6 + $0x44] ss:$16 sps:$4 sm:$0xff]  }
  0x58   :  { %v8298_v47 = vld [vmem:[#allocation6 + $0x4c] ss:$16 sps:$4 sm:$0xff]   ;;  %v8293_v48 = vld [vmem:[#allocation6 + $0x40] ss:$16 sps:$4 sm:$0xff]   ;;  %v8296_v49 = vld [vmem:[#allocation6 + $0x48] ss:$16 sps:$4 sm:$0xff]  }
  0x59   :  { %305 = vmatpush1.bf16.msra.mxu0 %v8255_v16  ;;  %346 = vmatpush1.bf16.msra.mxu1 %v8256_v17  ;;  %v8301_v50 = vld [vmem:[#allocation6 + $0x64] ss:$16 sps:$4 sm:$0xff]   ;;  %v8304_v51 = vld [vmem:[#allocation6 + $0x6c] ss:$16 sps:$4 sm:$0xff]   ;;  %v8299_v52 = vld [vmem:[#allocation6 + $0x60] ss:$16 sps:$4 sm:$0xff]  }
  0x5a   :  { %306 = vmatprep.subr.bf16.mxu0 %v8257_v18  ;;  %347 = vmatprep.subr.bf16.mxu1 %v8259_v19  ;;  %v8302_v53 = vld [vmem:[#allocation6 + $0x68] ss:$16 sps:$4 sm:$0xff]   ;;  %v8307_v54 = vld [vmem:[#allocation6 + $0x84] ss:$16 sps:$4 sm:$0xff]   ;;  %v8310_v55 = vld [vmem:[#allocation6 + $0x8c] ss:$16 sps:$4 sm:$0xff]  }
  0x5b   :  { %v8305_v56 = vld [vmem:[#allocation6 + $0x80] ss:$16 sps:$4 sm:$0xff]   ;;  %v8308_v57 = vld [vmem:[#allocation6 + $0x88] ss:$16 sps:$4 sm:$0xff]   ;;  %v8313_v58 = vld [vmem:[#allocation6 + $0xa4] ss:$16 sps:$4 sm:$0xff]  }
  0x5c   :  { %v8316_v59 = vld [vmem:[#allocation6 + $0xac] ss:$16 sps:$4 sm:$0xff]   ;;  %v8311_v60 = vld [vmem:[#allocation6 + $0xa0] ss:$16 sps:$4 sm:$0xff]   ;;  %v8314_v61 = vld [vmem:[#allocation6 + $0xa8] ss:$16 sps:$4 sm:$0xff]  }
  0x5d   :  { %307 = vmatpush1.bf16.msra.mxu0 %v8261_v20  ;;  %348 = vmatpush1.bf16.msra.mxu1 %v8262_v21  ;;  %v8319_v62 = vld [vmem:[#allocation6 + $0xc4] ss:$16 sps:$4 sm:$0xff]   ;;  %v8322_v63 = vld [vmem:[#allocation6 + $0xcc] ss:$16 sps:$4 sm:$0xff]   ;;  %v8317_v0 = vld [vmem:[#allocation6 + $0xc0] ss:$16 sps:$4 sm:$0xff]  }
  0x5e   :  { %308 = vmatprep.subr.bf16.mxu0 %v8263_v22  ;;  %349 = vmatprep.subr.bf16.mxu1 %v8265_v23  ;;  %v8320_v1 = vld [vmem:[#allocation6 + $0xc8] ss:$16 sps:$4 sm:$0xff]   ;;  %v8325_v2 = vld [vmem:[#allocation6 + $0xe4] ss:$16 sps:$4 sm:$0xff]   ;;  %v8328_v3 = vld [vmem:[#allocation6 + $0xec] ss:$16 sps:$4 sm:$0xff]  }
  0x5f   :  { %v8323_v4 = vld [vmem:[#allocation6 + $0xe0] ss:$16 sps:$4 sm:$0xff]   ;;  %v8326_v5 = vld [vmem:[#allocation6 + $0xe8] ss:$16 sps:$4 sm:$0xff]   ;;  %v8331_v6 = vld [vmem:[#allocation6 + $0x104] ss:$16 sps:$4 sm:$0xff]  }
  0x60   :  { %v8334_v7 = vld [vmem:[#allocation6 + $0x10c] ss:$16 sps:$4 sm:$0xff]   ;;  %v8329_v8 = vld [vmem:[#allocation6 + $0x100] ss:$16 sps:$4 sm:$0xff]   ;;  %v8332_v9 = vld [vmem:[#allocation6 + $0x108] ss:$16 sps:$4 sm:$0xff]  }
  0x61   :  { %309 = vmatpush1.bf16.msra.mxu0 %v8267_v24  ;;  %350 = vmatpush1.bf16.msra.mxu1 %v8268_v25  ;;  %v8337_v10 = vld [vmem:[#allocation6 + $0x124] ss:$16 sps:$4 sm:$0xff]   ;;  %v8340_v11 = vld [vmem:[#allocation6 + $0x12c] ss:$16 sps:$4 sm:$0xff]   ;;  %v8335_v12 = vld [vmem:[#allocation6 + $0x120] ss:$16 sps:$4 sm:$0xff]  }
  0x62   :  { %310 = vmatprep.subr.bf16.mxu0 %v8269_v26  ;;  %351 = vmatprep.subr.bf16.mxu1 %v8271_v27  ;;  %v8338_v13 = vld [vmem:[#allocation6 + $0x128] ss:$16 sps:$4 sm:$0xff]   ;;  %v8343_v14 = vld [vmem:[#allocation6 + $0x144] ss:$16 sps:$4 sm:$0xff]   ;;  %v8346_v15 = vld [vmem:[#allocation6 + $0x14c] ss:$16 sps:$4 sm:$0xff]  }
  0x63   :  { %v8341_v16 = vld [vmem:[#allocation6 + $0x140] ss:$16 sps:$4 sm:$0xff]   ;;  %v8344_v17 = vld [vmem:[#allocation6 + $0x148] ss:$16 sps:$4 sm:$0xff]   ;;  %v8349_v18 = vld [vmem:[#allocation6 + $0x164] ss:$16 sps:$4 sm:$0xff]  }
  0x64   :  { %v8352_v19 = vld [vmem:[#allocation6 + $0x16c] ss:$16 sps:$4 sm:$0xff]   ;;  %v8347_v20 = vld [vmem:[#allocation6 + $0x160] ss:$16 sps:$4 sm:$0xff]   ;;  %v8350_v21 = vld [vmem:[#allocation6 + $0x168] ss:$16 sps:$4 sm:$0xff]  }
  0x65   :  { %311 = vmatpush1.bf16.msra.mxu0 %v8273_v28  ;;  %352 = vmatpush1.bf16.msra.mxu1 %v8274_v29  ;;  %v8355_v22 = vld [vmem:[#allocation6 + $0x184] ss:$16 sps:$4 sm:$0xff]   ;;  %v8358_v23 = vld [vmem:[#allocation6 + $0x18c] ss:$16 sps:$4 sm:$0xff]   ;;  %v8353_v24 = vld [vmem:[#allocation6 + $0x180] ss:$16 sps:$4 sm:$0xff]  }
  0x66   :  { %312 = vmatprep.subr.bf16.mxu0 %v8275_v30  ;;  %353 = vmatprep.subr.bf16.mxu1 %v8277_v31  ;;  %v8356_v25 = vld [vmem:[#allocation6 + $0x188] ss:$16 sps:$4 sm:$0xff]   ;;  %v8361_v26 = vld [vmem:[#allocation6 + $0x1a4] ss:$16 sps:$4 sm:$0xff]   ;;  %v8364_v27 = vld [vmem:[#allocation6 + $0x1ac] ss:$16 sps:$4 sm:$0xff]  }
  0x67   :  { %v8359_v28 = vld [vmem:[#allocation6 + $0x1a0] ss:$16 sps:$4 sm:$0xff]   ;;  %v8362_v29 = vld [vmem:[#allocation6 + $0x1a8] ss:$16 sps:$4 sm:$0xff]   ;;  %v8367_v30 = vld [vmem:[#allocation6 + $0x1c4] ss:$16 sps:$4 sm:$0xff]  }
  0x68   :  { %v8370_v31 = vld [vmem:[#allocation6 + $0x1cc] ss:$16 sps:$4 sm:$0xff]  }
  0x69   :  { %313 = vmatpush1.bf16.msra.mxu0 %v8279_v32  ;;  %354 = vmatpush1.bf16.msra.mxu1 %v8280_v33  ;;  %v8365_v32 = vld [vmem:[#allocation6 + $0x1c0] ss:$16 sps:$4 sm:$0xff]   ;;  %v8368_v33 = vld [vmem:[#allocation6 + $0x1c8] ss:$16 sps:$4 sm:$0xff]  }
  0x6a   :  { %1186 = vmatprep.subr.bf16.mxu0 %v8283_v34  ;;  %1268 = vmatprep.subr.bf16.mxu1 %v8286_v35  ;;  %v8373_v34 = vld [vmem:[#allocation6 + $0x1e4] ss:$16 sps:$4 sm:$0xff]   ;;  %v8376_v35 = vld [vmem:[#allocation6 + $0x1ec] ss:$16 sps:$4 sm:$0xff]  }
  0xca   :  { %v79_v42 = vpop.permute.xlu0 %78 }
  0xcb   :  { %vm80_vm0 = vcmp.eq.s32.totalorder %v76_v37, %v79_v42  ;;  %v8371_v37 = vld [vmem:[#allocation6 + $0x1e0] ss:$16 sps:$4 sm:$0xff]   ;;  %v9828_v42 = vld [vmem:[#allocation4] sm:$0xf] }
  0xcc   :  { %vm7238_vm1 = vmpackc.low %vm80_vm0, %vm80_vm0 }
  0xcd   :  { %7239 = vmatmul.mubr.msk.bf16.vlgmr.msra.gmra.mrb[0].mxu0 %vm7238_vm1, %v9728_v45  ;;  %7241 = vmatmul.mubr.msk.bf16.vlgmr.msra.gmra.mrb[0].mxu1 %vm7238_vm1, %v9728_v45 }
  0xce   :  { %1187 = vmatpush1.bf16.msra.mxu0 %v8281_v38  ;;  %1269 = vmatpush1.bf16.msra.mxu1 %v8284_v39  ;;  %v8374_v38 = vld [vmem:[#allocation6 + $0x1e8] ss:$16 sps:$4 sm:$0xff]   ;;  %v8379_v39 = vld [vmem:[#allocation6 + $0x204] ss:$16 sps:$4 sm:$0xff]  }
  0xcf   :  { %1188 = vmatprep.subr.bf16.mxu0 %v8289_v40  ;;  %1270 = vmatprep.subr.bf16.mxu1 %v8292_v41  ;;  %v8382_v40 = vld [vmem:[#allocation6 + $0x20c] ss:$16 sps:$4 sm:$0xff]   ;;  %v9826_v41 = vshrl.u32 %v75_v36, 7 }
  0xd1   :  { %v9837_v45 = vsub.s32 3, %v9826_v41 }
  0xd2   :  { %1189 = vmatpush1.bf16.msra.mxu0 %v8287_v43  ;;  %1271 = vmatpush1.bf16.msra.mxu1 %v8290_v44  ;;  %v9831_v43 = vsub.s32 0, %v9826_v41  ;;  %v9834_v44 = vsub.s32 1, %v9826_v41 }
  0xd3   :  { %1190 = vmatprep.subr.bf16.mxu0 %v8295_v46  ;;  %1272 = vmatprep.subr.bf16.mxu1 %v8298_v47  ;;  %v133_v36 = vrot.slane %v9828_v42, %v9837_v45 }
  0xd4   :  { %v121_v46 = vrot.slane %v9828_v42, %v9831_v43  ;;  %v125_v47 = vrot.slane %v9828_v42, %v9834_v44 }
  0xd6   :  { %1191 = vmatpush1.bf16.msra.mxu0 %v8293_v48  ;;  %1273 = vmatpush1.bf16.msra.mxu1 %v8296_v49 }
  0xd7   :  { %1192 = vmatprep.subr.bf16.mxu0 %v8301_v50  ;;  %1274 = vmatprep.subr.bf16.mxu1 %v8304_v51 }
  0xda   :  { %1193 = vmatpush1.bf16.msra.mxu0 %v8299_v52  ;;  %1275 = vmatpush1.bf16.msra.mxu1 %v8302_v53 }
  0xdb   :  { %1194 = vmatprep.subr.bf16.mxu0 %v8307_v54  ;;  %1276 = vmatprep.subr.bf16.mxu1 %v8310_v55 }
  0xde   :  { %1195 = vmatpush1.bf16.msra.mxu0 %v8305_v56  ;;  %1277 = vmatpush1.bf16.msra.mxu1 %v8308_v57 }
  0xdf   :  { %1196 = vmatprep.subr.bf16.mxu0 %v8313_v58  ;;  %1278 = vmatprep.subr.bf16.mxu1 %v8316_v59 }
  0xe2   :  { %1197 = vmatpush1.bf16.msra.mxu0 %v8311_v60  ;;  %1279 = vmatpush1.bf16.msra.mxu1 %v8314_v61 }
  0xe3   :  { %1198 = vmatprep.subr.bf16.mxu0 %v8319_v62  ;;  %1280 = vmatprep.subr.bf16.mxu1 %v8322_v63  ;;  %v8377_v63 = vld [vmem:[#allocation6 + $0x200] ss:$16 sps:$4 sm:$0xff]  }
  0xe6   :  { %1199 = vmatpush1.bf16.msra.mxu0 %v8317_v0  ;;  %1281 = vmatpush1.bf16.msra.mxu1 %v8320_v1  ;;  %v8380_v0 = vld [vmem:[#allocation6 + $0x208] ss:$16 sps:$4 sm:$0xff]  }
  0xe7   :  { %1200 = vmatprep.subr.bf16.mxu0 %v8325_v2  ;;  %1282 = vmatprep.subr.bf16.mxu1 %v8328_v3 }
  0xea   :  { %1201 = vmatpush1.bf16.msra.mxu0 %v8323_v4  ;;  %1283 = vmatpush1.bf16.msra.mxu1 %v8326_v5  ;;  %v8385_v4 = vld [vmem:[#allocation6 + $0x224] ss:$16 sps:$4 sm:$0xff]   ;;  %v8388_v5 = vld [vmem:[#allocation6 + $0x22c] ss:$16 sps:$4 sm:$0xff]  }
  0xeb   :  { %1202 = vmatprep.subr.bf16.mxu0 %v8331_v6  ;;  %1284 = vmatprep.subr.bf16.mxu1 %v8334_v7  ;;  %v8383_v7 = vld [vmem:[#allocation6 + $0x220] ss:$16 sps:$4 sm:$0xff]  }
  0xee   :  { %1203 = vmatpush1.bf16.msra.mxu0 %v8329_v8  ;;  %1285 = vmatpush1.bf16.msra.mxu1 %v8332_v9  ;;  %v8386_v8 = vld [vmem:[#allocation6 + $0x228] ss:$16 sps:$4 sm:$0xff]  }
  0xef   :  { %1204 = vmatprep.subr.bf16.mxu0 %v8337_v10  ;;  %1286 = vmatprep.subr.bf16.mxu1 %v8340_v11  ;;  %v8391_v10 = vld [vmem:[#allocation6 + $0x244] ss:$16 sps:$4 sm:$0xff]   ;;  %v8394_v11 = vld [vmem:[#allocation6 + $0x24c] ss:$16 sps:$4 sm:$0xff]  }
  0xf2   :  { %1205 = vmatpush1.bf16.msra.mxu0 %v8335_v12  ;;  %1287 = vmatpush1.bf16.msra.mxu1 %v8338_v13  ;;  %v8389_v12 = vld [vmem:[#allocation6 + $0x240] ss:$16 sps:$4 sm:$0xff]   ;;  %v8392_v13 = vld [vmem:[#allocation6 + $0x248] ss:$16 sps:$4 sm:$0xff]  }
  0xf3   :  { %1206 = vmatprep.subr.bf16.mxu0 %v8343_v14  ;;  %1288 = vmatprep.subr.bf16.mxu1 %v8346_v15  ;;  %v8397_v14 = vld [vmem:[#allocation6 + $0x264] ss:$16 sps:$4 sm:$0xff]   ;;  %v8400_v15 = vld [vmem:[#allocation6 + $0x26c] ss:$16 sps:$4 sm:$0xff]  }
  0xf6   :  { %1207 = vmatpush1.bf16.msra.mxu0 %v8341_v16  ;;  %1289 = vmatpush1.bf16.msra.mxu1 %v8344_v17  ;;  %v8395_v16 = vld [vmem:[#allocation6 + $0x260] ss:$16 sps:$4 sm:$0xff]   ;;  %v8398_v17 = vld [vmem:[#allocation6 + $0x268] ss:$16 sps:$4 sm:$0xff]  }
  0xf7   :  { %1208 = vmatprep.subr.bf16.mxu0 %v8349_v18  ;;  %1290 = vmatprep.subr.bf16.mxu1 %v8352_v19  ;;  %v8403_v18 = vld [vmem:[#allocation6 + $0x284] ss:$16 sps:$4 sm:$0xff]   ;;  %v8406_v19 = vld [vmem:[#allocation6 + $0x28c] ss:$16 sps:$4 sm:$0xff]  }
  0xfa   :  { %1209 = vmatpush1.bf16.msra.mxu0 %v8347_v20  ;;  %1291 = vmatpush1.bf16.msra.mxu1 %v8350_v21  ;;  %v8401_v20 = vld [vmem:[#allocation6 + $0x280] ss:$16 sps:$4 sm:$0xff]   ;;  %v8404_v21 = vld [vmem:[#allocation6 + $0x288] ss:$16 sps:$4 sm:$0xff]  }
  0xfb   :  { %1210 = vmatprep.subr.bf16.mxu0 %v8355_v22  ;;  %1292 = vmatprep.subr.bf16.mxu1 %v8358_v23  ;;  %v8409_v22 = vld [vmem:[#allocation6 + $0x2a4] ss:$16 sps:$4 sm:$0xff]   ;;  %v8412_v23 = vld [vmem:[#allocation6 + $0x2ac] ss:$16 sps:$4 sm:$0xff]  }
  0xfe   :  { %1211 = vmatpush1.bf16.msra.mxu0 %v8353_v24  ;;  %1293 = vmatpush1.bf16.msra.mxu1 %v8356_v25  ;;  %v8407_v24 = vld [vmem:[#allocation6 + $0x2a0] ss:$16 sps:$4 sm:$0xff]   ;;  %v8410_v25 = vld [vmem:[#allocation6 + $0x2a8] ss:$16 sps:$4 sm:$0xff]  }
  0xff   :  { %1212 = vmatprep.subr.bf16.mxu0 %v8361_v26  ;;  %1294 = vmatprep.subr.bf16.mxu1 %v8364_v27  ;;  %v8415_v26 = vld [vmem:[#allocation6 + $0x2c4] ss:$16 sps:$4 sm:$0xff]   ;;  %v8418_v27 = vld [vmem:[#allocation6 + $0x2cc] ss:$16 sps:$4 sm:$0xff]  }
 0x102   :  { %1213 = vmatpush1.bf16.msra.mxu0 %v8359_v28  ;;  %1295 = vmatpush1.bf16.msra.mxu1 %v8362_v29  ;;  %v8413_v28 = vld [vmem:[#allocation6 + $0x2c0] ss:$16 sps:$4 sm:$0xff]   ;;  %v8416_v29 = vld [vmem:[#allocation6 + $0x2c8] ss:$16 sps:$4 sm:$0xff]  }
 0x103   :  { %1214 = vmatprep.subr.bf16.mxu0 %v8367_v30  ;;  %1296 = vmatprep.subr.bf16.mxu1 %v8370_v31  ;;  %v8421_v30 = vld [vmem:[#allocation6 + $0x2e4] ss:$16 sps:$4 sm:$0xff]   ;;  %v8424_v31 = vld [vmem:[#allocation6 + $0x2ec] ss:$16 sps:$4 sm:$0xff]  }
 0x106   :  { %1215 = vmatpush1.bf16.msra.mxu0 %v8365_v32  ;;  %1297 = vmatpush1.bf16.msra.mxu1 %v8368_v33  ;;  %v8419_v32 = vld [vmem:[#allocation6 + $0x2e0] ss:$16 sps:$4 sm:$0xff]   ;;  %v8422_v33 = vld [vmem:[#allocation6 + $0x2e8] ss:$16 sps:$4 sm:$0xff]  }
 0x107   :  { %1216 = vmatprep.subr.bf16.mxu0 %v8373_v34  ;;  %1298 = vmatprep.subr.bf16.mxu1 %v8376_v35  ;;  %v8427_v34 = vld [vmem:[#allocation6 + $0x304] ss:$16 sps:$4 sm:$0xff]   ;;  %v8430_v35 = vld [vmem:[#allocation6 + $0x30c] ss:$16 sps:$4 sm:$0xff]  }
 0x10a   :  { %1217 = vmatpush1.bf16.msra.mxu0 %v8371_v37  ;;  %1299 = vmatpush1.bf16.msra.mxu1 %v8374_v38  ;;  %v8425_v37 = vld [vmem:[#allocation6 + $0x300] ss:$16 sps:$4 sm:$0xff]   ;;  %v8428_v38 = vld [vmem:[#allocation6 + $0x308] ss:$16 sps:$4 sm:$0xff]  }
 0x10b   :  { %1227 = vmatprep.subr.bf16.mxu0 %v8379_v39  ;;  %1309 = vmatprep.subr.bf16.mxu1 %v8382_v40  ;;  %v8433_v39 = vld [vmem:[#allocation6 + $0x324] ss:$16 sps:$4 sm:$0xff]   ;;  %v8436_v40 = vld [vmem:[#allocation6 + $0x32c] ss:$16 sps:$4 sm:$0xff]  }
 0x1a0   :  { %v332_v48 = vpop.f32.mrb[0].mxu0  ;;  %v9845_v49 = vpop.f32.mrb[0].mxu1 }
 0x1a1   :  { %v333_v50 = vadd.f32 %v332_v48, %v121_v46  ;;  %v334_v51 = vpop.f32.mrb[1].mxu0  ;;  %v375_v52 = vpop.f32.mrb[1].mxu1  ;;  %v8431_v46 = vld [vmem:[#allocation6 + $0x320] ss:$16 sps:$4 sm:$0xff]   ;;  %v8442_v48 = vld [vmem:[#allocation6 + $0x34c] ss:$16 sps:$4 sm:$0xff]  }
 0x1a2   :  { %v335_v53 = vadd.f32 %v334_v51, %v125_v47  ;;  %v376_v54 = vadd.f32 %v375_v52, %v133_v36  ;;  %v336_v55 = vpop.f32.mrb[2].mxu0  ;;  %v377_v56 = vpop.f32.mrb[2].mxu1  ;;  %v8434_v47 = vld [vmem:[#allocation6 + $0x328] ss:$16 sps:$4 sm:$0xff]   ;;  %v8439_v36 = vld [vmem:[#allocation6 + $0x344] ss:$16 sps:$4 sm:$0xff]  }
 0x1a3   :  { %vm380_vm2 = vcmp.ge.f32.partialorder %v333_v50, 0.0  ;;  %v384_v57 = vmul.f32 0.2, %v333_v50  ;;  %v337_v61 = vpop.f32.mrb[3].mxu0  ;;  %v378_v62 = vpop.f32.mrb[3].mxu1 }
 0x1a4   :  { %vm381_vm3 = vcmp.ge.f32.partialorder %v335_v53, 0.0  ;;  %v385_v58 = vmul.f32 0.2, %v335_v53  ;;  %vm383_vm4 = vcmp.ge.f32.partialorder %v376_v54, 0.0  ;;  %v387_v59 = vmul.f32 0.2, %v376_v54 }
 0x1a5   :  { %v388_v60 = vsel %vm380_vm2, %v333_v50, %v384_v57  ;;  %v8437_v50 = vld [vmem:[#allocation6 + $0x340] ss:$16 sps:$4 sm:$0xff]   ;;  %v8440_v51 = vld [vmem:[#allocation6 + $0x348] ss:$16 sps:$4 sm:$0xff]   ;;  %v8445_v52 = vld [vmem:[#allocation6 + $0x364] ss:$16 sps:$4 sm:$0xff]  }
 0x1a6   :  { %v389_v1 = vsel %vm381_vm3, %v335_v53, %v385_v58  ;;  %v391_v3 = vsel %vm383_vm4, %v376_v54, %v387_v59  ;;  %v392_v6 = vpack.c.bf16 %v388_v60, %v388_v60  ;;  %v8448_v53 = vld [vmem:[#allocation6 + $0x36c] ss:$16 sps:$4 sm:$0xff]   ;;  %v8443_v54 = vld [vmem:[#allocation6 + $0x360] ss:$16 sps:$4 sm:$0xff]   ;;  %v8446_v55 = vld [vmem:[#allocation6 + $0x368] ss:$16 sps:$4 sm:$0xff]  }
 0x1a7   :  { %v393_v2 = vpack.c.bf16 %v389_v1, %v389_v1  ;;  %v395_v9 = vpack.c.bf16 %v391_v3, %v391_v3  ;;  %v8451_v56 = vld [vmem:[#allocation6 + $0x384] ss:$16 sps:$4 sm:$0xff]   ;;  %v8454_v57 = vld [vmem:[#allocation6 + $0x38c] ss:$16 sps:$4 sm:$0xff]   ;;  %v9848_v58 = vsub.s32 2, %v9826_v41 }
 0x1a8   :  { %v8449_v59 = vld [vmem:[#allocation6 + $0x380] ss:$16 sps:$4 sm:$0xff]   ;;  %v8452_v60 = vld [vmem:[#allocation6 + $0x388] ss:$16 sps:$4 sm:$0xff]   ;;  %v8457_v61 = vld [vmem:[#allocation6 + $0x3a4] ss:$16 sps:$4 sm:$0xff]  }
 0x1a9   :  { %1218 = vmatprep.mubr.bf16.mxu0 %v393_v2  ;;  %1300 = vmatprep.mubr.bf16.mxu1 %v393_v2  ;;  %v8460_v62 = vld [vmem:[#allocation6 + $0x3ac] ss:$16 sps:$4 sm:$0xff]   ;;  %v8458_v1 = vld [vmem:[#allocation6 + $0x3a8] ss:$16 sps:$4 sm:$0xff]   ;;  %v8463_v2 = vld [vmem:[#allocation6 + $0x3c4] ss:$16 sps:$4 sm:$0xff]  }
 0x1aa   :  { %1219 = vmatmul.mubr.bf16.vlgmr.msra.gmra.mrb[4].mxu0 %v392_v6  ;;  %1301 = vmatmul.mubr.bf16.vlgmr.msra.gmra.mrb[4].mxu1 %v392_v6  ;;  %v8466_v41 = vld [vmem:[#allocation6 + $0x3cc] ss:$16 sps:$4 sm:$0xff]   ;;  %v8469_v6 = vld [vmem:[#allocation6 + $0x3e4] ss:$16 sps:$4 sm:$0xff]  }
 0x1ab   :  { %1228 = vmatpush1.bf16.msra.mxu0 %v8377_v63  ;;  %1310 = vmatpush1.bf16.msra.mxu1 %v8380_v0  ;;  %v129_v63 = vrot.slane %v9828_v42, %v9848_v58  ;;  %v8455_v0 = vld [vmem:[#allocation6 + $0x3a0] ss:$16 sps:$4 sm:$0xff]  }
 0x1ac   :  { %1259 = vmatprep.mubr.bf16.mxu0 %v395_v9  ;;  %1341 = vmatprep.mubr.bf16.mxu1 %v395_v9  ;;  %v8467_v42 = vld [vmem:[#allocation6 + $0x3e0] ss:$16 sps:$4 sm:$0xff]   ;;  %v8470_v9 = vld [vmem:[#allocation6 + $0x3e8] ss:$16 sps:$4 sm:$0xff]  }
 0x1ad   :  { %1229 = vmatprep.subr.bf16.mxu0 %v8385_v4  ;;  %1311 = vmatprep.subr.bf16.mxu1 %v8388_v5  ;;  %v374_v3 = vadd.f32 %v9845_v49, %v129_v63  ;;  %v8461_v4 = vld [vmem:[#allocation6 + $0x3c0] ss:$16 sps:$4 sm:$0xff]   ;;  %v8464_v5 = vld [vmem:[#allocation6 + $0x3c8] ss:$16 sps:$4 sm:$0xff]   ;;  %v8544_v63 = vld [vmem:[#allocation6 + $0x56c] ss:$16 sps:$4 sm:$0xff]  }
 0x1ae   :  { %v8473_v49 = vld [vmem:[#allocation6 + $0x400] ss:$16 sps:$4 sm:$0xff]  }
 0x1af   :  { %1230 = vmatpush1.bf16.msra.mxu0 %v8383_v7  ;;  %1312 = vmatpush1.bf16.msra.mxu1 %v8386_v8  ;;  %v8472_v7 = vld [vmem:[#allocation6 + $0x3ec] ss:$16 sps:$4 sm:$0xff]   ;;  %v386_v8 = vmul.f32 0.2, %v374_v3  ;;  %vm382_vm5 = vcmp.ge.f32.partialorder %v374_v3, 0.0 }
 0x1b0   :  { %1231 = vmatprep.subr.bf16.mxu0 %v8391_v10  ;;  %1313 = vmatprep.subr.bf16.mxu1 %v8394_v11  ;;  %v8475_v10 = vld [vmem:[#allocation6 + $0x404] ss:$16 sps:$4 sm:$0xff]   ;;  %v8478_v11 = vld [vmem:[#allocation6 + $0x40c] ss:$16 sps:$4 sm:$0xff]  }
 0x1b3   :  { %1232 = vmatpush1.bf16.msra.mxu0 %v8389_v12  ;;  %1314 = vmatpush1.bf16.msra.mxu1 %v8392_v13  ;;  %v390_v12 = vsel %vm382_vm5, %v374_v3, %v386_v8  ;;  %v8476_v13 = vld [vmem:[#allocation6 + $0x408] ss:$16 sps:$4 sm:$0xff]   ;;  %v8545_v3 = vld [vmem:[#allocation6 + $0x580] ss:$16 sps:$4 sm:$0xff]  }
 0x1b4   :  { %1233 = vmatprep.subr.bf16.mxu0 %v8397_v14  ;;  %1315 = vmatprep.subr.bf16.mxu1 %v8400_v15  ;;  %v394_v14 = vpack.c.bf16 %v390_v12, %v390_v12  ;;  %v8481_v15 = vld [vmem:[#allocation6 + $0x424] ss:$16 sps:$4 sm:$0xff]   ;;  %v8554_v8 = vld [vmem:[#allocation6 + $0x5a8] ss:$16 sps:$4 sm:$0xff]  }
 0x1b5   :  { %v8565_v12 = vld [vmem:[#allocation6 + $0x5e4] ss:$16 sps:$4 sm:$0xff]  }
 0x1b7   :  { %1234 = vmatpush1.bf16.msra.mxu0 %v8395_v16  ;;  %1316 = vmatpush1.bf16.msra.mxu1 %v8398_v17  ;;  %v8484_v16 = vld [vmem:[#allocation6 + $0x42c] ss:$16 sps:$4 sm:$0xff]   ;;  %v8479_v17 = vld [vmem:[#allocation6 + $0x420] ss:$16 sps:$4 sm:$0xff]  }
 0x1b8   :  { %1235 = vmatprep.subr.bf16.mxu0 %v8403_v18  ;;  %1317 = vmatprep.subr.bf16.mxu1 %v8406_v19  ;;  %v8482_v18 = vld [vmem:[#allocation6 + $0x428] ss:$16 sps:$4 sm:$0xff]   ;;  %v8487_v19 = vld [vmem:[#allocation6 + $0x444] ss:$16 sps:$4 sm:$0xff]  }
 0x1bb   :  { %1236 = vmatpush1.bf16.msra.mxu0 %v8401_v20  ;;  %1318 = vmatpush1.bf16.msra.mxu1 %v8404_v21  ;;  %v8490_v20 = vld [vmem:[#allocation6 + $0x44c] ss:$16 sps:$4 sm:$0xff]   ;;  %v8485_v21 = vld [vmem:[#allocation6 + $0x440] ss:$16 sps:$4 sm:$0xff]  }
 0x1bc   :  { %1237 = vmatprep.subr.bf16.mxu0 %v8409_v22  ;;  %1319 = vmatprep.subr.bf16.mxu1 %v8412_v23  ;;  %v8488_v22 = vld [vmem:[#allocation6 + $0x448] ss:$16 sps:$4 sm:$0xff]   ;;  %v8493_v23 = vld [vmem:[#allocation6 + $0x464] ss:$16 sps:$4 sm:$0xff]  }
 0x1bf   :  { %1238 = vmatpush1.bf16.msra.mxu0 %v8407_v24  ;;  %1320 = vmatpush1.bf16.msra.mxu1 %v8410_v25  ;;  %v8496_v24 = vld [vmem:[#allocation6 + $0x46c] ss:$16 sps:$4 sm:$0xff]   ;;  %v8491_v25 = vld [vmem:[#allocation6 + $0x460] ss:$16 sps:$4 sm:$0xff]  }
 0x1c0   :  { %1239 = vmatprep.subr.bf16.mxu0 %v8415_v26  ;;  %1321 = vmatprep.subr.bf16.mxu1 %v8418_v27  ;;  %v8494_v26 = vld [vmem:[#allocation6 + $0x468] ss:$16 sps:$4 sm:$0xff]   ;;  %v8499_v27 = vld [vmem:[#allocation6 + $0x484] ss:$16 sps:$4 sm:$0xff]  }
 0x1c3   :  { %1240 = vmatpush1.bf16.msra.mxu0 %v8413_v28  ;;  %1322 = vmatpush1.bf16.msra.mxu1 %v8416_v29  ;;  %v8502_v28 = vld [vmem:[#allocation6 + $0x48c] ss:$16 sps:$4 sm:$0xff]   ;;  %v8497_v29 = vld [vmem:[#allocation6 + $0x480] ss:$16 sps:$4 sm:$0xff]  }
 0x1c4   :  { %1241 = vmatprep.subr.bf16.mxu0 %v8421_v30  ;;  %1323 = vmatprep.subr.bf16.mxu1 %v8424_v31  ;;  %v8500_v30 = vld [vmem:[#allocation6 + $0x488] ss:$16 sps:$4 sm:$0xff]   ;;  %v8505_v31 = vld [vmem:[#allocation6 + $0x4a4] ss:$16 sps:$4 sm:$0xff]  }
 0x1c7   :  { %1242 = vmatpush1.bf16.msra.mxu0 %v8419_v32  ;;  %1324 = vmatpush1.bf16.msra.mxu1 %v8422_v33  ;;  %v8508_v32 = vld [vmem:[#allocation6 + $0x4ac] ss:$16 sps:$4 sm:$0xff]   ;;  %v8503_v33 = vld [vmem:[#allocation6 + $0x4a0] ss:$16 sps:$4 sm:$0xff]  }
 0x1c8   :  { %1243 = vmatprep.subr.bf16.mxu0 %v8427_v34  ;;  %1325 = vmatprep.subr.bf16.mxu1 %v8430_v35  ;;  %v8506_v34 = vld [vmem:[#allocation6 + $0x4a8] ss:$16 sps:$4 sm:$0xff]   ;;  %v8511_v35 = vld [vmem:[#allocation6 + $0x4c4] ss:$16 sps:$4 sm:$0xff]  }
 0x1cb   :  { %1244 = vmatpush1.bf16.msra.mxu0 %v8425_v37  ;;  %1326 = vmatpush1.bf16.msra.mxu1 %v8428_v38  ;;  %v8514_v37 = vld [vmem:[#allocation6 + $0x4cc] ss:$16 sps:$4 sm:$0xff]   ;;  %v8509_v38 = vld [vmem:[#allocation6 + $0x4c0] ss:$16 sps:$4 sm:$0xff]  }
 0x1cc   :  { %1245 = vmatprep.subr.bf16.mxu0 %v8433_v39  ;;  %1327 = vmatprep.subr.bf16.mxu1 %v8436_v40  ;;  %v8512_v39 = vld [vmem:[#allocation6 + $0x4c8] ss:$16 sps:$4 sm:$0xff]   ;;  %v8517_v40 = vld [vmem:[#allocation6 + $0x4e4] ss:$16 sps:$4 sm:$0xff]  }
 0x1cf   :  { %1246 = vmatpush1.bf16.msra.mxu0 %v8431_v46  ;;  %1328 = vmatpush1.bf16.msra.mxu1 %v8434_v47  ;;  %v8520_v46 = vld [vmem:[#allocation6 + $0x4ec] ss:$16 sps:$4 sm:$0xff]   ;;  %v8515_v47 = vld [vmem:[#allocation6 + $0x4e0] ss:$16 sps:$4 sm:$0xff]  }
 0x1d0   :  { %1247 = vmatprep.subr.bf16.mxu0 %v8439_v36  ;;  %1329 = vmatprep.subr.bf16.mxu1 %v8442_v48  ;;  %v8518_v36 = vld [vmem:[#allocation6 + $0x4e8] ss:$16 sps:$4 sm:$0xff]   ;;  %v8523_v48 = vld [vmem:[#allocation6 + $0x504] ss:$16 sps:$4 sm:$0xff]  }
 0x1d3   :  { %1248 = vmatpush1.bf16.msra.mxu0 %v8437_v50  ;;  %1330 = vmatpush1.bf16.msra.mxu1 %v8440_v51  ;;  %v8526_v50 = vld [vmem:[#allocation6 + $0x50c] ss:$16 sps:$4 sm:$0xff]   ;;  %v8521_v51 = vld [vmem:[#allocation6 + $0x500] ss:$16 sps:$4 sm:$0xff]  }
 0x1d4   :  { %1249 = vmatprep.subr.bf16.mxu0 %v8445_v52  ;;  %1331 = vmatprep.subr.bf16.mxu1 %v8448_v53  ;;  %v8524_v52 = vld [vmem:[#allocation6 + $0x508] ss:$16 sps:$4 sm:$0xff]   ;;  %v8529_v53 = vld [vmem:[#allocation6 + $0x524] ss:$16 sps:$4 sm:$0xff]  }
 0x1d7   :  { %1250 = vmatpush1.bf16.msra.mxu0 %v8443_v54  ;;  %1332 = vmatpush1.bf16.msra.mxu1 %v8446_v55  ;;  %v8532_v54 = vld [vmem:[#allocation6 + $0x52c] ss:$16 sps:$4 sm:$0xff]   ;;  %v8527_v55 = vld [vmem:[#allocation6 + $0x520] ss:$16 sps:$4 sm:$0xff]  }
 0x1d8   :  { %1251 = vmatprep.subr.bf16.mxu0 %v8451_v56  ;;  %1333 = vmatprep.subr.bf16.mxu1 %v8454_v57  ;;  %v8530_v56 = vld [vmem:[#allocation6 + $0x528] ss:$16 sps:$4 sm:$0xff]   ;;  %v8535_v57 = vld [vmem:[#allocation6 + $0x544] ss:$16 sps:$4 sm:$0xff]  }
 0x1db   :  { %1252 = vmatpush1.bf16.msra.mxu0 %v8449_v59  ;;  %1334 = vmatpush1.bf16.msra.mxu1 %v8452_v60  ;;  %v8538_v59 = vld [vmem:[#allocation6 + $0x54c] ss:$16 sps:$4 sm:$0xff]   ;;  %v8533_v60 = vld [vmem:[#allocation6 + $0x540] ss:$16 sps:$4 sm:$0xff]  }
 0x1dc   :  { %1253 = vmatprep.subr.bf16.mxu0 %v8457_v61  ;;  %1335 = vmatprep.subr.bf16.mxu1 %v8460_v62  ;;  %v8536_v61 = vld [vmem:[#allocation6 + $0x548] ss:$16 sps:$4 sm:$0xff]   ;;  %v8541_v62 = vld [vmem:[#allocation6 + $0x564] ss:$16 sps:$4 sm:$0xff]  }
 0x1df   :  { %1254 = vmatpush1.bf16.msra.mxu0 %v8455_v0  ;;  %1336 = vmatpush1.bf16.msra.mxu1 %v8458_v1  ;;  %v8539_v0 = vld [vmem:[#allocation6 + $0x560] ss:$16 sps:$4 sm:$0xff]   ;;  %v8542_v1 = vld [vmem:[#allocation6 + $0x568] ss:$16 sps:$4 sm:$0xff]  }
 0x1e0   :  { %1255 = vmatprep.subr.bf16.mxu0 %v8463_v2  ;;  %1337 = vmatprep.subr.bf16.mxu1 %v8466_v41  ;;  %v8547_v2 = vld [vmem:[#allocation6 + $0x584] ss:$16 sps:$4 sm:$0xff]   ;;  %v8550_v41 = vld [vmem:[#allocation6 + $0x58c] ss:$16 sps:$4 sm:$0xff]  }
 0x1e3   :  { %1256 = vmatpush1.bf16.msra.mxu0 %v8461_v4  ;;  %1338 = vmatpush1.bf16.msra.mxu1 %v8464_v5  ;;  %v8548_v4 = vld [vmem:[#allocation6 + $0x588] ss:$16 sps:$4 sm:$0xff]   ;;  %v8553_v5 = vld [vmem:[#allocation6 + $0x5a4] ss:$16 sps:$4 sm:$0xff]  }
 0x1e4   :  { %1257 = vmatprep.subr.bf16.mxu0 %v8469_v6  ;;  %1339 = vmatprep.subr.bf16.mxu1 %v8472_v7  ;;  %v8556_v6 = vld [vmem:[#allocation6 + $0x5ac] ss:$16 sps:$4 sm:$0xff]   ;;  %v8551_v7 = vld [vmem:[#allocation6 + $0x5a0] ss:$16 sps:$4 sm:$0xff]  }
 0x1e7   :  { %1258 = vmatpush1.bf16.msra.mxu0 %v8467_v42  ;;  %1340 = vmatpush1.bf16.msra.mxu1 %v8470_v9  ;;  %v8559_v42 = vld [vmem:[#allocation6 + $0x5c4] ss:$16 sps:$4 sm:$0xff]   ;;  %v8562_v9 = vld [vmem:[#allocation6 + $0x5cc] ss:$16 sps:$4 sm:$0xff]  }
 0x1e8   :  { %2158 = vmatprep.subr.bf16.mxu0 %v8475_v10  ;;  %2240 = vmatprep.subr.bf16.mxu1 %v8478_v11  ;;  %v8557_v10 = vld [vmem:[#allocation6 + $0x5c0] ss:$16 sps:$4 sm:$0xff]   ;;  %v8560_v11 = vld [vmem:[#allocation6 + $0x5c8] ss:$16 sps:$4 sm:$0xff]  }
 0x1ea   :  { %1260 = vmatmul.mubr.bf16.vlgmr.msra.gmra.mrb[4].mxu0 %v394_v14  ;;  %1342 = vmatmul.mubr.bf16.vlgmr.msra.gmra.mrb[4].mxu1 %v394_v14  ;;  %v8566_v14 = vld [vmem:[#allocation6 + $0x5e8] ss:$16 sps:$4 sm:$0xff]  }
 0x1eb   :  { %2159 = vmatpush1.bf16.msra.mxu0 %v8473_v49  ;;  %2241 = vmatpush1.bf16.msra.mxu1 %v8476_v13  ;;  %v8568_v49 = vld [vmem:[#allocation6 + $0x5ec] ss:$16 sps:$4 sm:$0xff]   ;;  %v8563_v13 = vld [vmem:[#allocation6 + $0x5e0] ss:$16 sps:$4 sm:$0xff]  }
 0x1ec   :  { %2160 = vmatprep.subr.bf16.mxu0 %v8481_v15  ;;  %2242 = vmatprep.subr.bf16.mxu1 %v8484_v16  ;;  %v8571_v15 = vld [vmem:[#allocation6 + $0x604] ss:$16 sps:$4 sm:$0xff]   ;;  %v8574_v16 = vld [vmem:[#allocation6 + $0x60c] ss:$16 sps:$4 sm:$0xff]  }
 0x1ef   :  { %2161 = vmatpush1.bf16.msra.mxu0 %v8479_v17  ;;  %2243 = vmatpush1.bf16.msra.mxu1 %v8482_v18  ;;  %v9853_v17 = vld [vmem:[#allocation7] sm:$0xf] }
 0x1f0   :  { %2162 = vmatprep.subr.bf16.mxu0 %v8487_v19  ;;  %2244 = vmatprep.subr.bf16.mxu1 %v8490_v20  ;;  %v529_v18 = vrot.slane %v9853_v17, %v9831_v43  ;;  %v533_v19 = vrot.slane %v9853_v17, %v9834_v44  ;;  %v541_v20 = vrot.slane %v9853_v17, %v9837_v45 }
 0x1f3   :  { %2163 = vmatpush1.bf16.msra.mxu0 %v8485_v21  ;;  %2245 = vmatpush1.bf16.msra.mxu1 %v8488_v22 }
 0x1f4   :  { %2164 = vmatprep.subr.bf16.mxu0 %v8493_v23  ;;  %2246 = vmatprep.subr.bf16.mxu1 %v8496_v24 }
 0x1f7   :  { %2165 = vmatpush1.bf16.msra.mxu0 %v8491_v25  ;;  %2247 = vmatpush1.bf16.msra.mxu1 %v8494_v26 }
 0x1f8   :  { %2166 = vmatprep.subr.bf16.mxu0 %v8499_v27  ;;  %2248 = vmatprep.subr.bf16.mxu1 %v8502_v28 }
 0x1fb   :  { %2167 = vmatpush1.bf16.msra.mxu0 %v8497_v29  ;;  %2249 = vmatpush1.bf16.msra.mxu1 %v8500_v30 }
 0x1fc   :  { %2168 = vmatprep.subr.bf16.mxu0 %v8505_v31  ;;  %2250 = vmatprep.subr.bf16.mxu1 %v8508_v32 }
 0x1ff   :  { %2169 = vmatpush1.bf16.msra.mxu0 %v8503_v33  ;;  %2251 = vmatpush1.bf16.msra.mxu1 %v8506_v34 }
 0x200   :  { %2170 = vmatprep.subr.bf16.mxu0 %v8511_v35  ;;  %2252 = vmatprep.subr.bf16.mxu1 %v8514_v37 }
 0x203   :  { %2171 = vmatpush1.bf16.msra.mxu0 %v8509_v38  ;;  %2253 = vmatpush1.bf16.msra.mxu1 %v8512_v39  ;;  %v8569_v39 = vld [vmem:[#allocation6 + $0x600] ss:$16 sps:$4 sm:$0xff]  }
 0x204   :  { %2172 = vmatprep.subr.bf16.mxu0 %v8517_v40  ;;  %2254 = vmatprep.subr.bf16.mxu1 %v8520_v46  ;;  %v8572_v40 = vld [vmem:[#allocation6 + $0x608] ss:$16 sps:$4 sm:$0xff]  }
 0x207   :  { %2173 = vmatpush1.bf16.msra.mxu0 %v8515_v47  ;;  %2255 = vmatpush1.bf16.msra.mxu1 %v8518_v36  ;;  %v8577_v36 = vld [vmem:[#allocation6 + $0x624] ss:$16 sps:$4 sm:$0xff]  }
 0x208   :  { %2174 = vmatprep.subr.bf16.mxu0 %v8523_v48  ;;  %2256 = vmatprep.subr.bf16.mxu1 %v8526_v50  ;;  %v8580_v48 = vld [vmem:[#allocation6 + $0x62c] ss:$16 sps:$4 sm:$0xff]  }
 0x20b   :  { %2175 = vmatpush1.bf16.msra.mxu0 %v8521_v51  ;;  %2257 = vmatpush1.bf16.msra.mxu1 %v8524_v52  ;;  %v8575_v51 = vld [vmem:[#allocation6 + $0x620] ss:$16 sps:$4 sm:$0xff]   ;;  %v8578_v52 = vld [vmem:[#allocation6 + $0x628] ss:$16 sps:$4 sm:$0xff]  }
 0x20c   :  { %2176 = vmatprep.subr.bf16.mxu0 %v8529_v53  ;;  %2258 = vmatprep.subr.bf16.mxu1 %v8532_v54  ;;  %v8583_v53 = vld [vmem:[#allocation6 + $0x644] ss:$16 sps:$4 sm:$0xff]   ;;  %v8586_v54 = vld [vmem:[#allocation6 + $0x64c] ss:$16 sps:$4 sm:$0xff]  }
 0x20f   :  { %2177 = vmatpush1.bf16.msra.mxu0 %v8527_v55  ;;  %2259 = vmatpush1.bf16.msra.mxu1 %v8530_v56  ;;  %v8581_v55 = vld [vmem:[#allocation6 + $0x640] ss:$16 sps:$4 sm:$0xff]   ;;  %v8584_v56 = vld [vmem:[#allocation6 + $0x648] ss:$16 sps:$4 sm:$0xff]  }
 0x210   :  { %2178 = vmatprep.subr.bf16.mxu0 %v8535_v57  ;;  %2260 = vmatprep.subr.bf16.mxu1 %v8538_v59  ;;  %v8589_v57 = vld [vmem:[#allocation6 + $0x664] ss:$16 sps:$4 sm:$0xff]   ;;  %v8592_v59 = vld [vmem:[#allocation6 + $0x66c] ss:$16 sps:$4 sm:$0xff]  }
 0x213   :  { %2179 = vmatpush1.bf16.msra.mxu0 %v8533_v60  ;;  %2261 = vmatpush1.bf16.msra.mxu1 %v8536_v61  ;;  %v8587_v60 = vld [vmem:[#allocation6 + $0x660] ss:$16 sps:$4 sm:$0xff]   ;;  %v8590_v61 = vld [vmem:[#allocation6 + $0x668] ss:$16 sps:$4 sm:$0xff]  }
 0x214   :  { %2180 = vmatprep.subr.bf16.mxu0 %v8541_v62  ;;  %2262 = vmatprep.subr.bf16.mxu1 %v8544_v63  ;;  %v8595_v62 = vld [vmem:[#allocation6 + $0x684] ss:$16 sps:$4 sm:$0xff]   ;;  %v8598_v63 = vld [vmem:[#allocation6 + $0x68c] ss:$16 sps:$4 sm:$0xff]  }
 0x217   :  { %2181 = vmatpush1.bf16.msra.mxu0 %v8539_v0  ;;  %2263 = vmatpush1.bf16.msra.mxu1 %v8542_v1  ;;  %v8593_v0 = vld [vmem:[#allocation6 + $0x680] ss:$16 sps:$4 sm:$0xff]   ;;  %v8596_v1 = vld [vmem:[#allocation6 + $0x688] ss:$16 sps:$4 sm:$0xff]  }
 0x218   :  { %2182 = vmatprep.subr.bf16.mxu0 %v8547_v2  ;;  %2264 = vmatprep.subr.bf16.mxu1 %v8550_v41  ;;  %v8601_v2 = vld [vmem:[#allocation6 + $0x6a4] ss:$16 sps:$4 sm:$0xff]   ;;  %v8604_v41 = vld [vmem:[#allocation6 + $0x6ac] ss:$16 sps:$4 sm:$0xff]  }
 0x21b   :  { %2183 = vmatpush1.bf16.msra.mxu0 %v8545_v3  ;;  %2265 = vmatpush1.bf16.msra.mxu1 %v8548_v4  ;;  %v8599_v3 = vld [vmem:[#allocation6 + $0x6a0] ss:$16 sps:$4 sm:$0xff]   ;;  %v8602_v4 = vld [vmem:[#allocation6 + $0x6a8] ss:$16 sps:$4 sm:$0xff]  }
 0x21c   :  { %2184 = vmatprep.subr.bf16.mxu0 %v8553_v5  ;;  %2266 = vmatprep.subr.bf16.mxu1 %v8556_v6  ;;  %v8607_v5 = vld [vmem:[#allocation6 + $0x6c4] ss:$16 sps:$4 sm:$0xff]   ;;  %v8610_v6 = vld [vmem:[#allocation6 + $0x6cc] ss:$16 sps:$4 sm:$0xff]  }
 0x21f   :  { %2185 = vmatpush1.bf16.msra.mxu0 %v8551_v7  ;;  %2267 = vmatpush1.bf16.msra.mxu1 %v8554_v8  ;;  %v8605_v7 = vld [vmem:[#allocation6 + $0x6c0] ss:$16 sps:$4 sm:$0xff]   ;;  %v8608_v8 = vld [vmem:[#allocation6 + $0x6c8] ss:$16 sps:$4 sm:$0xff]  }
 0x220   :  { %2186 = vmatprep.subr.bf16.mxu0 %v8559_v42  ;;  %2268 = vmatprep.subr.bf16.mxu1 %v8562_v9  ;;  %v8613_v42 = vld [vmem:[#allocation6 + $0x6e4] ss:$16 sps:$4 sm:$0xff]   ;;  %v8616_v9 = vld [vmem:[#allocation6 + $0x6ec] ss:$16 sps:$4 sm:$0xff]  }
 0x223   :  { %2187 = vmatpush1.bf16.msra.mxu0 %v8557_v10  ;;  %2269 = vmatpush1.bf16.msra.mxu1 %v8560_v11  ;;  %v8611_v10 = vld [vmem:[#allocation6 + $0x6e0] ss:$16 sps:$4 sm:$0xff]   ;;  %v8614_v11 = vld [vmem:[#allocation6 + $0x6e8] ss:$16 sps:$4 sm:$0xff]  }
 0x224   :  { %2188 = vmatprep.subr.bf16.mxu0 %v8565_v12  ;;  %2270 = vmatprep.subr.bf16.mxu1 %v8568_v49  ;;  %v8619_v12 = vld [vmem:[#allocation6 + $0x704] ss:$16 sps:$4 sm:$0xff]   ;;  %v8622_v49 = vld [vmem:[#allocation6 + $0x70c] ss:$16 sps:$4 sm:$0xff]  }
 0x227   :  { %2189 = vmatpush1.bf16.msra.mxu0 %v8563_v13  ;;  %2271 = vmatpush1.bf16.msra.mxu1 %v8566_v14  ;;  %v8617_v13 = vld [vmem:[#allocation6 + $0x700] ss:$16 sps:$4 sm:$0xff]   ;;  %v8620_v14 = vld [vmem:[#allocation6 + $0x708] ss:$16 sps:$4 sm:$0xff]  }
 0x228   :  { %2199 = vmatprep.subr.bf16.mxu0 %v8571_v15  ;;  %2281 = vmatprep.subr.bf16.mxu1 %v8574_v16  ;;  %v8625_v15 = vld [vmem:[#allocation6 + $0x724] ss:$16 sps:$4 sm:$0xff]   ;;  %v8628_v16 = vld [vmem:[#allocation6 + $0x72c] ss:$16 sps:$4 sm:$0xff]  }
 0x2bd   :  { %v1261_v21 = vpop.f32.mrb[4].mxu0  ;;  %v9861_v22 = vpop.f32.mrb[4].mxu1 }
 0x2be   :  { %v8138_v23 = vadd.f32 %v1261_v21, %v529_v18  ;;  %v1263_v24 = vpop.f32.mrb[5].mxu0  ;;  %v1345_v25 = vpop.f32.mrb[5].mxu1  ;;  %v8623_v18 = vld [vmem:[#allocation6 + $0x720] ss:$16 sps:$4 sm:$0xff]   ;;  %v8634_v21 = vld [vmem:[#allocation6 + $0x74c] ss:$16 sps:$4 sm:$0xff]  }
 0x2bf   :  { %v8139_v26 = vadd.f32 %v1263_v24, %v533_v19  ;;  %v8141_v27 = vadd.f32 %v1345_v25, %v541_v20  ;;  %v1265_v28 = vpop.f32.mrb[6].mxu0  ;;  %v1347_v29 = vpop.f32.mrb[6].mxu1  ;;  %v8626_v19 = vld [vmem:[#allocation6 + $0x728] ss:$16 sps:$4 sm:$0xff]   ;;  %v8631_v20 = vld [vmem:[#allocation6 + $0x744] ss:$16 sps:$4 sm:$0xff]  }
 0x2c0   :  { %vm1350_vm6 = vcmp.ge.f32.partialorder %v8138_v23, 0.0  ;;  %v1354_v30 = vmul.f32 0.2, %v8138_v23  ;;  %v1266_v34 = vpop.f32.mrb[7].mxu0  ;;  %v1348_v35 = vpop.f32.mrb[7].mxu1 }
 0x2c1   :  { %vm1351_vm7 = vcmp.ge.f32.partialorder %v8139_v26, 0.0  ;;  %v1355_v31 = vmul.f32 0.2, %v8139_v26  ;;  %vm1353_vm8 = vcmp.ge.f32.partialorder %v8141_v27, 0.0  ;;  %v1357_v32 = vmul.f32 0.2, %v8141_v27 }
 0x2c2   :  { %v1358_v33 = vsel %vm1350_vm6, %v8138_v23, %v1354_v30  ;;  %v8629_v23 = vld [vmem:[#allocation6 + $0x740] ss:$16 sps:$4 sm:$0xff]   ;;  %v8632_v24 = vld [vmem:[#allocation6 + $0x748] ss:$16 sps:$4 sm:$0xff]   ;;  %v8637_v25 = vld [vmem:[#allocation6 + $0x764] ss:$16 sps:$4 sm:$0xff]   ;;  %v537_v35 = vrot.slane %v9853_v17, %v9848_v58 }
 0x2c3   :  { %v1359_v37 = vsel %vm1351_vm7, %v8139_v26, %v1355_v31  ;;  %v1361_v46 = vsel %vm1353_vm8, %v8141_v27, %v1357_v32  ;;  %v1362_v47 = vpack.c.bf16 %v1358_v33, %v1358_v33  ;;  %v8640_v26 = vld [vmem:[#allocation6 + $0x76c] ss:$16 sps:$4 sm:$0xff]   ;;  %v8635_v27 = vld [vmem:[#allocation6 + $0x760] ss:$16 sps:$4 sm:$0xff]   ;;  %v8638_v28 = vld [vmem:[#allocation6 + $0x768] ss:$16 sps:$4 sm:$0xff]  }
 0x2c4   :  { %v1363_v38 = vpack.c.bf16 %v1359_v37, %v1359_v37  ;;  %v1365_v50 = vpack.c.bf16 %v1361_v46, %v1361_v46  ;;  %v8643_v29 = vld [vmem:[#allocation6 + $0x784] ss:$16 sps:$4 sm:$0xff]   ;;  %v8646_v30 = vld [vmem:[#allocation6 + $0x78c] ss:$16 sps:$4 sm:$0xff]   ;;  %v8641_v31 = vld [vmem:[#allocation6 + $0x780] ss:$16 sps:$4 sm:$0xff]   ;;  %v8140_v46 = vadd.f32 %v9861_v22, %v537_v35 }
 0x2c5   :  { %v8644_v32 = vld [vmem:[#allocation6 + $0x788] ss:$16 sps:$4 sm:$0xff]   ;;  %v8649_v33 = vld [vmem:[#allocation6 + $0x7a4] ss:$16 sps:$4 sm:$0xff]   ;;  %v8652_v34 = vld [vmem:[#allocation6 + $0x7ac] ss:$16 sps:$4 sm:$0xff]  }
 0x2c6   :  { %2190 = vmatprep.mubr.bf16.mxu0 %v1363_v38  ;;  %2272 = vmatprep.mubr.bf16.mxu1 %v1363_v38  ;;  %v8647_v37 = vld [vmem:[#allocation6 + $0x7a0] ss:$16 sps:$4 sm:$0xff]   ;;  %v8650_v38 = vld [vmem:[#allocation6 + $0x7a8] ss:$16 sps:$4 sm:$0xff]   ;;  %vm1352_vm9 = vcmp.ge.f32.partialorder %v8140_v46, 0.0 }
 0x2c7   :  { %2191 = vmatmul.mubr.bf16.vlgmr.msra.gmra.mrb[8].mxu0 %v1362_v47  ;;  %2273 = vmatmul.mubr.bf16.vlgmr.msra.gmra.mrb[8].mxu1 %v1362_v47  ;;  %v8653_v47 = vld [vmem:[#allocation6 + $0x7c0] ss:$16 sps:$4 sm:$0xff]   ;;  %v8736_v35 = vld [vmem:[#allocation6 + $0x96c] ss:$16 sps:$4 sm:$0xff]  }
 0x2c8   :  { %2200 = vmatpush1.bf16.msra.mxu0 %v8569_v39  ;;  %2282 = vmatpush1.bf16.msra.mxu1 %v8572_v40  ;;  %v8655_v39 = vld [vmem:[#allocation6 + $0x7c4] ss:$16 sps:$4 sm:$0xff]   ;;  %v8658_v40 = vld [vmem:[#allocation6 + $0x7cc] ss:$16 sps:$4 sm:$0xff]   ;;  %v8659_v17 = vld [vmem:[#allocation6 + $0x7e0] ss:$16 sps:$4 sm:$0xff]  }
 0x2c9   :  { %2231 = vmatprep.mubr.bf16.mxu0 %v1365_v50  ;;  %2313 = vmatprep.mubr.bf16.mxu1 %v1365_v50  ;;  %v8664_v50 = vld [vmem:[#allocation6 + $0x7ec] ss:$16 sps:$4 sm:$0xff]   ;;  %v8665_v22 = vld [vmem:[#allocation6 + $0x800] ss:$16 sps:$4 sm:$0xff]  }
 0x2ca   :  { %2201 = vmatprep.subr.bf16.mxu0 %v8577_v36  ;;  %2283 = vmatprep.subr.bf16.mxu1 %v8580_v48  ;;  %v8656_v36 = vld [vmem:[#allocation6 + $0x7c8] ss:$16 sps:$4 sm:$0xff]   ;;  %v8661_v48 = vld [vmem:[#allocation6 + $0x7e4] ss:$16 sps:$4 sm:$0xff]  }
 0x2cc   :  { %2202 = vmatpush1.bf16.msra.mxu0 %v8575_v51  ;;  %2284 = vmatpush1.bf16.msra.mxu1 %v8578_v52  ;;  %v1356_v51 = vmul.f32 0.2, %v8140_v46  ;;  %v8662_v52 = vld [vmem:[#allocation6 + $0x7e8] ss:$16 sps:$4 sm:$0xff]  }
 0x2cd   :  { %2203 = vmatprep.subr.bf16.mxu0 %v8583_v53  ;;  %2285 = vmatprep.subr.bf16.mxu1 %v8586_v54  ;;  %v8667_v53 = vld [vmem:[#allocation6 + $0x804] ss:$16 sps:$4 sm:$0xff]   ;;  %v8670_v54 = vld [vmem:[#allocation6 + $0x80c] ss:$16 sps:$4 sm:$0xff]  }
 0x2d0   :  { %2204 = vmatpush1.bf16.msra.mxu0 %v8581_v55  ;;  %2286 = vmatpush1.bf16.msra.mxu1 %v8584_v56  ;;  %v1360_v55 = vsel %vm1352_vm9, %v8140_v46, %v1356_v51  ;;  %v8668_v56 = vld [vmem:[#allocation6 + $0x808] ss:$16 sps:$4 sm:$0xff]   ;;  %v8737_v46 = vld [vmem:[#allocation6 + $0x980] ss:$16 sps:$4 sm:$0xff]  }
 0x2d1   :  { %2205 = vmatprep.subr.bf16.mxu0 %v8589_v57  ;;  %2287 = vmatprep.subr.bf16.mxu1 %v8592_v59  ;;  %v1364_v57 = vpack.c.bf16 %v1360_v55, %v1360_v55  ;;  %v8673_v59 = vld [vmem:[#allocation6 + $0x824] ss:$16 sps:$4 sm:$0xff]   ;;  %v8746_v51 = vld [vmem:[#allocation6 + $0x9a8] ss:$16 sps:$4 sm:$0xff]  }
 0x2d2   :  { %v8757_v55 = vld [vmem:[#allocation6 + $0x9e4] ss:$16 sps:$4 sm:$0xff]  }
 0x2d4   :  { %2206 = vmatpush1.bf16.msra.mxu0 %v8587_v60  ;;  %2288 = vmatpush1.bf16.msra.mxu1 %v8590_v61  ;;  %v8676_v60 = vld [vmem:[#allocation6 + $0x82c] ss:$16 sps:$4 sm:$0xff]   ;;  %v8671_v61 = vld [vmem:[#allocation6 + $0x820] ss:$16 sps:$4 sm:$0xff]  }
 0x2d5   :  { %2207 = vmatprep.subr.bf16.mxu0 %v8595_v62  ;;  %2289 = vmatprep.subr.bf16.mxu1 %v8598_v63  ;;  %v8674_v62 = vld [vmem:[#allocation6 + $0x828] ss:$16 sps:$4 sm:$0xff]   ;;  %v8679_v63 = vld [vmem:[#allocation6 + $0x844] ss:$16 sps:$4 sm:$0xff]  }
 0x2d8   :  { %2208 = vmatpush1.bf16.msra.mxu0 %v8593_v0  ;;  %2290 = vmatpush1.bf16.msra.mxu1 %v8596_v1  ;;  %v8682_v0 = vld [vmem:[#allocation6 + $0x84c] ss:$16 sps:$4 sm:$0xff]   ;;  %v8677_v1 = vld [vmem:[#allocation6 + $0x840] ss:$16 sps:$4 sm:$0xff]  }
 0x2d9   :  { %2209 = vmatprep.subr.bf16.mxu0 %v8601_v2  ;;  %2291 = vmatprep.subr.bf16.mxu1 %v8604_v41  ;;  %v8680_v2 = vld [vmem:[#allocation6 + $0x848] ss:$16 sps:$4 sm:$0xff]   ;;  %v8685_v41 = vld [vmem:[#allocation6 + $0x864] ss:$16 sps:$4 sm:$0xff]  }
 0x2dc   :  { %2210 = vmatpush1.bf16.msra.mxu0 %v8599_v3  ;;  %2292 = vmatpush1.bf16.msra.mxu1 %v8602_v4  ;;  %v8688_v3 = vld [vmem:[#allocation6 + $0x86c] ss:$16 sps:$4 sm:$0xff]   ;;  %v8683_v4 = vld [vmem:[#allocation6 + $0x860] ss:$16 sps:$4 sm:$0xff]  }
 0x2dd   :  { %2211 = vmatprep.subr.bf16.mxu0 %v8607_v5  ;;  %2293 = vmatprep.subr.bf16.mxu1 %v8610_v6  ;;  %v8686_v5 = vld [vmem:[#allocation6 + $0x868] ss:$16 sps:$4 sm:$0xff]   ;;  %v8691_v6 = vld [vmem:[#allocation6 + $0x884] ss:$16 sps:$4 sm:$0xff]  }
 0x2e0   :  { %2212 = vmatpush1.bf16.msra.mxu0 %v8605_v7  ;;  %2294 = vmatpush1.bf16.msra.mxu1 %v8608_v8  ;;  %v8694_v7 = vld [vmem:[#allocation6 + $0x88c] ss:$16 sps:$4 sm:$0xff]   ;;  %v8689_v8 = vld [vmem:[#allocation6 + $0x880] ss:$16 sps:$4 sm:$0xff]  }
 0x2e1   :  { %2213 = vmatprep.subr.bf16.mxu0 %v8613_v42  ;;  %2295 = vmatprep.subr.bf16.mxu1 %v8616_v9  ;;  %v8692_v42 = vld [vmem:[#allocation6 + $0x888] ss:$16 sps:$4 sm:$0xff]   ;;  %v8697_v9 = vld [vmem:[#allocation6 + $0x8a4] ss:$16 sps:$4 sm:$0xff]  }
 0x2e4   :  { %2214 = vmatpush1.bf16.msra.mxu0 %v8611_v10  ;;  %2296 = vmatpush1.bf16.msra.mxu1 %v8614_v11  ;;  %v8700_v10 = vld [vmem:[#allocation6 + $0x8ac] ss:$16 sps:$4 sm:$0xff]   ;;  %v8695_v11 = vld [vmem:[#allocation6 + $0x8a0] ss:$16 sps:$4 sm:$0xff]  }
 0x2e5   :  { %2215 = vmatprep.subr.bf16.mxu0 %v8619_v12  ;;  %2297 = vmatprep.subr.bf16.mxu1 %v8622_v49  ;;  %v8698_v12 = vld [vmem:[#allocation6 + $0x8a8] ss:$16 sps:$4 sm:$0xff]   ;;  %v8703_v49 = vld [vmem:[#allocation6 + $0x8c4] ss:$16 sps:$4 sm:$0xff]  }
 0x2e8   :  { %2216 = vmatpush1.bf16.msra.mxu0 %v8617_v13  ;;  %2298 = vmatpush1.bf16.msra.mxu1 %v8620_v14  ;;  %v8706_v13 = vld [vmem:[#allocation6 + $0x8cc] ss:$16 sps:$4 sm:$0xff]   ;;  %v8701_v14 = vld [vmem:[#allocation6 + $0x8c0] ss:$16 sps:$4 sm:$0xff]  }
 0x2e9   :  { %2217 = vmatprep.subr.bf16.mxu0 %v8625_v15  ;;  %2299 = vmatprep.subr.bf16.mxu1 %v8628_v16  ;;  %v8704_v15 = vld [vmem:[#allocation6 + $0x8c8] ss:$16 sps:$4 sm:$0xff]   ;;  %v8709_v16 = vld [vmem:[#allocation6 + $0x8e4] ss:$16 sps:$4 sm:$0xff]  }
 0x2ec   :  { %2218 = vmatpush1.bf16.msra.mxu0 %v8623_v18  ;;  %2300 = vmatpush1.bf16.msra.mxu1 %v8626_v19  ;;  %v8712_v18 = vld [vmem:[#allocation6 + $0x8ec] ss:$16 sps:$4 sm:$0xff]   ;;  %v8707_v19 = vld [vmem:[#allocation6 + $0x8e0] ss:$16 sps:$4 sm:$0xff]  }
 0x2ed   :  { %2219 = vmatprep.subr.bf16.mxu0 %v8631_v20  ;;  %2301 = vmatprep.subr.bf16.mxu1 %v8634_v21  ;;  %v8710_v20 = vld [vmem:[#allocation6 + $0x8e8] ss:$16 sps:$4 sm:$0xff]   ;;  %v8715_v21 = vld [vmem:[#allocation6 + $0x904] ss:$16 sps:$4 sm:$0xff]  }
 0x2f0   :  { %2220 = vmatpush1.bf16.msra.mxu0 %v8629_v23  ;;  %2302 = vmatpush1.bf16.msra.mxu1 %v8632_v24  ;;  %v8718_v23 = vld [vmem:[#allocation6 + $0x90c] ss:$16 sps:$4 sm:$0xff]   ;;  %v8713_v24 = vld [vmem:[#allocation6 + $0x900] ss:$16 sps:$4 sm:$0xff]  }
 0x2f1   :  { %2221 = vmatprep.subr.bf16.mxu0 %v8637_v25  ;;  %2303 = vmatprep.subr.bf16.mxu1 %v8640_v26  ;;  %v8716_v25 = vld [vmem:[#allocation6 + $0x908] ss:$16 sps:$4 sm:$0xff]   ;;  %v8721_v26 = vld [vmem:[#allocation6 + $0x924] ss:$16 sps:$4 sm:$0xff]  }
 0x2f4   :  { %2222 = vmatpush1.bf16.msra.mxu0 %v8635_v27  ;;  %2304 = vmatpush1.bf16.msra.mxu1 %v8638_v28  ;;  %v8724_v27 = vld [vmem:[#allocation6 + $0x92c] ss:$16 sps:$4 sm:$0xff]   ;;  %v8719_v28 = vld [vmem:[#allocation6 + $0x920] ss:$16 sps:$4 sm:$0xff]  }
 0x2f5   :  { %2223 = vmatprep.subr.bf16.mxu0 %v8643_v29  ;;  %2305 = vmatprep.subr.bf16.mxu1 %v8646_v30  ;;  %v8722_v29 = vld [vmem:[#allocation6 + $0x928] ss:$16 sps:$4 sm:$0xff]   ;;  %v8727_v30 = vld [vmem:[#allocation6 + $0x944] ss:$16 sps:$4 sm:$0xff]  }
 0x2f8   :  { %2224 = vmatpush1.bf16.msra.mxu0 %v8641_v31  ;;  %2306 = vmatpush1.bf16.msra.mxu1 %v8644_v32  ;;  %v8730_v31 = vld [vmem:[#allocation6 + $0x94c] ss:$16 sps:$4 sm:$0xff]   ;;  %v8725_v32 = vld [vmem:[#allocation6 + $0x940] ss:$16 sps:$4 sm:$0xff]  }
 0x2f9   :  { %2225 = vmatprep.subr.bf16.mxu0 %v8649_v33  ;;  %2307 = vmatprep.subr.bf16.mxu1 %v8652_v34  ;;  %v8728_v33 = vld [vmem:[#allocation6 + $0x948] ss:$16 sps:$4 sm:$0xff]   ;;  %v8733_v34 = vld [vmem:[#allocation6 + $0x964] ss:$16 sps:$4 sm:$0xff]  }
 0x2fc   :  { %2226 = vmatpush1.bf16.msra.mxu0 %v8647_v37  ;;  %2308 = vmatpush1.bf16.msra.mxu1 %v8650_v38  ;;  %v8731_v37 = vld [vmem:[#allocation6 + $0x960] ss:$16 sps:$4 sm:$0xff]   ;;  %v8734_v38 = vld [vmem:[#allocation6 + $0x968] ss:$16 sps:$4 sm:$0xff]  }
 0x2fd   :  { %2227 = vmatprep.subr.bf16.mxu0 %v8655_v39  ;;  %2309 = vmatprep.subr.bf16.mxu1 %v8658_v40  ;;  %v8739_v39 = vld [vmem:[#allocation6 + $0x984] ss:$16 sps:$4 sm:$0xff]   ;;  %v8742_v40 = vld [vmem:[#allocation6 + $0x98c] ss:$16 sps:$4 sm:$0xff]  }
 0x300   :  { %2228 = vmatpush1.bf16.msra.mxu0 %v8653_v47  ;;  %2310 = vmatpush1.bf16.msra.mxu1 %v8656_v36  ;;  %v8740_v47 = vld [vmem:[#allocation6 + $0x988] ss:$16 sps:$4 sm:$0xff]   ;;  %v8745_v36 = vld [vmem:[#allocation6 + $0x9a4] ss:$16 sps:$4 sm:$0xff]  }
 0x301   :  { %2229 = vmatprep.subr.bf16.mxu0 %v8661_v48  ;;  %2311 = vmatprep.subr.bf16.mxu1 %v8664_v50  ;;  %v8748_v48 = vld [vmem:[#allocation6 + $0x9ac] ss:$16 sps:$4 sm:$0xff]   ;;  %v8743_v50 = vld [vmem:[#allocation6 + $0x9a0] ss:$16 sps:$4 sm:$0xff]  }
 0x304   :  { %2230 = vmatpush1.bf16.msra.mxu0 %v8659_v17  ;;  %2312 = vmatpush1.bf16.msra.mxu1 %v8662_v52  ;;  %v8751_v17 = vld [vmem:[#allocation6 + $0x9c4] ss:$16 sps:$4 sm:$0xff]   ;;  %v8754_v52 = vld [vmem:[#allocation6 + $0x9cc] ss:$16 sps:$4 sm:$0xff]  }
 0x305   :  { %3130 = vmatprep.subr.bf16.mxu0 %v8667_v53  ;;  %3212 = vmatprep.subr.bf16.mxu1 %v8670_v54  ;;  %v8749_v53 = vld [vmem:[#allocation6 + $0x9c0] ss:$16 sps:$4 sm:$0xff]   ;;  %v8752_v54 = vld [vmem:[#allocation6 + $0x9c8] ss:$16 sps:$4 sm:$0xff]  }
 0x307   :  { %2232 = vmatmul.mubr.bf16.vlgmr.msra.gmra.mrb[8].mxu0 %v1364_v57  ;;  %2314 = vmatmul.mubr.bf16.vlgmr.msra.gmra.mrb[8].mxu1 %v1364_v57  ;;  %v8758_v57 = vld [vmem:[#allocation6 + $0x9e8] ss:$16 sps:$4 sm:$0xff]  }
 0x308   :  { %3131 = vmatpush1.bf16.msra.mxu0 %v8665_v22  ;;  %3213 = vmatpush1.bf16.msra.mxu1 %v8668_v56  ;;  %v8760_v22 = vld [vmem:[#allocation6 + $0x9ec] ss:$16 sps:$4 sm:$0xff]   ;;  %v8755_v56 = vld [vmem:[#allocation6 + $0x9e0] ss:$16 sps:$4 sm:$0xff]  }
 0x309   :  { %3132 = vmatprep.subr.bf16.mxu0 %v8673_v59  ;;  %3214 = vmatprep.subr.bf16.mxu1 %v8676_v60  ;;  %v8763_v59 = vld [vmem:[#allocation6 + $0xa04] ss:$16 sps:$4 sm:$0xff]   ;;  %v8766_v60 = vld [vmem:[#allocation6 + $0xa0c] ss:$16 sps:$4 sm:$0xff]  }
 0x30c   :  { %3133 = vmatpush1.bf16.msra.mxu0 %v8671_v61  ;;  %3215 = vmatpush1.bf16.msra.mxu1 %v8674_v62  ;;  %v9866_v61 = vld [vmem:[#allocation7 + $0x4] sm:$0xf] }
 0x30d   :  { %3134 = vmatprep.subr.bf16.mxu0 %v8679_v63  ;;  %3216 = vmatprep.subr.bf16.mxu1 %v8682_v0  ;;  %v1501_v62 = vrot.slane %v9866_v61, %v9831_v43  ;;  %v1505_v63 = vrot.slane %v9866_v61, %v9834_v44  ;;  %v1513_v0 = vrot.slane %v9866_v61, %v9837_v45 }
 0x310   :  { %3135 = vmatpush1.bf16.msra.mxu0 %v8677_v1  ;;  %3217 = vmatpush1.bf16.msra.mxu1 %v8680_v2 }
 0x311   :  { %3136 = vmatprep.subr.bf16.mxu0 %v8685_v41  ;;  %3218 = vmatprep.subr.bf16.mxu1 %v8688_v3 }
 0x314   :  { %3137 = vmatpush1.bf16.msra.mxu0 %v8683_v4  ;;  %3219 = vmatpush1.bf16.msra.mxu1 %v8686_v5 }
 0x315   :  { %3138 = vmatprep.subr.bf16.mxu0 %v8691_v6  ;;  %3220 = vmatprep.subr.bf16.mxu1 %v8694_v7 }
 0x318   :  { %3139 = vmatpush1.bf16.msra.mxu0 %v8689_v8  ;;  %3221 = vmatpush1.bf16.msra.mxu1 %v8692_v42 }
 0x319   :  { %3140 = vmatprep.subr.bf16.mxu0 %v8697_v9  ;;  %3222 = vmatprep.subr.bf16.mxu1 %v8700_v10 }
 0x31c   :  { %3141 = vmatpush1.bf16.msra.mxu0 %v8695_v11  ;;  %3223 = vmatpush1.bf16.msra.mxu1 %v8698_v12 }
 0x31d   :  { %3142 = vmatprep.subr.bf16.mxu0 %v8703_v49  ;;  %3224 = vmatprep.subr.bf16.mxu1 %v8706_v13 }
 0x320   :  { %3143 = vmatpush1.bf16.msra.mxu0 %v8701_v14  ;;  %3225 = vmatpush1.bf16.msra.mxu1 %v8704_v15  ;;  %v8761_v15 = vld [vmem:[#allocation6 + $0xa00] ss:$16 sps:$4 sm:$0xff]  }
 0x321   :  { %3144 = vmatprep.subr.bf16.mxu0 %v8709_v16  ;;  %3226 = vmatprep.subr.bf16.mxu1 %v8712_v18  ;;  %v8764_v16 = vld [vmem:[#allocation6 + $0xa08] ss:$16 sps:$4 sm:$0xff]  }
 0x324   :  { %3145 = vmatpush1.bf16.msra.mxu0 %v8707_v19  ;;  %3227 = vmatpush1.bf16.msra.mxu1 %v8710_v20  ;;  %v8769_v20 = vld [vmem:[#allocation6 + $0xa24] ss:$16 sps:$4 sm:$0xff]  }
 0x325   :  { %3146 = vmatprep.subr.bf16.mxu0 %v8715_v21  ;;  %3228 = vmatprep.subr.bf16.mxu1 %v8718_v23  ;;  %v8772_v21 = vld [vmem:[#allocation6 + $0xa2c] ss:$16 sps:$4 sm:$0xff]  }
 0x328   :  { %3147 = vmatpush1.bf16.msra.mxu0 %v8713_v24  ;;  %3229 = vmatpush1.bf16.msra.mxu1 %v8716_v25  ;;  %v8767_v24 = vld [vmem:[#allocation6 + $0xa20] ss:$16 sps:$4 sm:$0xff]   ;;  %v8770_v25 = vld [vmem:[#allocation6 + $0xa28] ss:$16 sps:$4 sm:$0xff]  }
 0x329   :  { %3148 = vmatprep.subr.bf16.mxu0 %v8721_v26  ;;  %3230 = vmatprep.subr.bf16.mxu1 %v8724_v27  ;;  %v8775_v26 = vld [vmem:[#allocation6 + $0xa44] ss:$16 sps:$4 sm:$0xff]   ;;  %v8778_v27 = vld [vmem:[#allocation6 + $0xa4c] ss:$16 sps:$4 sm:$0xff]  }
 0x32c   :  { %3149 = vmatpush1.bf16.msra.mxu0 %v8719_v28  ;;  %3231 = vmatpush1.bf16.msra.mxu1 %v8722_v29  ;;  %v8773_v28 = vld [vmem:[#allocation6 + $0xa40] ss:$16 sps:$4 sm:$0xff]   ;;  %v8776_v29 = vld [vmem:[#allocation6 + $0xa48] ss:$16 sps:$4 sm:$0xff]  }
 0x32d   :  { %3150 = vmatprep.subr.bf16.mxu0 %v8727_v30  ;;  %3232 = vmatprep.subr.bf16.mxu1 %v8730_v31  ;;  %v8781_v30 = vld [vmem:[#allocation6 + $0xa64] ss:$16 sps:$4 sm:$0xff]   ;;  %v8784_v31 = vld [vmem:[#allocation6 + $0xa6c] ss:$16 sps:$4 sm:$0xff]  }
 0x330   :  { %3151 = vmatpush1.bf16.msra.mxu0 %v8725_v32  ;;  %3233 = vmatpush1.bf16.msra.mxu1 %v8728_v33  ;;  %v8779_v32 = vld [vmem:[#allocation6 + $0xa60] ss:$16 sps:$4 sm:$0xff]   ;;  %v8782_v33 = vld [vmem:[#allocation6 + $0xa68] ss:$16 sps:$4 sm:$0xff]  }
 0x331   :  { %3152 = vmatprep.subr.bf16.mxu0 %v8733_v34  ;;  %3234 = vmatprep.subr.bf16.mxu1 %v8736_v35  ;;  %v8787_v34 = vld [vmem:[#allocation6 + $0xa84] ss:$16 sps:$4 sm:$0xff]   ;;  %v8790_v35 = vld [vmem:[#allocation6 + $0xa8c] ss:$16 sps:$4 sm:$0xff]  }
 0x334   :  { %3153 = vmatpush1.bf16.msra.mxu0 %v8731_v37  ;;  %3235 = vmatpush1.bf16.msra.mxu1 %v8734_v38  ;;  %v8785_v37 = vld [vmem:[#allocation6 + $0xa80] ss:$16 sps:$4 sm:$0xff]   ;;  %v8788_v38 = vld [vmem:[#allocation6 + $0xa88] ss:$16 sps:$4 sm:$0xff]  }
 0x335   :  { %3154 = vmatprep.subr.bf16.mxu0 %v8739_v39  ;;  %3236 = vmatprep.subr.bf16.mxu1 %v8742_v40  ;;  %v8793_v39 = vld [vmem:[#allocation6 + $0xaa4] ss:$16 sps:$4 sm:$0xff]   ;;  %v8796_v40 = vld [vmem:[#allocation6 + $0xaac] ss:$16 sps:$4 sm:$0xff]  }
 0x338   :  { %3155 = vmatpush1.bf16.msra.mxu0 %v8737_v46  ;;  %3237 = vmatpush1.bf16.msra.mxu1 %v8740_v47  ;;  %v8791_v46 = vld [vmem:[#allocation6 + $0xaa0] ss:$16 sps:$4 sm:$0xff]   ;;  %v8794_v47 = vld [vmem:[#allocation6 + $0xaa8] ss:$16 sps:$4 sm:$0xff]  }
 0x339   :  { %3156 = vmatprep.subr.bf16.mxu0 %v8745_v36  ;;  %3238 = vmatprep.subr.bf16.mxu1 %v8748_v48  ;;  %v8799_v36 = vld [vmem:[#allocation6 + $0xac4] ss:$16 sps:$4 sm:$0xff]   ;;  %v8802_v48 = vld [vmem:[#allocation6 + $0xacc] ss:$16 sps:$4 sm:$0xff]  }
 0x33c   :  { %3157 = vmatpush1.bf16.msra.mxu0 %v8743_v50  ;;  %3239 = vmatpush1.bf16.msra.mxu1 %v8746_v51  ;;  %v8797_v50 = vld [vmem:[#allocation6 + $0xac0] ss:$16 sps:$4 sm:$0xff]   ;;  %v8800_v51 = vld [vmem:[#allocation6 + $0xac8] ss:$16 sps:$4 sm:$0xff]  }
 0x33d   :  { %3158 = vmatprep.subr.bf16.mxu0 %v8751_v17  ;;  %3240 = vmatprep.subr.bf16.mxu1 %v8754_v52  ;;  %v8805_v17 = vld [vmem:[#allocation6 + $0xae4] ss:$16 sps:$4 sm:$0xff]   ;;  %v8808_v52 = vld [vmem:[#allocation6 + $0xaec] ss:$16 sps:$4 sm:$0xff]  }
 0x340   :  { %3159 = vmatpush1.bf16.msra.mxu0 %v8749_v53  ;;  %3241 = vmatpush1.bf16.msra.mxu1 %v8752_v54  ;;  %v8803_v53 = vld [vmem:[#allocation6 + $0xae0] ss:$16 sps:$4 sm:$0xff]   ;;  %v8806_v54 = vld [vmem:[#allocation6 + $0xae8] ss:$16 sps:$4 sm:$0xff]  }
 0x341   :  { %3160 = vmatprep.subr.bf16.mxu0 %v8757_v55  ;;  %3242 = vmatprep.subr.bf16.mxu1 %v8760_v22  ;;  %v8811_v55 = vld [vmem:[#allocation6 + $0xb04] ss:$16 sps:$4 sm:$0xff]   ;;  %v8814_v22 = vld [vmem:[#allocation6 + $0xb0c] ss:$16 sps:$4 sm:$0xff]  }
 0x344   :  { %3161 = vmatpush1.bf16.msra.mxu0 %v8755_v56  ;;  %3243 = vmatpush1.bf16.msra.mxu1 %v8758_v57  ;;  %v8809_v56 = vld [vmem:[#allocation6 + $0xb00] ss:$16 sps:$4 sm:$0xff]   ;;  %v8812_v57 = vld [vmem:[#allocation6 + $0xb08] ss:$16 sps:$4 sm:$0xff]  }
 0x345   :  { %3171 = vmatprep.subr.bf16.mxu0 %v8763_v59  ;;  %3253 = vmatprep.subr.bf16.mxu1 %v8766_v60  ;;  %v8817_v59 = vld [vmem:[#allocation6 + $0xb24] ss:$16 sps:$4 sm:$0xff]   ;;  %v8820_v60 = vld [vmem:[#allocation6 + $0xb2c] ss:$16 sps:$4 sm:$0xff]  }
 0x3da   :  { %v2233_v1 = vpop.f32.mrb[8].mxu0  ;;  %v9874_v2 = vpop.f32.mrb[8].mxu1 }
 0x3db   :  { %v8142_v41 = vadd.f32 %v2233_v1, %v1501_v62  ;;  %v2235_v3 = vpop.f32.mrb[9].mxu0  ;;  %v2317_v4 = vpop.f32.mrb[9].mxu1  ;;  %v8815_v62 = vld [vmem:[#allocation6 + $0xb20] ss:$16 sps:$4 sm:$0xff]   ;;  %v8826_v1 = vld [vmem:[#allocation6 + $0xb4c] ss:$16 sps:$4 sm:$0xff]  }
 0x3dc   :  { %v8143_v5 = vadd.f32 %v2235_v3, %v1505_v63  ;;  %v8145_v6 = vadd.f32 %v2317_v4, %v1513_v0  ;;  %v2237_v7 = vpop.f32.mrb[10].mxu0  ;;  %v2319_v8 = vpop.f32.mrb[10].mxu1  ;;  %v8818_v63 = vld [vmem:[#allocation6 + $0xb28] ss:$16 sps:$4 sm:$0xff]   ;;  %v8823_v0 = vld [vmem:[#allocation6 + $0xb44] ss:$16 sps:$4 sm:$0xff]  }
 0x3dd   :  { %vm2322_vm10 = vcmp.ge.f32.partialorder %v8142_v41, 0.0  ;;  %v2326_v42 = vmul.f32 0.2, %v8142_v41  ;;  %v2238_v12 = vpop.f32.mrb[11].mxu0  ;;  %v2320_v49 = vpop.f32.mrb[11].mxu1 }
 0x3de   :  { %vm2323_vm11 = vcmp.ge.f32.partialorder %v8143_v5, 0.0  ;;  %v2327_v9 = vmul.f32 0.2, %v8143_v5  ;;  %vm2325_vm12 = vcmp.ge.f32.partialorder %v8145_v6, 0.0  ;;  %v2329_v10 = vmul.f32 0.2, %v8145_v6 }
 0x3df   :  { %v2330_v11 = vsel %vm2322_vm10, %v8142_v41, %v2326_v42  ;;  %v8821_v41 = vld [vmem:[#allocation6 + $0xb40] ss:$16 sps:$4 sm:$0xff]   ;;  %v8824_v3 = vld [vmem:[#allocation6 + $0xb48] ss:$16 sps:$4 sm:$0xff]   ;;  %v8829_v4 = vld [vmem:[#allocation6 + $0xb64] ss:$16 sps:$4 sm:$0xff]   ;;  %v1509_v49 = vrot.slane %v9866_v61, %v9848_v58 }
 0x3e0   :  { %v2331_v13 = vsel %vm2323_vm11, %v8143_v5, %v2327_v9  ;;  %v2333_v18 = vsel %vm2325_vm12, %v8145_v6, %v2329_v10  ;;  %v2334_v19 = vpack.c.bf16 %v2330_v11, %v2330_v11  ;;  %v8832_v5 = vld [vmem:[#allocation6 + $0xb6c] ss:$16 sps:$4 sm:$0xff]   ;;  %v8827_v6 = vld [vmem:[#allocation6 + $0xb60] ss:$16 sps:$4 sm:$0xff]   ;;  %v8830_v7 = vld [vmem:[#allocation6 + $0xb68] ss:$16 sps:$4 sm:$0xff]  }
 0x3e1   :  { %v2335_v14 = vpack.c.bf16 %v2331_v13, %v2331_v13  ;;  %v2337_v23 = vpack.c.bf16 %v2333_v18, %v2333_v18  ;;  %v8835_v8 = vld [vmem:[#allocation6 + $0xb84] ss:$16 sps:$4 sm:$0xff]   ;;  %v8838_v42 = vld [vmem:[#allocation6 + $0xb8c] ss:$16 sps:$4 sm:$0xff]   ;;  %v8833_v9 = vld [vmem:[#allocation6 + $0xb80] ss:$16 sps:$4 sm:$0xff]   ;;  %v8144_v18 = vadd.f32 %v9874_v2, %v1509_v49 }
 0x3e2   :  { %v8836_v10 = vld [vmem:[#allocation6 + $0xb88] ss:$16 sps:$4 sm:$0xff]   ;;  %v8841_v11 = vld [vmem:[#allocation6 + $0xba4] ss:$16 sps:$4 sm:$0xff]   ;;  %v8844_v12 = vld [vmem:[#allocation6 + $0xbac] ss:$16 sps:$4 sm:$0xff]  }
 0x3e3   :  { %3162 = vmatprep.mubr.bf16.mxu0 %v2335_v14  ;;  %3244 = vmatprep.mubr.bf16.mxu1 %v2335_v14  ;;  %v8839_v13 = vld [vmem:[#allocation6 + $0xba0] ss:$16 sps:$4 sm:$0xff]   ;;  %v8842_v14 = vld [vmem:[#allocation6 + $0xba8] ss:$16 sps:$4 sm:$0xff]   ;;  %vm2324_vm13 = vcmp.ge.f32.partialorder %v8144_v18, 0.0 }
 0x3e4   :  { %3163 = vmatmul.mubr.bf16.vlgmr.msra.gmra.mrb[12].mxu0 %v2334_v19  ;;  %3245 = vmatmul.mubr.bf16.vlgmr.msra.gmra.mrb[12].mxu1 %v2334_v19  ;;  %v8845_v19 = vld [vmem:[#allocation6 + $0xbc0] ss:$16 sps:$4 sm:$0xff]   ;;  %v8928_v49 = vld [vmem:[#allocation6 + $0xd6c] ss:$16 sps:$4 sm:$0xff]  }
 0x3e5   :  { %3172 = vmatpush1.bf16.msra.mxu0 %v8761_v15  ;;  %3254 = vmatpush1.bf16.msra.mxu1 %v8764_v16  ;;  %v8847_v15 = vld [vmem:[#allocation6 + $0xbc4] ss:$16 sps:$4 sm:$0xff]   ;;  %v8850_v16 = vld [vmem:[#allocation6 + $0xbcc] ss:$16 sps:$4 sm:$0xff]   ;;  %v8851_v61 = vld [vmem:[#allocation6 + $0xbe0] ss:$16 sps:$4 sm:$0xff]  }
 0x3e6   :  { %3203 = vmatprep.mubr.bf16.mxu0 %v2337_v23  ;;  %3285 = vmatprep.mubr.bf16.mxu1 %v2337_v23  ;;  %v8856_v23 = vld [vmem:[#allocation6 + $0xbec] ss:$16 sps:$4 sm:$0xff]   ;;  %v8857_v2 = vld [vmem:[#allocation6 + $0xc00] ss:$16 sps:$4 sm:$0xff]  }
 0x3e7   :  { %3173 = vmatprep.subr.bf16.mxu0 %v8769_v20  ;;  %3255 = vmatprep.subr.bf16.mxu1 %v8772_v21  ;;  %v8848_v20 = vld [vmem:[#allocation6 + $0xbc8] ss:$16 sps:$4 sm:$0xff]   ;;  %v8853_v21 = vld [vmem:[#allocation6 + $0xbe4] ss:$16 sps:$4 sm:$0xff]  }
 0x3e9   :  { %3174 = vmatpush1.bf16.msra.mxu0 %v8767_v24  ;;  %3256 = vmatpush1.bf16.msra.mxu1 %v8770_v25  ;;  %v2328_v24 = vmul.f32 0.2, %v8144_v18  ;;  %v8854_v25 = vld [vmem:[#allocation6 + $0xbe8] ss:$16 sps:$4 sm:$0xff]  }
 0x3ea   :  { %3175 = vmatprep.subr.bf16.mxu0 %v8775_v26  ;;  %3257 = vmatprep.subr.bf16.mxu1 %v8778_v27  ;;  %v8859_v26 = vld [vmem:[#allocation6 + $0xc04] ss:$16 sps:$4 sm:$0xff]   ;;  %v8862_v27 = vld [vmem:[#allocation6 + $0xc0c] ss:$16 sps:$4 sm:$0xff]  }
 0x3ed   :  { %3176 = vmatpush1.bf16.msra.mxu0 %v8773_v28  ;;  %3258 = vmatpush1.bf16.msra.mxu1 %v8776_v29  ;;  %v2332_v28 = vsel %vm2324_vm13, %v8144_v18, %v2328_v24  ;;  %v8860_v29 = vld [vmem:[#allocation6 + $0xc08] ss:$16 sps:$4 sm:$0xff]   ;;  %v8929_v18 = vld [vmem:[#allocation6 + $0xd80] ss:$16 sps:$4 sm:$0xff]  }
 0x3ee   :  { %3177 = vmatprep.subr.bf16.mxu0 %v8781_v30  ;;  %3259 = vmatprep.subr.bf16.mxu1 %v8784_v31  ;;  %v2336_v30 = vpack.c.bf16 %v2332_v28, %v2332_v28  ;;  %v8865_v31 = vld [vmem:[#allocation6 + $0xc24] ss:$16 sps:$4 sm:$0xff]   ;;  %v8938_v24 = vld [vmem:[#allocation6 + $0xda8] ss:$16 sps:$4 sm:$0xff]  }
 0x3ef   :  { %v8949_v28 = vld [vmem:[#allocation6 + $0xde4] ss:$16 sps:$4 sm:$0xff]  }
 0x3f1   :  { %3178 = vmatpush1.bf16.msra.mxu0 %v8779_v32  ;;  %3260 = vmatpush1.bf16.msra.mxu1 %v8782_v33  ;;  %v8868_v32 = vld [vmem:[#allocation6 + $0xc2c] ss:$16 sps:$4 sm:$0xff]   ;;  %v8863_v33 = vld [vmem:[#allocation6 + $0xc20] ss:$16 sps:$4 sm:$0xff]  }
 0x3f2   :  { %3179 = vmatprep.subr.bf16.mxu0 %v8787_v34  ;;  %3261 = vmatprep.subr.bf16.mxu1 %v8790_v35  ;;  %v8866_v34 = vld [vmem:[#allocation6 + $0xc28] ss:$16 sps:$4 sm:$0xff]   ;;  %v8871_v35 = vld [vmem:[#allocation6 + $0xc44] ss:$16 sps:$4 sm:$0xff]  }
 0x3f5   :  { %3180 = vmatpush1.bf16.msra.mxu0 %v8785_v37  ;;  %3262 = vmatpush1.bf16.msra.mxu1 %v8788_v38  ;;  %v8874_v37 = vld [vmem:[#allocation6 + $0xc4c] ss:$16 sps:$4 sm:$0xff]   ;;  %v8869_v38 = vld [vmem:[#allocation6 + $0xc40] ss:$16 sps:$4 sm:$0xff]  }
 0x3f6   :  { %3181 = vmatprep.subr.bf16.mxu0 %v8793_v39  ;;  %3263 = vmatprep.subr.bf16.mxu1 %v8796_v40  ;;  %v8872_v39 = vld [vmem:[#allocation6 + $0xc48] ss:$16 sps:$4 sm:$0xff]   ;;  %v8877_v40 = vld [vmem:[#allocation6 + $0xc64] ss:$16 sps:$4 sm:$0xff]  }
 0x3f9   :  { %3182 = vmatpush1.bf16.msra.mxu0 %v8791_v46  ;;  %3264 = vmatpush1.bf16.msra.mxu1 %v8794_v47  ;;  %v8880_v46 = vld [vmem:[#allocation6 + $0xc6c] ss:$16 sps:$4 sm:$0xff]   ;;  %v8875_v47 = vld [vmem:[#allocation6 + $0xc60] ss:$16 sps:$4 sm:$0xff]  }
 0x3fa   :  { %3183 = vmatprep.subr.bf16.mxu0 %v8799_v36  ;;  %3265 = vmatprep.subr.bf16.mxu1 %v8802_v48  ;;  %v8878_v36 = vld [vmem:[#allocation6 + $0xc68] ss:$16 sps:$4 sm:$0xff]   ;;  %v8883_v48 = vld [vmem:[#allocation6 + $0xc84] ss:$16 sps:$4 sm:$0xff]  }
 0x3fd   :  { %3184 = vmatpush1.bf16.msra.mxu0 %v8797_v50  ;;  %3266 = vmatpush1.bf16.msra.mxu1 %v8800_v51  ;;  %v8886_v50 = vld [vmem:[#allocation6 + $0xc8c] ss:$16 sps:$4 sm:$0xff]   ;;  %v8881_v51 = vld [vmem:[#allocation6 + $0xc80] ss:$16 sps:$4 sm:$0xff]  }
 0x3fe   :  { %3185 = vmatprep.subr.bf16.mxu0 %v8805_v17  ;;  %3267 = vmatprep.subr.bf16.mxu1 %v8808_v52  ;;  %v8884_v17 = vld [vmem:[#allocation6 + $0xc88] ss:$16 sps:$4 sm:$0xff]   ;;  %v8889_v52 = vld [vmem:[#allocation6 + $0xca4] ss:$16 sps:$4 sm:$0xff]  }
 0x401   :  { %3186 = vmatpush1.bf16.msra.mxu0 %v8803_v53  ;;  %3268 = vmatpush1.bf16.msra.mxu1 %v8806_v54  ;;  %v8892_v53 = vld [vmem:[#allocation6 + $0xcac] ss:$16 sps:$4 sm:$0xff]   ;;  %v8887_v54 = vld [vmem:[#allocation6 + $0xca0] ss:$16 sps:$4 sm:$0xff]  }
 0x402   :  { %3187 = vmatprep.subr.bf16.mxu0 %v8811_v55  ;;  %3269 = vmatprep.subr.bf16.mxu1 %v8814_v22  ;;  %v8890_v55 = vld [vmem:[#allocation6 + $0xca8] ss:$16 sps:$4 sm:$0xff]   ;;  %v8895_v22 = vld [vmem:[#allocation6 + $0xcc4] ss:$16 sps:$4 sm:$0xff]  }
 0x405   :  { %3188 = vmatpush1.bf16.msra.mxu0 %v8809_v56  ;;  %3270 = vmatpush1.bf16.msra.mxu1 %v8812_v57  ;;  %v8898_v56 = vld [vmem:[#allocation6 + $0xccc] ss:$16 sps:$4 sm:$0xff]   ;;  %v8893_v57 = vld [vmem:[#allocation6 + $0xcc0] ss:$16 sps:$4 sm:$0xff]  }
 0x406   :  { %3189 = vmatprep.subr.bf16.mxu0 %v8817_v59  ;;  %3271 = vmatprep.subr.bf16.mxu1 %v8820_v60  ;;  %v8896_v59 = vld [vmem:[#allocation6 + $0xcc8] ss:$16 sps:$4 sm:$0xff]   ;;  %v8901_v60 = vld [vmem:[#allocation6 + $0xce4] ss:$16 sps:$4 sm:$0xff]  }
 0x409   :  { %3190 = vmatpush1.bf16.msra.mxu0 %v8815_v62  ;;  %3272 = vmatpush1.bf16.msra.mxu1 %v8818_v63  ;;  %v8904_v62 = vld [vmem:[#allocation6 + $0xcec] ss:$16 sps:$4 sm:$0xff]   ;;  %v8899_v63 = vld [vmem:[#allocation6 + $0xce0] ss:$16 sps:$4 sm:$0xff]  }
 0x40a   :  { %3191 = vmatprep.subr.bf16.mxu0 %v8823_v0  ;;  %3273 = vmatprep.subr.bf16.mxu1 %v8826_v1  ;;  %v8902_v0 = vld [vmem:[#allocation6 + $0xce8] ss:$16 sps:$4 sm:$0xff]   ;;  %v8907_v1 = vld [vmem:[#allocation6 + $0xd04] ss:$16 sps:$4 sm:$0xff]  }
 0x40d   :  { %3192 = vmatpush1.bf16.msra.mxu0 %v8821_v41  ;;  %3274 = vmatpush1.bf16.msra.mxu1 %v8824_v3  ;;  %v8910_v41 = vld [vmem:[#allocation6 + $0xd0c] ss:$16 sps:$4 sm:$0xff]   ;;  %v8905_v3 = vld [vmem:[#allocation6 + $0xd00] ss:$16 sps:$4 sm:$0xff]  }
 0x40e   :  { %3193 = vmatprep.subr.bf16.mxu0 %v8829_v4  ;;  %3275 = vmatprep.subr.bf16.mxu1 %v8832_v5  ;;  %v8908_v4 = vld [vmem:[#allocation6 + $0xd08] ss:$16 sps:$4 sm:$0xff]   ;;  %v8913_v5 = vld [vmem:[#allocation6 + $0xd24] ss:$16 sps:$4 sm:$0xff]  }
 0x411   :  { %3194 = vmatpush1.bf16.msra.mxu0 %v8827_v6  ;;  %3276 = vmatpush1.bf16.msra.mxu1 %v8830_v7  ;;  %v8916_v6 = vld [vmem:[#allocation6 + $0xd2c] ss:$16 sps:$4 sm:$0xff]   ;;  %v8911_v7 = vld [vmem:[#allocation6 + $0xd20] ss:$16 sps:$4 sm:$0xff]  }
 0x412   :  { %3195 = vmatprep.subr.bf16.mxu0 %v8835_v8  ;;  %3277 = vmatprep.subr.bf16.mxu1 %v8838_v42  ;;  %v8914_v8 = vld [vmem:[#allocation6 + $0xd28] ss:$16 sps:$4 sm:$0xff]   ;;  %v8919_v42 = vld [vmem:[#allocation6 + $0xd44] ss:$16 sps:$4 sm:$0xff]  }
 0x415   :  { %3196 = vmatpush1.bf16.msra.mxu0 %v8833_v9  ;;  %3278 = vmatpush1.bf16.msra.mxu1 %v8836_v10  ;;  %v8922_v9 = vld [vmem:[#allocation6 + $0xd4c] ss:$16 sps:$4 sm:$0xff]   ;;  %v8917_v10 = vld [vmem:[#allocation6 + $0xd40] ss:$16 sps:$4 sm:$0xff]  }
 0x416   :  { %3197 = vmatprep.subr.bf16.mxu0 %v8841_v11  ;;  %3279 = vmatprep.subr.bf16.mxu1 %v8844_v12  ;;  %v8920_v11 = vld [vmem:[#allocation6 + $0xd48] ss:$16 sps:$4 sm:$0xff]   ;;  %v8925_v12 = vld [vmem:[#allocation6 + $0xd64] ss:$16 sps:$4 sm:$0xff]  }
 0x419   :  { %3198 = vmatpush1.bf16.msra.mxu0 %v8839_v13  ;;  %3280 = vmatpush1.bf16.msra.mxu1 %v8842_v14  ;;  %v8923_v13 = vld [vmem:[#allocation6 + $0xd60] ss:$16 sps:$4 sm:$0xff]   ;;  %v8926_v14 = vld [vmem:[#allocation6 + $0xd68] ss:$16 sps:$4 sm:$0xff]  }
 0x41a   :  { %3199 = vmatprep.subr.bf16.mxu0 %v8847_v15  ;;  %3281 = vmatprep.subr.bf16.mxu1 %v8850_v16  ;;  %v8931_v15 = vld [vmem:[#allocation6 + $0xd84] ss:$16 sps:$4 sm:$0xff]   ;;  %v8934_v16 = vld [vmem:[#allocation6 + $0xd8c] ss:$16 sps:$4 sm:$0xff]  }
 0x41d   :  { %3200 = vmatpush1.bf16.msra.mxu0 %v8845_v19  ;;  %3282 = vmatpush1.bf16.msra.mxu1 %v8848_v20  ;;  %v8932_v19 = vld [vmem:[#allocation6 + $0xd88] ss:$16 sps:$4 sm:$0xff]   ;;  %v8937_v20 = vld [vmem:[#allocation6 + $0xda4] ss:$16 sps:$4 sm:$0xff]  }
 0x41e   :  { %3201 = vmatprep.subr.bf16.mxu0 %v8853_v21  ;;  %3283 = vmatprep.subr.bf16.mxu1 %v8856_v23  ;;  %v8940_v21 = vld [vmem:[#allocation6 + $0xdac] ss:$16 sps:$4 sm:$0xff]   ;;  %v8935_v23 = vld [vmem:[#allocation6 + $0xda0] ss:$16 sps:$4 sm:$0xff]  }
 0x421   :  { %3202 = vmatpush1.bf16.msra.mxu0 %v8851_v61  ;;  %3284 = vmatpush1.bf16.msra.mxu1 %v8854_v25  ;;  %v8943_v61 = vld [vmem:[#allocation6 + $0xdc4] ss:$16 sps:$4 sm:$0xff]   ;;  %v8946_v25 = vld [vmem:[#allocation6 + $0xdcc] ss:$16 sps:$4 sm:$0xff]  }
 0x422   :  { %4102 = vmatprep.subr.bf16.mxu0 %v8859_v26  ;;  %4184 = vmatprep.subr.bf16.mxu1 %v8862_v27  ;;  %v8941_v26 = vld [vmem:[#allocation6 + $0xdc0] ss:$16 sps:$4 sm:$0xff]   ;;  %v8944_v27 = vld [vmem:[#allocation6 + $0xdc8] ss:$16 sps:$4 sm:$0xff]  }
 0x424   :  { %3204 = vmatmul.mubr.bf16.vlgmr.msra.gmra.mrb[12].mxu0 %v2336_v30  ;;  %3286 = vmatmul.mubr.bf16.vlgmr.msra.gmra.mrb[12].mxu1 %v2336_v30  ;;  %v8950_v30 = vld [vmem:[#allocation6 + $0xde8] ss:$16 sps:$4 sm:$0xff]  }
 0x425   :  { %4103 = vmatpush1.bf16.msra.mxu0 %v8857_v2  ;;  %4185 = vmatpush1.bf16.msra.mxu1 %v8860_v29  ;;  %v8952_v2 = vld [vmem:[#allocation6 + $0xdec] ss:$16 sps:$4 sm:$0xff]   ;;  %v8947_v29 = vld [vmem:[#allocation6 + $0xde0] ss:$16 sps:$4 sm:$0xff]  }
 0x426   :  { %4104 = vmatprep.subr.bf16.mxu0 %v8865_v31  ;;  %4186 = vmatprep.subr.bf16.mxu1 %v8868_v32  ;;  %v8955_v31 = vld [vmem:[#allocation6 + $0xe04] ss:$16 sps:$4 sm:$0xff]   ;;  %v8958_v32 = vld [vmem:[#allocation6 + $0xe0c] ss:$16 sps:$4 sm:$0xff]  }
 0x429   :  { %4105 = vmatpush1.bf16.msra.mxu0 %v8863_v33  ;;  %4187 = vmatpush1.bf16.msra.mxu1 %v8866_v34  ;;  %v9879_v33 = vld [vmem:[#allocation7 + $0x8] sm:$0xf] }
 0x42a   :  { %4106 = vmatprep.subr.bf16.mxu0 %v8871_v35  ;;  %4188 = vmatprep.subr.bf16.mxu1 %v8874_v37  ;;  %v2473_v34 = vrot.slane %v9879_v33, %v9831_v43  ;;  %v2477_v35 = vrot.slane %v9879_v33, %v9834_v44  ;;  %v2485_v37 = vrot.slane %v9879_v33, %v9837_v45 }
 0x42d   :  { %4107 = vmatpush1.bf16.msra.mxu0 %v8869_v38  ;;  %4189 = vmatpush1.bf16.msra.mxu1 %v8872_v39 }
 0x42e   :  { %4108 = vmatprep.subr.bf16.mxu0 %v8877_v40  ;;  %4190 = vmatprep.subr.bf16.mxu1 %v8880_v46 }
 0x431   :  { %4109 = vmatpush1.bf16.msra.mxu0 %v8875_v47  ;;  %4191 = vmatpush1.bf16.msra.mxu1 %v8878_v36 }
 0x432   :  { %4110 = vmatprep.subr.bf16.mxu0 %v8883_v48  ;;  %4192 = vmatprep.subr.bf16.mxu1 %v8886_v50 }
 0x435   :  { %4111 = vmatpush1.bf16.msra.mxu0 %v8881_v51  ;;  %4193 = vmatpush1.bf16.msra.mxu1 %v8884_v17 }
 0x436   :  { %4112 = vmatprep.subr.bf16.mxu0 %v8889_v52  ;;  %4194 = vmatprep.subr.bf16.mxu1 %v8892_v53 }
 0x439   :  { %4113 = vmatpush1.bf16.msra.mxu0 %v8887_v54  ;;  %4195 = vmatpush1.bf16.msra.mxu1 %v8890_v55 }
 0x43a   :  { %4114 = vmatprep.subr.bf16.mxu0 %v8895_v22  ;;  %4196 = vmatprep.subr.bf16.mxu1 %v8898_v56 }
 0x43d   :  { %4115 = vmatpush1.bf16.msra.mxu0 %v8893_v57  ;;  %4197 = vmatpush1.bf16.msra.mxu1 %v8896_v59  ;;  %v8953_v59 = vld [vmem:[#allocation6 + $0xe00] ss:$16 sps:$4 sm:$0xff]  }
 0x43e   :  { %4116 = vmatprep.subr.bf16.mxu0 %v8901_v60  ;;  %4198 = vmatprep.subr.bf16.mxu1 %v8904_v62  ;;  %v8956_v60 = vld [vmem:[#allocation6 + $0xe08] ss:$16 sps:$4 sm:$0xff]  }
 0x441   :  { %4117 = vmatpush1.bf16.msra.mxu0 %v8899_v63  ;;  %4199 = vmatpush1.bf16.msra.mxu1 %v8902_v0  ;;  %v8961_v0 = vld [vmem:[#allocation6 + $0xe24] ss:$16 sps:$4 sm:$0xff]  }
 0x442   :  { %4118 = vmatprep.subr.bf16.mxu0 %v8907_v1  ;;  %4200 = vmatprep.subr.bf16.mxu1 %v8910_v41  ;;  %v8964_v1 = vld [vmem:[#allocation6 + $0xe2c] ss:$16 sps:$4 sm:$0xff]  }
 0x445   :  { %4119 = vmatpush1.bf16.msra.mxu0 %v8905_v3  ;;  %4201 = vmatpush1.bf16.msra.mxu1 %v8908_v4  ;;  %v8959_v3 = vld [vmem:[#allocation6 + $0xe20] ss:$16 sps:$4 sm:$0xff]   ;;  %v8962_v4 = vld [vmem:[#allocation6 + $0xe28] ss:$16 sps:$4 sm:$0xff]  }
 0x446   :  { %4120 = vmatprep.subr.bf16.mxu0 %v8913_v5  ;;  %4202 = vmatprep.subr.bf16.mxu1 %v8916_v6  ;;  %v8967_v5 = vld [vmem:[#allocation6 + $0xe44] ss:$16 sps:$4 sm:$0xff]   ;;  %v8970_v6 = vld [vmem:[#allocation6 + $0xe4c] ss:$16 sps:$4 sm:$0xff]  }
 0x449   :  { %4121 = vmatpush1.bf16.msra.mxu0 %v8911_v7  ;;  %4203 = vmatpush1.bf16.msra.mxu1 %v8914_v8  ;;  %v8965_v7 = vld [vmem:[#allocation6 + $0xe40] ss:$16 sps:$4 sm:$0xff]   ;;  %v8968_v8 = vld [vmem:[#allocation6 + $0xe48] ss:$16 sps:$4 sm:$0xff]  }
 0x44a   :  { %4122 = vmatprep.subr.bf16.mxu0 %v8919_v42  ;;  %4204 = vmatprep.subr.bf16.mxu1 %v8922_v9  ;;  %v8973_v42 = vld [vmem:[#allocation6 + $0xe64] ss:$16 sps:$4 sm:$0xff]   ;;  %v8976_v9 = vld [vmem:[#allocation6 + $0xe6c] ss:$16 sps:$4 sm:$0xff]  }
 0x44d   :  { %4123 = vmatpush1.bf16.msra.mxu0 %v8917_v10  ;;  %4205 = vmatpush1.bf16.msra.mxu1 %v8920_v11  ;;  %v8971_v10 = vld [vmem:[#allocation6 + $0xe60] ss:$16 sps:$4 sm:$0xff]   ;;  %v8974_v11 = vld [vmem:[#allocation6 + $0xe68] ss:$16 sps:$4 sm:$0xff]  }
 0x44e   :  { %4124 = vmatprep.subr.bf16.mxu0 %v8925_v12  ;;  %4206 = vmatprep.subr.bf16.mxu1 %v8928_v49  ;;  %v8979_v12 = vld [vmem:[#allocation6 + $0xe84] ss:$16 sps:$4 sm:$0xff]   ;;  %v8982_v49 = vld [vmem:[#allocation6 + $0xe8c] ss:$16 sps:$4 sm:$0xff]  }
 0x451   :  { %4125 = vmatpush1.bf16.msra.mxu0 %v8923_v13  ;;  %4207 = vmatpush1.bf16.msra.mxu1 %v8926_v14  ;;  %v8977_v13 = vld [vmem:[#allocation6 + $0xe80] ss:$16 sps:$4 sm:$0xff]   ;;  %v8980_v14 = vld [vmem:[#allocation6 + $0xe88] ss:$16 sps:$4 sm:$0xff]  }
 0x452   :  { %4126 = vmatprep.subr.bf16.mxu0 %v8931_v15  ;;  %4208 = vmatprep.subr.bf16.mxu1 %v8934_v16  ;;  %v8985_v15 = vld [vmem:[#allocation6 + $0xea4] ss:$16 sps:$4 sm:$0xff]   ;;  %v8988_v16 = vld [vmem:[#allocation6 + $0xeac] ss:$16 sps:$4 sm:$0xff]  }
 0x455   :  { %4127 = vmatpush1.bf16.msra.mxu0 %v8929_v18  ;;  %4209 = vmatpush1.bf16.msra.mxu1 %v8932_v19  ;;  %v8983_v18 = vld [vmem:[#allocation6 + $0xea0] ss:$16 sps:$4 sm:$0xff]   ;;  %v8986_v19 = vld [vmem:[#allocation6 + $0xea8] ss:$16 sps:$4 sm:$0xff]  }
 0x456   :  { %4128 = vmatprep.subr.bf16.mxu0 %v8937_v20  ;;  %4210 = vmatprep.subr.bf16.mxu1 %v8940_v21  ;;  %v8991_v20 = vld [vmem:[#allocation6 + $0xec4] ss:$16 sps:$4 sm:$0xff]   ;;  %v8994_v21 = vld [vmem:[#allocation6 + $0xecc] ss:$16 sps:$4 sm:$0xff]  }
 0x459   :  { %4129 = vmatpush1.bf16.msra.mxu0 %v8935_v23  ;;  %4211 = vmatpush1.bf16.msra.mxu1 %v8938_v24  ;;  %v8989_v23 = vld [vmem:[#allocation6 + $0xec0] ss:$16 sps:$4 sm:$0xff]   ;;  %v8992_v24 = vld [vmem:[#allocation6 + $0xec8] ss:$16 sps:$4 sm:$0xff]  }
 0x45a   :  { %4130 = vmatprep.subr.bf16.mxu0 %v8943_v61  ;;  %4212 = vmatprep.subr.bf16.mxu1 %v8946_v25  ;;  %v8997_v61 = vld [vmem:[#allocation6 + $0xee4] ss:$16 sps:$4 sm:$0xff]   ;;  %v9000_v25 = vld [vmem:[#allocation6 + $0xeec] ss:$16 sps:$4 sm:$0xff]  }
 0x45d   :  { %4131 = vmatpush1.bf16.msra.mxu0 %v8941_v26  ;;  %4213 = vmatpush1.bf16.msra.mxu1 %v8944_v27  ;;  %v8995_v26 = vld [vmem:[#allocation6 + $0xee0] ss:$16 sps:$4 sm:$0xff]   ;;  %v8998_v27 = vld [vmem:[#allocation6 + $0xee8] ss:$16 sps:$4 sm:$0xff]  }
 0x45e   :  { %4132 = vmatprep.subr.bf16.mxu0 %v8949_v28  ;;  %4214 = vmatprep.subr.bf16.mxu1 %v8952_v2  ;;  %v9003_v28 = vld [vmem:[#allocation6 + $0xf04] ss:$16 sps:$4 sm:$0xff]   ;;  %v9006_v2 = vld [vmem:[#allocation6 + $0xf0c] ss:$16 sps:$4 sm:$0xff]  }
 0x461   :  { %4133 = vmatpush1.bf16.msra.mxu0 %v8947_v29  ;;  %4215 = vmatpush1.bf16.msra.mxu1 %v8950_v30  ;;  %v9001_v29 = vld [vmem:[#allocation6 + $0xf00] ss:$16 sps:$4 sm:$0xff]   ;;  %v9004_v30 = vld [vmem:[#allocation6 + $0xf08] ss:$16 sps:$4 sm:$0xff]  }
 0x462   :  { %4143 = vmatprep.subr.bf16.mxu0 %v8955_v31  ;;  %4225 = vmatprep.subr.bf16.mxu1 %v8958_v32  ;;  %v9009_v31 = vld [vmem:[#allocation6 + $0xf24] ss:$16 sps:$4 sm:$0xff]   ;;  %v9012_v32 = vld [vmem:[#allocation6 + $0xf2c] ss:$16 sps:$4 sm:$0xff]  }
 0x4f7   :  { %v3205_v38 = vpop.f32.mrb[12].mxu0  ;;  %v9887_v39 = vpop.f32.mrb[12].mxu1 }
 0x4f8   :  { %v8146_v40 = vadd.f32 %v3205_v38, %v2473_v34  ;;  %v3207_v46 = vpop.f32.mrb[13].mxu0  ;;  %v3289_v47 = vpop.f32.mrb[13].mxu1  ;;  %v9007_v34 = vld [vmem:[#allocation6 + $0xf20] ss:$16 sps:$4 sm:$0xff]   ;;  %v9018_v38 = vld [vmem:[#allocation6 + $0xf4c] ss:$16 sps:$4 sm:$0xff]  }
 0x4f9   :  { %v8147_v36 = vadd.f32 %v3207_v46, %v2477_v35  ;;  %v8149_v48 = vadd.f32 %v3289_v47, %v2485_v37  ;;  %v3209_v50 = vpop.f32.mrb[14].mxu0  ;;  %v3291_v51 = vpop.f32.mrb[14].mxu1  ;;  %v9010_v35 = vld [vmem:[#allocation6 + $0xf28] ss:$16 sps:$4 sm:$0xff]   ;;  %v9015_v37 = vld [vmem:[#allocation6 + $0xf44] ss:$16 sps:$4 sm:$0xff]  }
 0x4fa   :  { %vm3294_vm14 = vcmp.ge.f32.partialorder %v8146_v40, 0.0  ;;  %v3298_v17 = vmul.f32 0.2, %v8146_v40  ;;  %v3210_v55 = vpop.f32.mrb[15].mxu0  ;;  %v3292_v22 = vpop.f32.mrb[15].mxu1 }
 0x4fb   :  { %vm3295_vm15 = vcmp.ge.f32.partialorder %v8147_v36, 0.0  ;;  %v3299_v52 = vmul.f32 0.2, %v8147_v36  ;;  %vm3297_vm0 = vcmp.ge.f32.partialorder %v8149_v48, 0.0  ;;  %v3301_v53 = vmul.f32 0.2, %v8149_v48 }
 0x4fc   :  { %v3302_v54 = vsel %vm3294_vm14, %v8146_v40, %v3298_v17  ;;  %v9013_v40 = vld [vmem:[#allocation6 + $0xf40] ss:$16 sps:$4 sm:$0xff]   ;;  %v9016_v46 = vld [vmem:[#allocation6 + $0xf48] ss:$16 sps:$4 sm:$0xff]   ;;  %v9021_v47 = vld [vmem:[#allocation6 + $0xf64] ss:$16 sps:$4 sm:$0xff]   ;;  %v2481_v22 = vrot.slane %v9879_v33, %v9848_v58 }
 0x4fd   :  { %v3303_v56 = vsel %vm3295_vm15, %v8147_v36, %v3299_v52  ;;  %v3305_v62 = vsel %vm3297_vm0, %v8149_v48, %v3301_v53  ;;  %v3306_v63 = vpack.c.bf16 %v3302_v54, %v3302_v54  ;;  %v9024_v36 = vld [vmem:[#allocation6 + $0xf6c] ss:$16 sps:$4 sm:$0xff]   ;;  %v9019_v48 = vld [vmem:[#allocation6 + $0xf60] ss:$16 sps:$4 sm:$0xff]   ;;  %v9022_v50 = vld [vmem:[#allocation6 + $0xf68] ss:$16 sps:$4 sm:$0xff]  }
 0x4fe   :  { %v3307_v57 = vpack.c.bf16 %v3303_v56, %v3303_v56  ;;  %v3309_v41 = vpack.c.bf16 %v3305_v62, %v3305_v62  ;;  %v9027_v51 = vld [vmem:[#allocation6 + $0xf84] ss:$16 sps:$4 sm:$0xff]   ;;  %v9030_v17 = vld [vmem:[#allocation6 + $0xf8c] ss:$16 sps:$4 sm:$0xff]   ;;  %v9025_v52 = vld [vmem:[#allocation6 + $0xf80] ss:$16 sps:$4 sm:$0xff]   ;;  %v8148_v62 = vadd.f32 %v9887_v39, %v2481_v22 }
 0x4ff   :  { %v9028_v53 = vld [vmem:[#allocation6 + $0xf88] ss:$16 sps:$4 sm:$0xff]   ;;  %v9033_v54 = vld [vmem:[#allocation6 + $0xfa4] ss:$16 sps:$4 sm:$0xff]   ;;  %v9036_v55 = vld [vmem:[#allocation6 + $0xfac] ss:$16 sps:$4 sm:$0xff]  }
 0x500   :  { %4134 = vmatprep.mubr.bf16.mxu0 %v3307_v57  ;;  %4216 = vmatprep.mubr.bf16.mxu1 %v3307_v57  ;;  %v9031_v56 = vld [vmem:[#allocation6 + $0xfa0] ss:$16 sps:$4 sm:$0xff]   ;;  %v9034_v57 = vld [vmem:[#allocation6 + $0xfa8] ss:$16 sps:$4 sm:$0xff]   ;;  %vm3296_vm1 = vcmp.ge.f32.partialorder %v8148_v62, 0.0 }
 0x501   :  { %4135 = vmatmul.mubr.bf16.vlgmr.msra.gmra.mrb[16].mxu0 %v3306_v63  ;;  %4217 = vmatmul.mubr.bf16.vlgmr.msra.gmra.mrb[16].mxu1 %v3306_v63  ;;  %v9037_v63 = vld [vmem:[#allocation6 + $0xfc0] ss:$16 sps:$4 sm:$0xff]   ;;  %v9120_v22 = vld [vmem:[#allocation6 + $0x116c] ss:$16 sps:$4 sm:$0xff]  }
 0x502   :  { %4144 = vmatpush1.bf16.msra.mxu0 %v8953_v59  ;;  %4226 = vmatpush1.bf16.msra.mxu1 %v8956_v60  ;;  %v9039_v59 = vld [vmem:[#allocation6 + $0xfc4] ss:$16 sps:$4 sm:$0xff]   ;;  %v9042_v60 = vld [vmem:[#allocation6 + $0xfcc] ss:$16 sps:$4 sm:$0xff]   ;;  %v9043_v33 = vld [vmem:[#allocation6 + $0xfe0] ss:$16 sps:$4 sm:$0xff]  }
 0x503   :  { %4175 = vmatprep.mubr.bf16.mxu0 %v3309_v41  ;;  %4257 = vmatprep.mubr.bf16.mxu1 %v3309_v41  ;;  %v9048_v41 = vld [vmem:[#allocation6 + $0xfec] ss:$16 sps:$4 sm:$0xff]   ;;  %v9049_v39 = vld [vmem:[#allocation6 + $0x1000] ss:$16 sps:$4 sm:$0xff]  }
 0x504   :  { %4145 = vmatprep.subr.bf16.mxu0 %v8961_v0  ;;  %4227 = vmatprep.subr.bf16.mxu1 %v8964_v1  ;;  %v9040_v0 = vld [vmem:[#allocation6 + $0xfc8] ss:$16 sps:$4 sm:$0xff]   ;;  %v9045_v1 = vld [vmem:[#allocation6 + $0xfe4] ss:$16 sps:$4 sm:$0xff]  }
 0x506   :  { %4146 = vmatpush1.bf16.msra.mxu0 %v8959_v3  ;;  %4228 = vmatpush1.bf16.msra.mxu1 %v8962_v4  ;;  %v3300_v3 = vmul.f32 0.2, %v8148_v62  ;;  %v9046_v4 = vld [vmem:[#allocation6 + $0xfe8] ss:$16 sps:$4 sm:$0xff]  }
 0x507   :  { %4147 = vmatprep.subr.bf16.mxu0 %v8967_v5  ;;  %4229 = vmatprep.subr.bf16.mxu1 %v8970_v6  ;;  %v9051_v5 = vld [vmem:[#allocation6 + $0x1004] ss:$16 sps:$4 sm:$0xff]   ;;  %v9054_v6 = vld [vmem:[#allocation6 + $0x100c] ss:$16 sps:$4 sm:$0xff]  }
 0x50a   :  { %4148 = vmatpush1.bf16.msra.mxu0 %v8965_v7  ;;  %4230 = vmatpush1.bf16.msra.mxu1 %v8968_v8  ;;  %v3304_v7 = vsel %vm3296_vm1, %v8148_v62, %v3300_v3  ;;  %v9052_v8 = vld [vmem:[#allocation6 + $0x1008] ss:$16 sps:$4 sm:$0xff]   ;;  %v9121_v62 = vld [vmem:[#allocation6 + $0x1180] ss:$16 sps:$4 sm:$0xff]  }
 0x50b   :  { %4149 = vmatprep.subr.bf16.mxu0 %v8973_v42  ;;  %4231 = vmatprep.subr.bf16.mxu1 %v8976_v9  ;;  %v3308_v42 = vpack.c.bf16 %v3304_v7, %v3304_v7  ;;  %v9057_v9 = vld [vmem:[#allocation6 + $0x1024] ss:$16 sps:$4 sm:$0xff]   ;;  %v9130_v3 = vld [vmem:[#allocation6 + $0x11a8] ss:$16 sps:$4 sm:$0xff]  }
 0x50c   :  { %v9141_v7 = vld [vmem:[#allocation6 + $0x11e4] ss:$16 sps:$4 sm:$0xff]  }
 0x50e   :  { %4150 = vmatpush1.bf16.msra.mxu0 %v8971_v10  ;;  %4232 = vmatpush1.bf16.msra.mxu1 %v8974_v11  ;;  %v9060_v10 = vld [vmem:[#allocation6 + $0x102c] ss:$16 sps:$4 sm:$0xff]   ;;  %v9055_v11 = vld [vmem:[#allocation6 + $0x1020] ss:$16 sps:$4 sm:$0xff]  }
 0x50f   :  { %4151 = vmatprep.subr.bf16.mxu0 %v8979_v12  ;;  %4233 = vmatprep.subr.bf16.mxu1 %v8982_v49  ;;  %v9058_v12 = vld [vmem:[#allocation6 + $0x1028] ss:$16 sps:$4 sm:$0xff]   ;;  %v9063_v49 = vld [vmem:[#allocation6 + $0x1044] ss:$16 sps:$4 sm:$0xff]  }
 0x512   :  { %4152 = vmatpush1.bf16.msra.mxu0 %v8977_v13  ;;  %4234 = vmatpush1.bf16.msra.mxu1 %v8980_v14  ;;  %v9066_v13 = vld [vmem:[#allocation6 + $0x104c] ss:$16 sps:$4 sm:$0xff]   ;;  %v9061_v14 = vld [vmem:[#allocation6 + $0x1040] ss:$16 sps:$4 sm:$0xff]  }
 0x513   :  { %4153 = vmatprep.subr.bf16.mxu0 %v8985_v15  ;;  %4235 = vmatprep.subr.bf16.mxu1 %v8988_v16  ;;  %v9064_v15 = vld [vmem:[#allocation6 + $0x1048] ss:$16 sps:$4 sm:$0xff]   ;;  %v9069_v16 = vld [vmem:[#allocation6 + $0x1064] ss:$16 sps:$4 sm:$0xff]  }
 0x516   :  { %4154 = vmatpush1.bf16.msra.mxu0 %v8983_v18  ;;  %4236 = vmatpush1.bf16.msra.mxu1 %v8986_v19  ;;  %v9072_v18 = vld [vmem:[#allocation6 + $0x106c] ss:$16 sps:$4 sm:$0xff]   ;;  %v9067_v19 = vld [vmem:[#allocation6 + $0x1060] ss:$16 sps:$4 sm:$0xff]  }
 0x517   :  { %4155 = vmatprep.subr.bf16.mxu0 %v8991_v20  ;;  %4237 = vmatprep.subr.bf16.mxu1 %v8994_v21  ;;  %v9070_v20 = vld [vmem:[#allocation6 + $0x1068] ss:$16 sps:$4 sm:$0xff]   ;;  %v9075_v21 = vld [vmem:[#allocation6 + $0x1084] ss:$16 sps:$4 sm:$0xff]  }
 0x51a   :  { %4156 = vmatpush1.bf16.msra.mxu0 %v8989_v23  ;;  %4238 = vmatpush1.bf16.msra.mxu1 %v8992_v24  ;;  %v9078_v23 = vld [vmem:[#allocation6 + $0x108c] ss:$16 sps:$4 sm:$0xff]   ;;  %v9073_v24 = vld [vmem:[#allocation6 + $0x1080] ss:$16 sps:$4 sm:$0xff]  }
 0x51b   :  { %4157 = vmatprep.subr.bf16.mxu0 %v8997_v61  ;;  %4239 = vmatprep.subr.bf16.mxu1 %v9000_v25  ;;  %v9076_v61 = vld [vmem:[#allocation6 + $0x1088] ss:$16 sps:$4 sm:$0xff]   ;;  %v9081_v25 = vld [vmem:[#allocation6 + $0x10a4] ss:$16 sps:$4 sm:$0xff]  }
 0x51e   :  { %4158 = vmatpush1.bf16.msra.mxu0 %v8995_v26  ;;  %4240 = vmatpush1.bf16.msra.mxu1 %v8998_v27  ;;  %v9084_v26 = vld [vmem:[#allocation6 + $0x10ac] ss:$16 sps:$4 sm:$0xff]   ;;  %v9079_v27 = vld [vmem:[#allocation6 + $0x10a0] ss:$16 sps:$4 sm:$0xff]  }
 0x51f   :  { %4159 = vmatprep.subr.bf16.mxu0 %v9003_v28  ;;  %4241 = vmatprep.subr.bf16.mxu1 %v9006_v2  ;;  %v9082_v28 = vld [vmem:[#allocation6 + $0x10a8] ss:$16 sps:$4 sm:$0xff]   ;;  %v9087_v2 = vld [vmem:[#allocation6 + $0x10c4] ss:$16 sps:$4 sm:$0xff]  }
 0x522   :  { %4160 = vmatpush1.bf16.msra.mxu0 %v9001_v29  ;;  %4242 = vmatpush1.bf16.msra.mxu1 %v9004_v30  ;;  %v9090_v29 = vld [vmem:[#allocation6 + $0x10cc] ss:$16 sps:$4 sm:$0xff]   ;;  %v9085_v30 = vld [vmem:[#allocation6 + $0x10c0] ss:$16 sps:$4 sm:$0xff]  }
 0x523   :  { %4161 = vmatprep.subr.bf16.mxu0 %v9009_v31  ;;  %4243 = vmatprep.subr.bf16.mxu1 %v9012_v32  ;;  %v9088_v31 = vld [vmem:[#allocation6 + $0x10c8] ss:$16 sps:$4 sm:$0xff]   ;;  %v9093_v32 = vld [vmem:[#allocation6 + $0x10e4] ss:$16 sps:$4 sm:$0xff]  }
 0x526   :  { %4162 = vmatpush1.bf16.msra.mxu0 %v9007_v34  ;;  %4244 = vmatpush1.bf16.msra.mxu1 %v9010_v35  ;;  %v9096_v34 = vld [vmem:[#allocation6 + $0x10ec] ss:$16 sps:$4 sm:$0xff]   ;;  %v9091_v35 = vld [vmem:[#allocation6 + $0x10e0] ss:$16 sps:$4 sm:$0xff]  }
 0x527   :  { %4163 = vmatprep.subr.bf16.mxu0 %v9015_v37  ;;  %4245 = vmatprep.subr.bf16.mxu1 %v9018_v38  ;;  %v9094_v37 = vld [vmem:[#allocation6 + $0x10e8] ss:$16 sps:$4 sm:$0xff]   ;;  %v9099_v38 = vld [vmem:[#allocation6 + $0x1104] ss:$16 sps:$4 sm:$0xff]  }
 0x52a   :  { %4164 = vmatpush1.bf16.msra.mxu0 %v9013_v40  ;;  %4246 = vmatpush1.bf16.msra.mxu1 %v9016_v46  ;;  %v9102_v40 = vld [vmem:[#allocation6 + $0x110c] ss:$16 sps:$4 sm:$0xff]   ;;  %v9097_v46 = vld [vmem:[#allocation6 + $0x1100] ss:$16 sps:$4 sm:$0xff]  }
 0x52b   :  { %4165 = vmatprep.subr.bf16.mxu0 %v9021_v47  ;;  %4247 = vmatprep.subr.bf16.mxu1 %v9024_v36  ;;  %v9100_v47 = vld [vmem:[#allocation6 + $0x1108] ss:$16 sps:$4 sm:$0xff]   ;;  %v9105_v36 = vld [vmem:[#allocation6 + $0x1124] ss:$16 sps:$4 sm:$0xff]  }
 0x52e   :  { %4166 = vmatpush1.bf16.msra.mxu0 %v9019_v48  ;;  %4248 = vmatpush1.bf16.msra.mxu1 %v9022_v50  ;;  %v9108_v48 = vld [vmem:[#allocation6 + $0x112c] ss:$16 sps:$4 sm:$0xff]   ;;  %v9103_v50 = vld [vmem:[#allocation6 + $0x1120] ss:$16 sps:$4 sm:$0xff]  }
 0x52f   :  { %4167 = vmatprep.subr.bf16.mxu0 %v9027_v51  ;;  %4249 = vmatprep.subr.bf16.mxu1 %v9030_v17  ;;  %v9106_v51 = vld [vmem:[#allocation6 + $0x1128] ss:$16 sps:$4 sm:$0xff]   ;;  %v9111_v17 = vld [vmem:[#allocation6 + $0x1144] ss:$16 sps:$4 sm:$0xff]  }
 0x532   :  { %4168 = vmatpush1.bf16.msra.mxu0 %v9025_v52  ;;  %4250 = vmatpush1.bf16.msra.mxu1 %v9028_v53  ;;  %v9114_v52 = vld [vmem:[#allocation6 + $0x114c] ss:$16 sps:$4 sm:$0xff]   ;;  %v9109_v53 = vld [vmem:[#allocation6 + $0x1140] ss:$16 sps:$4 sm:$0xff]  }
 0x533   :  { %4169 = vmatprep.subr.bf16.mxu0 %v9033_v54  ;;  %4251 = vmatprep.subr.bf16.mxu1 %v9036_v55  ;;  %v9112_v54 = vld [vmem:[#allocation6 + $0x1148] ss:$16 sps:$4 sm:$0xff]   ;;  %v9117_v55 = vld [vmem:[#allocation6 + $0x1164] ss:$16 sps:$4 sm:$0xff]  }
 0x536   :  { %4170 = vmatpush1.bf16.msra.mxu0 %v9031_v56  ;;  %4252 = vmatpush1.bf16.msra.mxu1 %v9034_v57  ;;  %v9115_v56 = vld [vmem:[#allocation6 + $0x1160] ss:$16 sps:$4 sm:$0xff]   ;;  %v9118_v57 = vld [vmem:[#allocation6 + $0x1168] ss:$16 sps:$4 sm:$0xff]  }
 0x537   :  { %4171 = vmatprep.subr.bf16.mxu0 %v9039_v59  ;;  %4253 = vmatprep.subr.bf16.mxu1 %v9042_v60  ;;  %v9123_v59 = vld [vmem:[#allocation6 + $0x1184] ss:$16 sps:$4 sm:$0xff]   ;;  %v9126_v60 = vld [vmem:[#allocation6 + $0x118c] ss:$16 sps:$4 sm:$0xff]  }
 0x53a   :  { %4172 = vmatpush1.bf16.msra.mxu0 %v9037_v63  ;;  %4254 = vmatpush1.bf16.msra.mxu1 %v9040_v0  ;;  %v9124_v63 = vld [vmem:[#allocation6 + $0x1188] ss:$16 sps:$4 sm:$0xff]   ;;  %v9129_v0 = vld [vmem:[#allocation6 + $0x11a4] ss:$16 sps:$4 sm:$0xff]  }
 0x53b   :  { %4173 = vmatprep.subr.bf16.mxu0 %v9045_v1  ;;  %4255 = vmatprep.subr.bf16.mxu1 %v9048_v41  ;;  %v9132_v1 = vld [vmem:[#allocation6 + $0x11ac] ss:$16 sps:$4 sm:$0xff]   ;;  %v9127_v41 = vld [vmem:[#allocation6 + $0x11a0] ss:$16 sps:$4 sm:$0xff]  }
 0x53e   :  { %4174 = vmatpush1.bf16.msra.mxu0 %v9043_v33  ;;  %4256 = vmatpush1.bf16.msra.mxu1 %v9046_v4  ;;  %v9135_v33 = vld [vmem:[#allocation6 + $0x11c4] ss:$16 sps:$4 sm:$0xff]   ;;  %v9138_v4 = vld [vmem:[#allocation6 + $0x11cc] ss:$16 sps:$4 sm:$0xff]  }
 0x53f   :  { %5074 = vmatprep.subr.bf16.mxu0 %v9051_v5  ;;  %5156 = vmatprep.subr.bf16.mxu1 %v9054_v6  ;;  %v9133_v5 = vld [vmem:[#allocation6 + $0x11c0] ss:$16 sps:$4 sm:$0xff]   ;;  %v9136_v6 = vld [vmem:[#allocation6 + $0x11c8] ss:$16 sps:$4 sm:$0xff]  }
 0x541   :  { %4176 = vmatmul.mubr.bf16.vlgmr.msra.gmra.mrb[16].mxu0 %v3308_v42  ;;  %4258 = vmatmul.mubr.bf16.vlgmr.msra.gmra.mrb[16].mxu1 %v3308_v42  ;;  %v9142_v42 = vld [vmem:[#allocation6 + $0x11e8] ss:$16 sps:$4 sm:$0xff]  }
 0x542   :  { %5075 = vmatpush1.bf16.msra.mxu0 %v9049_v39  ;;  %5157 = vmatpush1.bf16.msra.mxu1 %v9052_v8  ;;  %v9144_v39 = vld [vmem:[#allocation6 + $0x11ec] ss:$16 sps:$4 sm:$0xff]   ;;  %v9139_v8 = vld [vmem:[#allocation6 + $0x11e0] ss:$16 sps:$4 sm:$0xff]  }
 0x543   :  { %5076 = vmatprep.subr.bf16.mxu0 %v9057_v9  ;;  %5158 = vmatprep.subr.bf16.mxu1 %v9060_v10  ;;  %v9147_v9 = vld [vmem:[#allocation6 + $0x1204] ss:$16 sps:$4 sm:$0xff]   ;;  %v9150_v10 = vld [vmem:[#allocation6 + $0x120c] ss:$16 sps:$4 sm:$0xff]  }
 0x546   :  { %5077 = vmatpush1.bf16.msra.mxu0 %v9055_v11  ;;  %5159 = vmatpush1.bf16.msra.mxu1 %v9058_v12  ;;  %v9892_v11 = vld [vmem:[#allocation7 + $0xc] sm:$0xf] }
 0x547   :  { %5078 = vmatprep.subr.bf16.mxu0 %v9063_v49  ;;  %5160 = vmatprep.subr.bf16.mxu1 %v9066_v13  ;;  %v3445_v12 = vrot.slane %v9892_v11, %v9831_v43  ;;  %v3449_v49 = vrot.slane %v9892_v11, %v9834_v44  ;;  %v3457_v13 = vrot.slane %v9892_v11, %v9837_v45 }
 0x54a   :  { %5079 = vmatpush1.bf16.msra.mxu0 %v9061_v14  ;;  %5161 = vmatpush1.bf16.msra.mxu1 %v9064_v15 }
 0x54b   :  { %5080 = vmatprep.subr.bf16.mxu0 %v9069_v16  ;;  %5162 = vmatprep.subr.bf16.mxu1 %v9072_v18 }
 0x54e   :  { %5081 = vmatpush1.bf16.msra.mxu0 %v9067_v19  ;;  %5163 = vmatpush1.bf16.msra.mxu1 %v9070_v20 }
 0x54f   :  { %5082 = vmatprep.subr.bf16.mxu0 %v9075_v21  ;;  %5164 = vmatprep.subr.bf16.mxu1 %v9078_v23 }
 0x552   :  { %5083 = vmatpush1.bf16.msra.mxu0 %v9073_v24  ;;  %5165 = vmatpush1.bf16.msra.mxu1 %v9076_v61 }
 0x553   :  { %5084 = vmatprep.subr.bf16.mxu0 %v9081_v25  ;;  %5166 = vmatprep.subr.bf16.mxu1 %v9084_v26 }
 0x556   :  { %5085 = vmatpush1.bf16.msra.mxu0 %v9079_v27  ;;  %5167 = vmatpush1.bf16.msra.mxu1 %v9082_v28 }
 0x557   :  { %5086 = vmatprep.subr.bf16.mxu0 %v9087_v2  ;;  %5168 = vmatprep.subr.bf16.mxu1 %v9090_v29 }
 0x55a   :  { %5087 = vmatpush1.bf16.msra.mxu0 %v9085_v30  ;;  %5169 = vmatpush1.bf16.msra.mxu1 %v9088_v31  ;;  %v9145_v31 = vld [vmem:[#allocation6 + $0x1200] ss:$16 sps:$4 sm:$0xff]  }
 0x55b   :  { %5088 = vmatprep.subr.bf16.mxu0 %v9093_v32  ;;  %5170 = vmatprep.subr.bf16.mxu1 %v9096_v34  ;;  %v9148_v32 = vld [vmem:[#allocation6 + $0x1208] ss:$16 sps:$4 sm:$0xff]  }
 0x55e   :  { %5089 = vmatpush1.bf16.msra.mxu0 %v9091_v35  ;;  %5171 = vmatpush1.bf16.msra.mxu1 %v9094_v37  ;;  %v9153_v37 = vld [vmem:[#allocation6 + $0x1224] ss:$16 sps:$4 sm:$0xff]  }
 0x55f   :  { %5090 = vmatprep.subr.bf16.mxu0 %v9099_v38  ;;  %5172 = vmatprep.subr.bf16.mxu1 %v9102_v40  ;;  %v9156_v38 = vld [vmem:[#allocation6 + $0x122c] ss:$16 sps:$4 sm:$0xff]  }
 0x562   :  { %5091 = vmatpush1.bf16.msra.mxu0 %v9097_v46  ;;  %5173 = vmatpush1.bf16.msra.mxu1 %v9100_v47  ;;  %v9151_v46 = vld [vmem:[#allocation6 + $0x1220] ss:$16 sps:$4 sm:$0xff]   ;;  %v9154_v47 = vld [vmem:[#allocation6 + $0x1228] ss:$16 sps:$4 sm:$0xff]  }
 0x563   :  { %5092 = vmatprep.subr.bf16.mxu0 %v9105_v36  ;;  %5174 = vmatprep.subr.bf16.mxu1 %v9108_v48  ;;  %v9159_v36 = vld [vmem:[#allocation6 + $0x1244] ss:$16 sps:$4 sm:$0xff]   ;;  %v9162_v48 = vld [vmem:[#allocation6 + $0x124c] ss:$16 sps:$4 sm:$0xff]  }
 0x566   :  { %5093 = vmatpush1.bf16.msra.mxu0 %v9103_v50  ;;  %5175 = vmatpush1.bf16.msra.mxu1 %v9106_v51  ;;  %v9157_v50 = vld [vmem:[#allocation6 + $0x1240] ss:$16 sps:$4 sm:$0xff]   ;;  %v9160_v51 = vld [vmem:[#allocation6 + $0x1248] ss:$16 sps:$4 sm:$0xff]  }
 0x567   :  { %5094 = vmatprep.subr.bf16.mxu0 %v9111_v17  ;;  %5176 = vmatprep.subr.bf16.mxu1 %v9114_v52  ;;  %v9165_v17 = vld [vmem:[#allocation6 + $0x1264] ss:$16 sps:$4 sm:$0xff]   ;;  %v9168_v52 = vld [vmem:[#allocation6 + $0x126c] ss:$16 sps:$4 sm:$0xff]  }
 0x56a   :  { %5095 = vmatpush1.bf16.msra.mxu0 %v9109_v53  ;;  %5177 = vmatpush1.bf16.msra.mxu1 %v9112_v54  ;;  %v9163_v53 = vld [vmem:[#allocation6 + $0x1260] ss:$16 sps:$4 sm:$0xff]   ;;  %v9166_v54 = vld [vmem:[#allocation6 + $0x1268] ss:$16 sps:$4 sm:$0xff]  }
 0x56b   :  { %5096 = vmatprep.subr.bf16.mxu0 %v9117_v55  ;;  %5178 = vmatprep.subr.bf16.mxu1 %v9120_v22  ;;  %v9171_v55 = vld [vmem:[#allocation6 + $0x1284] ss:$16 sps:$4 sm:$0xff]   ;;  %v9174_v22 = vld [vmem:[#allocation6 + $0x128c] ss:$16 sps:$4 sm:$0xff]  }
 0x56e   :  { %5097 = vmatpush1.bf16.msra.mxu0 %v9115_v56  ;;  %5179 = vmatpush1.bf16.msra.mxu1 %v9118_v57  ;;  %v9169_v56 = vld [vmem:[#allocation6 + $0x1280] ss:$16 sps:$4 sm:$0xff]   ;;  %v9172_v57 = vld [vmem:[#allocation6 + $0x1288] ss:$16 sps:$4 sm:$0xff]  }
 0x56f   :  { %5098 = vmatprep.subr.bf16.mxu0 %v9123_v59  ;;  %5180 = vmatprep.subr.bf16.mxu1 %v9126_v60  ;;  %v9177_v59 = vld [vmem:[#allocation6 + $0x12a4] ss:$16 sps:$4 sm:$0xff]   ;;  %v9180_v60 = vld [vmem:[#allocation6 + $0x12ac] ss:$16 sps:$4 sm:$0xff]  }
 0x572   :  { %5099 = vmatpush1.bf16.msra.mxu0 %v9121_v62  ;;  %5181 = vmatpush1.bf16.msra.mxu1 %v9124_v63  ;;  %v9175_v62 = vld [vmem:[#allocation6 + $0x12a0] ss:$16 sps:$4 sm:$0xff]   ;;  %v9178_v63 = vld [vmem:[#allocation6 + $0x12a8] ss:$16 sps:$4 sm:$0xff]  }
 0x573   :  { %5100 = vmatprep.subr.bf16.mxu0 %v9129_v0  ;;  %5182 = vmatprep.subr.bf16.mxu1 %v9132_v1  ;;  %v9183_v0 = vld [vmem:[#allocation6 + $0x12c4] ss:$16 sps:$4 sm:$0xff]   ;;  %v9186_v1 = vld [vmem:[#allocation6 + $0x12cc] ss:$16 sps:$4 sm:$0xff]  }
 0x576   :  { %5101 = vmatpush1.bf16.msra.mxu0 %v9127_v41  ;;  %5183 = vmatpush1.bf16.msra.mxu1 %v9130_v3  ;;  %v9181_v41 = vld [vmem:[#allocation6 + $0x12c0] ss:$16 sps:$4 sm:$0xff]   ;;  %v9184_v3 = vld [vmem:[#allocation6 + $0x12c8] ss:$16 sps:$4 sm:$0xff]  }
 0x577   :  { %5102 = vmatprep.subr.bf16.mxu0 %v9135_v33  ;;  %5184 = vmatprep.subr.bf16.mxu1 %v9138_v4  ;;  %v9189_v33 = vld [vmem:[#allocation6 + $0x12e4] ss:$16 sps:$4 sm:$0xff]   ;;  %v9192_v4 = vld [vmem:[#allocation6 + $0x12ec] ss:$16 sps:$4 sm:$0xff]  }
 0x57a   :  { %5103 = vmatpush1.bf16.msra.mxu0 %v9133_v5  ;;  %5185 = vmatpush1.bf16.msra.mxu1 %v9136_v6  ;;  %v9187_v5 = vld [vmem:[#allocation6 + $0x12e0] ss:$16 sps:$4 sm:$0xff]   ;;  %v9190_v6 = vld [vmem:[#allocation6 + $0x12e8] ss:$16 sps:$4 sm:$0xff]  }
 0x57b   :  { %5104 = vmatprep.subr.bf16.mxu0 %v9141_v7  ;;  %5186 = vmatprep.subr.bf16.mxu1 %v9144_v39  ;;  %v9195_v7 = vld [vmem:[#allocation6 + $0x1304] ss:$16 sps:$4 sm:$0xff]   ;;  %v9198_v39 = vld [vmem:[#allocation6 + $0x130c] ss:$16 sps:$4 sm:$0xff]  }
 0x57e   :  { %5105 = vmatpush1.bf16.msra.mxu0 %v9139_v8  ;;  %5187 = vmatpush1.bf16.msra.mxu1 %v9142_v42  ;;  %v9193_v8 = vld [vmem:[#allocation6 + $0x1300] ss:$16 sps:$4 sm:$0xff]   ;;  %v9196_v42 = vld [vmem:[#allocation6 + $0x1308] ss:$16 sps:$4 sm:$0xff]  }
 0x57f   :  { %5115 = vmatprep.subr.bf16.mxu0 %v9147_v9  ;;  %5197 = vmatprep.subr.bf16.mxu1 %v9150_v10  ;;  %v9201_v9 = vld [vmem:[#allocation6 + $0x1324] ss:$16 sps:$4 sm:$0xff]   ;;  %v9204_v10 = vld [vmem:[#allocation6 + $0x132c] ss:$16 sps:$4 sm:$0xff]  }
 0x614   :  { %v4177_v14 = vpop.f32.mrb[16].mxu0  ;;  %v9900_v15 = vpop.f32.mrb[16].mxu1 }
 0x615   :  { %v8150_v16 = vadd.f32 %v4177_v14, %v3445_v12  ;;  %v4179_v18 = vpop.f32.mrb[17].mxu0  ;;  %v4261_v19 = vpop.f32.mrb[17].mxu1  ;;  %v9199_v12 = vld [vmem:[#allocation6 + $0x1320] ss:$16 sps:$4 sm:$0xff]   ;;  %v9210_v14 = vld [vmem:[#allocation6 + $0x134c] ss:$16 sps:$4 sm:$0xff]  }
 0x616   :  { %v8151_v20 = vadd.f32 %v4179_v18, %v3449_v49  ;;  %v8153_v21 = vadd.f32 %v4261_v19, %v3457_v13  ;;  %v4181_v23 = vpop.f32.mrb[18].mxu0  ;;  %v4263_v24 = vpop.f32.mrb[18].mxu1  ;;  %v9202_v49 = vld [vmem:[#allocation6 + $0x1328] ss:$16 sps:$4 sm:$0xff]   ;;  %v9207_v13 = vld [vmem:[#allocation6 + $0x1344] ss:$16 sps:$4 sm:$0xff]  }
 0x617   :  { %vm4266_vm2 = vcmp.ge.f32.partialorder %v8150_v16, 0.0  ;;  %v4270_v61 = vmul.f32 0.2, %v8150_v16  ;;  %v4182_v28 = vpop.f32.mrb[19].mxu0  ;;  %v4264_v2 = vpop.f32.mrb[19].mxu1 }
 0x618   :  { %vm4267_vm3 = vcmp.ge.f32.partialorder %v8151_v20, 0.0  ;;  %v4271_v25 = vmul.f32 0.2, %v8151_v20  ;;  %vm4269_vm4 = vcmp.ge.f32.partialorder %v8153_v21, 0.0  ;;  %v4273_v26 = vmul.f32 0.2, %v8153_v21 }
 0x619   :  { %v4274_v27 = vsel %vm4266_vm2, %v8150_v16, %v4270_v61  ;;  %v9205_v16 = vld [vmem:[#allocation6 + $0x1340] ss:$16 sps:$4 sm:$0xff]   ;;  %v9208_v18 = vld [vmem:[#allocation6 + $0x1348] ss:$16 sps:$4 sm:$0xff]   ;;  %v9213_v19 = vld [vmem:[#allocation6 + $0x1364] ss:$16 sps:$4 sm:$0xff]   ;;  %v3453_v2 = vrot.slane %v9892_v11, %v9848_v58 }
 0x61a   :  { %v4275_v29 = vsel %vm4267_vm3, %v8151_v20, %v4271_v25  ;;  %v4277_v34 = vsel %vm4269_vm4, %v8153_v21, %v4273_v26  ;;  %v4278_v35 = vpack.c.bf16 %v4274_v27, %v4274_v27  ;;  %v9216_v20 = vld [vmem:[#allocation6 + $0x136c] ss:$16 sps:$4 sm:$0xff]   ;;  %v9211_v21 = vld [vmem:[#allocation6 + $0x1360] ss:$16 sps:$4 sm:$0xff]   ;;  %v9214_v23 = vld [vmem:[#allocation6 + $0x1368] ss:$16 sps:$4 sm:$0xff]  }
 0x61b   :  { %v4279_v30 = vpack.c.bf16 %v4275_v29, %v4275_v29  ;;  %v4281_v40 = vpack.c.bf16 %v4277_v34, %v4277_v34  ;;  %v9219_v24 = vld [vmem:[#allocation6 + $0x1384] ss:$16 sps:$4 sm:$0xff]   ;;  %v9222_v61 = vld [vmem:[#allocation6 + $0x138c] ss:$16 sps:$4 sm:$0xff]   ;;  %v9217_v25 = vld [vmem:[#allocation6 + $0x1380] ss:$16 sps:$4 sm:$0xff]   ;;  %v8152_v34 = vadd.f32 %v9900_v15, %v3453_v2 }
 0x61c   :  { %v9220_v26 = vld [vmem:[#allocation6 + $0x1388] ss:$16 sps:$4 sm:$0xff]   ;;  %v9225_v27 = vld [vmem:[#allocation6 + $0x13a4] ss:$16 sps:$4 sm:$0xff]   ;;  %v9228_v28 = vld [vmem:[#allocation6 + $0x13ac] ss:$16 sps:$4 sm:$0xff]  }
 0x61d   :  { %5106 = vmatprep.mubr.bf16.mxu0 %v4279_v30  ;;  %5188 = vmatprep.mubr.bf16.mxu1 %v4279_v30  ;;  %v9223_v29 = vld [vmem:[#allocation6 + $0x13a0] ss:$16 sps:$4 sm:$0xff]   ;;  %v9226_v30 = vld [vmem:[#allocation6 + $0x13a8] ss:$16 sps:$4 sm:$0xff]   ;;  %vm4268_vm5 = vcmp.ge.f32.partialorder %v8152_v34, 0.0 }
 0x61e   :  { %5107 = vmatmul.mubr.bf16.vlgmr.msra.gmra.mrb[20].mxu0 %v4278_v35  ;;  %5189 = vmatmul.mubr.bf16.vlgmr.msra.gmra.mrb[20].mxu1 %v4278_v35  ;;  %v9229_v35 = vld [vmem:[#allocation6 + $0x13c0] ss:$16 sps:$4 sm:$0xff]   ;;  %v9312_v2 = vld [vmem:[#allocation6 + $0x156c] ss:$16 sps:$4 sm:$0xff]  }
 0x61f   :  { %5116 = vmatpush1.bf16.msra.mxu0 %v9145_v31  ;;  %5198 = vmatpush1.bf16.msra.mxu1 %v9148_v32  ;;  %v9231_v31 = vld [vmem:[#allocation6 + $0x13c4] ss:$16 sps:$4 sm:$0xff]   ;;  %v9234_v32 = vld [vmem:[#allocation6 + $0x13cc] ss:$16 sps:$4 sm:$0xff]   ;;  %v9235_v11 = vld [vmem:[#allocation6 + $0x13e0] ss:$16 sps:$4 sm:$0xff]  }
 0x620   :  { %5147 = vmatprep.mubr.bf16.mxu0 %v4281_v40  ;;  %5229 = vmatprep.mubr.bf16.mxu1 %v4281_v40  ;;  %v9240_v40 = vld [vmem:[#allocation6 + $0x13ec] ss:$16 sps:$4 sm:$0xff]   ;;  %v9241_v15 = vld [vmem:[#allocation6 + $0x1400] ss:$16 sps:$4 sm:$0xff]  }
 0x621   :  { %5117 = vmatprep.subr.bf16.mxu0 %v9153_v37  ;;  %5199 = vmatprep.subr.bf16.mxu1 %v9156_v38  ;;  %v9232_v37 = vld [vmem:[#allocation6 + $0x13c8] ss:$16 sps:$4 sm:$0xff]   ;;  %v9237_v38 = vld [vmem:[#allocation6 + $0x13e4] ss:$16 sps:$4 sm:$0xff]  }
 0x623   :  { %5118 = vmatpush1.bf16.msra.mxu0 %v9151_v46  ;;  %5200 = vmatpush1.bf16.msra.mxu1 %v9154_v47  ;;  %v4272_v46 = vmul.f32 0.2, %v8152_v34  ;;  %v9238_v47 = vld [vmem:[#allocation6 + $0x13e8] ss:$16 sps:$4 sm:$0xff]  }
 0x624   :  { %5119 = vmatprep.subr.bf16.mxu0 %v9159_v36  ;;  %5201 = vmatprep.subr.bf16.mxu1 %v9162_v48  ;;  %v9243_v36 = vld [vmem:[#allocation6 + $0x1404] ss:$16 sps:$4 sm:$0xff]   ;;  %v9246_v48 = vld [vmem:[#allocation6 + $0x140c] ss:$16 sps:$4 sm:$0xff]  }
 0x627   :  { %5120 = vmatpush1.bf16.msra.mxu0 %v9157_v50  ;;  %5202 = vmatpush1.bf16.msra.mxu1 %v9160_v51  ;;  %v4276_v50 = vsel %vm4268_vm5, %v8152_v34, %v4272_v46  ;;  %v9244_v51 = vld [vmem:[#allocation6 + $0x1408] ss:$16 sps:$4 sm:$0xff]   ;;  %v9313_v34 = vld [vmem:[#allocation6 + $0x1580] ss:$16 sps:$4 sm:$0xff]  }
 0x628   :  { %5121 = vmatprep.subr.bf16.mxu0 %v9165_v17  ;;  %5203 = vmatprep.subr.bf16.mxu1 %v9168_v52  ;;  %v4280_v17 = vpack.c.bf16 %v4276_v50, %v4276_v50  ;;  %v9249_v52 = vld [vmem:[#allocation6 + $0x1424] ss:$16 sps:$4 sm:$0xff]   ;;  %v9322_v46 = vld [vmem:[#allocation6 + $0x15a8] ss:$16 sps:$4 sm:$0xff]  }
 0x629   :  { %v9333_v50 = vld [vmem:[#allocation6 + $0x15e4] ss:$16 sps:$4 sm:$0xff]  }
 0x62b   :  { %5122 = vmatpush1.bf16.msra.mxu0 %v9163_v53  ;;  %5204 = vmatpush1.bf16.msra.mxu1 %v9166_v54  ;;  %v9252_v53 = vld [vmem:[#allocation6 + $0x142c] ss:$16 sps:$4 sm:$0xff]   ;;  %v9247_v54 = vld [vmem:[#allocation6 + $0x1420] ss:$16 sps:$4 sm:$0xff]  }
 0x62c   :  { %5123 = vmatprep.subr.bf16.mxu0 %v9171_v55  ;;  %5205 = vmatprep.subr.bf16.mxu1 %v9174_v22  ;;  %v9250_v55 = vld [vmem:[#allocation6 + $0x1428] ss:$16 sps:$4 sm:$0xff]   ;;  %v9255_v22 = vld [vmem:[#allocation6 + $0x1444] ss:$16 sps:$4 sm:$0xff]  }
 0x62f   :  { %5124 = vmatpush1.bf16.msra.mxu0 %v9169_v56  ;;  %5206 = vmatpush1.bf16.msra.mxu1 %v9172_v57  ;;  %v9258_v56 = vld [vmem:[#allocation6 + $0x144c] ss:$16 sps:$4 sm:$0xff]   ;;  %v9253_v57 = vld [vmem:[#allocation6 + $0x1440] ss:$16 sps:$4 sm:$0xff]  }
 0x630   :  { %5125 = vmatprep.subr.bf16.mxu0 %v9177_v59  ;;  %5207 = vmatprep.subr.bf16.mxu1 %v9180_v60  ;;  %v9256_v59 = vld [vmem:[#allocation6 + $0x1448] ss:$16 sps:$4 sm:$0xff]   ;;  %v9261_v60 = vld [vmem:[#allocation6 + $0x1464] ss:$16 sps:$4 sm:$0xff]  }
 0x633   :  { %5126 = vmatpush1.bf16.msra.mxu0 %v9175_v62  ;;  %5208 = vmatpush1.bf16.msra.mxu1 %v9178_v63  ;;  %v9264_v62 = vld [vmem:[#allocation6 + $0x146c] ss:$16 sps:$4 sm:$0xff]   ;;  %v9259_v63 = vld [vmem:[#allocation6 + $0x1460] ss:$16 sps:$4 sm:$0xff]  }
 0x634   :  { %5127 = vmatprep.subr.bf16.mxu0 %v9183_v0  ;;  %5209 = vmatprep.subr.bf16.mxu1 %v9186_v1  ;;  %v9262_v0 = vld [vmem:[#allocation6 + $0x1468] ss:$16 sps:$4 sm:$0xff]   ;;  %v9267_v1 = vld [vmem:[#allocation6 + $0x1484] ss:$16 sps:$4 sm:$0xff]  }
 0x637   :  { %5128 = vmatpush1.bf16.msra.mxu0 %v9181_v41  ;;  %5210 = vmatpush1.bf16.msra.mxu1 %v9184_v3  ;;  %v9270_v41 = vld [vmem:[#allocation6 + $0x148c] ss:$16 sps:$4 sm:$0xff]   ;;  %v9265_v3 = vld [vmem:[#allocation6 + $0x1480] ss:$16 sps:$4 sm:$0xff]  }
 0x638   :  { %5129 = vmatprep.subr.bf16.mxu0 %v9189_v33  ;;  %5211 = vmatprep.subr.bf16.mxu1 %v9192_v4  ;;  %v9268_v33 = vld [vmem:[#allocation6 + $0x1488] ss:$16 sps:$4 sm:$0xff]   ;;  %v9273_v4 = vld [vmem:[#allocation6 + $0x14a4] ss:$16 sps:$4 sm:$0xff]  }
 0x63b   :  { %5130 = vmatpush1.bf16.msra.mxu0 %v9187_v5  ;;  %5212 = vmatpush1.bf16.msra.mxu1 %v9190_v6  ;;  %v9276_v5 = vld [vmem:[#allocation6 + $0x14ac] ss:$16 sps:$4 sm:$0xff]   ;;  %v9271_v6 = vld [vmem:[#allocation6 + $0x14a0] ss:$16 sps:$4 sm:$0xff]  }
 0x63c   :  { %5131 = vmatprep.subr.bf16.mxu0 %v9195_v7  ;;  %5213 = vmatprep.subr.bf16.mxu1 %v9198_v39  ;;  %v9274_v7 = vld [vmem:[#allocation6 + $0x14a8] ss:$16 sps:$4 sm:$0xff]   ;;  %v9279_v39 = vld [vmem:[#allocation6 + $0x14c4] ss:$16 sps:$4 sm:$0xff]  }
 0x63f   :  { %5132 = vmatpush1.bf16.msra.mxu0 %v9193_v8  ;;  %5214 = vmatpush1.bf16.msra.mxu1 %v9196_v42  ;;  %v9282_v8 = vld [vmem:[#allocation6 + $0x14cc] ss:$16 sps:$4 sm:$0xff]   ;;  %v9277_v42 = vld [vmem:[#allocation6 + $0x14c0] ss:$16 sps:$4 sm:$0xff]  }
 0x640   :  { %5133 = vmatprep.subr.bf16.mxu0 %v9201_v9  ;;  %5215 = vmatprep.subr.bf16.mxu1 %v9204_v10  ;;  %v9280_v9 = vld [vmem:[#allocation6 + $0x14c8] ss:$16 sps:$4 sm:$0xff]   ;;  %v9285_v10 = vld [vmem:[#allocation6 + $0x14e4] ss:$16 sps:$4 sm:$0xff]  }
 0x643   :  { %5134 = vmatpush1.bf16.msra.mxu0 %v9199_v12  ;;  %5216 = vmatpush1.bf16.msra.mxu1 %v9202_v49  ;;  %v9288_v12 = vld [vmem:[#allocation6 + $0x14ec] ss:$16 sps:$4 sm:$0xff]   ;;  %v9283_v49 = vld [vmem:[#allocation6 + $0x14e0] ss:$16 sps:$4 sm:$0xff]  }
 0x644   :  { %5135 = vmatprep.subr.bf16.mxu0 %v9207_v13  ;;  %5217 = vmatprep.subr.bf16.mxu1 %v9210_v14  ;;  %v9286_v13 = vld [vmem:[#allocation6 + $0x14e8] ss:$16 sps:$4 sm:$0xff]   ;;  %v9291_v14 = vld [vmem:[#allocation6 + $0x1504] ss:$16 sps:$4 sm:$0xff]  }
 0x647   :  { %5136 = vmatpush1.bf16.msra.mxu0 %v9205_v16  ;;  %5218 = vmatpush1.bf16.msra.mxu1 %v9208_v18  ;;  %v9294_v16 = vld [vmem:[#allocation6 + $0x150c] ss:$16 sps:$4 sm:$0xff]   ;;  %v9289_v18 = vld [vmem:[#allocation6 + $0x1500] ss:$16 sps:$4 sm:$0xff]  }
 0x648   :  { %5137 = vmatprep.subr.bf16.mxu0 %v9213_v19  ;;  %5219 = vmatprep.subr.bf16.mxu1 %v9216_v20  ;;  %v9292_v19 = vld [vmem:[#allocation6 + $0x1508] ss:$16 sps:$4 sm:$0xff]   ;;  %v9297_v20 = vld [vmem:[#allocation6 + $0x1524] ss:$16 sps:$4 sm:$0xff]  }
 0x64b   :  { %5138 = vmatpush1.bf16.msra.mxu0 %v9211_v21  ;;  %5220 = vmatpush1.bf16.msra.mxu1 %v9214_v23  ;;  %v9300_v21 = vld [vmem:[#allocation6 + $0x152c] ss:$16 sps:$4 sm:$0xff]   ;;  %v9295_v23 = vld [vmem:[#allocation6 + $0x1520] ss:$16 sps:$4 sm:$0xff]  }
 0x64c   :  { %5139 = vmatprep.subr.bf16.mxu0 %v9219_v24  ;;  %5221 = vmatprep.subr.bf16.mxu1 %v9222_v61  ;;  %v9298_v24 = vld [vmem:[#allocation6 + $0x1528] ss:$16 sps:$4 sm:$0xff]   ;;  %v9303_v61 = vld [vmem:[#allocation6 + $0x1544] ss:$16 sps:$4 sm:$0xff]  }
 0x64f   :  { %5140 = vmatpush1.bf16.msra.mxu0 %v9217_v25  ;;  %5222 = vmatpush1.bf16.msra.mxu1 %v9220_v26  ;;  %v9306_v25 = vld [vmem:[#allocation6 + $0x154c] ss:$16 sps:$4 sm:$0xff]   ;;  %v9301_v26 = vld [vmem:[#allocation6 + $0x1540] ss:$16 sps:$4 sm:$0xff]  }
 0x650   :  { %5141 = vmatprep.subr.bf16.mxu0 %v9225_v27  ;;  %5223 = vmatprep.subr.bf16.mxu1 %v9228_v28  ;;  %v9304_v27 = vld [vmem:[#allocation6 + $0x1548] ss:$16 sps:$4 sm:$0xff]   ;;  %v9309_v28 = vld [vmem:[#allocation6 + $0x1564] ss:$16 sps:$4 sm:$0xff]  }
 0x653   :  { %5142 = vmatpush1.bf16.msra.mxu0 %v9223_v29  ;;  %5224 = vmatpush1.bf16.msra.mxu1 %v9226_v30  ;;  %v9307_v29 = vld [vmem:[#allocation6 + $0x1560] ss:$16 sps:$4 sm:$0xff]   ;;  %v9310_v30 = vld [vmem:[#allocation6 + $0x1568] ss:$16 sps:$4 sm:$0xff]  }
 0x654   :  { %5143 = vmatprep.subr.bf16.mxu0 %v9231_v31  ;;  %5225 = vmatprep.subr.bf16.mxu1 %v9234_v32  ;;  %v9315_v31 = vld [vmem:[#allocation6 + $0x1584] ss:$16 sps:$4 sm:$0xff]   ;;  %v9318_v32 = vld [vmem:[#allocation6 + $0x158c] ss:$16 sps:$4 sm:$0xff]  }
 0x657   :  { %5144 = vmatpush1.bf16.msra.mxu0 %v9229_v35  ;;  %5226 = vmatpush1.bf16.msra.mxu1 %v9232_v37  ;;  %v9316_v35 = vld [vmem:[#allocation6 + $0x1588] ss:$16 sps:$4 sm:$0xff]   ;;  %v9321_v37 = vld [vmem:[#allocation6 + $0x15a4] ss:$16 sps:$4 sm:$0xff]  }
 0x658   :  { %5145 = vmatprep.subr.bf16.mxu0 %v9237_v38  ;;  %5227 = vmatprep.subr.bf16.mxu1 %v9240_v40  ;;  %v9324_v38 = vld [vmem:[#allocation6 + $0x15ac] ss:$16 sps:$4 sm:$0xff]   ;;  %v9319_v40 = vld [vmem:[#allocation6 + $0x15a0] ss:$16 sps:$4 sm:$0xff]  }
 0x65b   :  { %5146 = vmatpush1.bf16.msra.mxu0 %v9235_v11  ;;  %5228 = vmatpush1.bf16.msra.mxu1 %v9238_v47  ;;  %v9327_v11 = vld [vmem:[#allocation6 + $0x15c4] ss:$16 sps:$4 sm:$0xff]   ;;  %v9330_v47 = vld [vmem:[#allocation6 + $0x15cc] ss:$16 sps:$4 sm:$0xff]  }
 0x65c   :  { %6046 = vmatprep.subr.bf16.mxu0 %v9243_v36  ;;  %6128 = vmatprep.subr.bf16.mxu1 %v9246_v48  ;;  %v9325_v36 = vld [vmem:[#allocation6 + $0x15c0] ss:$16 sps:$4 sm:$0xff]   ;;  %v9328_v48 = vld [vmem:[#allocation6 + $0x15c8] ss:$16 sps:$4 sm:$0xff]  }
 0x65e   :  { %5148 = vmatmul.mubr.bf16.vlgmr.msra.gmra.mrb[20].mxu0 %v4280_v17  ;;  %5230 = vmatmul.mubr.bf16.vlgmr.msra.gmra.mrb[20].mxu1 %v4280_v17  ;;  %v9334_v17 = vld [vmem:[#allocation6 + $0x15e8] ss:$16 sps:$4 sm:$0xff]  }
 0x65f   :  { %6047 = vmatpush1.bf16.msra.mxu0 %v9241_v15  ;;  %6129 = vmatpush1.bf16.msra.mxu1 %v9244_v51  ;;  %v9336_v15 = vld [vmem:[#allocation6 + $0x15ec] ss:$16 sps:$4 sm:$0xff]   ;;  %v9331_v51 = vld [vmem:[#allocation6 + $0x15e0] ss:$16 sps:$4 sm:$0xff]  }
 0x660   :  { %6048 = vmatprep.subr.bf16.mxu0 %v9249_v52  ;;  %6130 = vmatprep.subr.bf16.mxu1 %v9252_v53  ;;  %v9339_v52 = vld [vmem:[#allocation6 + $0x1604] ss:$16 sps:$4 sm:$0xff]   ;;  %v9342_v53 = vld [vmem:[#allocation6 + $0x160c] ss:$16 sps:$4 sm:$0xff]  }
 0x663   :  { %6049 = vmatpush1.bf16.msra.mxu0 %v9247_v54  ;;  %6131 = vmatpush1.bf16.msra.mxu1 %v9250_v55  ;;  %v9905_v54 = vld [vmem:[#allocation7 + $0x10] sm:$0xf] }
 0x664   :  { %6050 = vmatprep.subr.bf16.mxu0 %v9255_v22  ;;  %6132 = vmatprep.subr.bf16.mxu1 %v9258_v56  ;;  %v4417_v55 = vrot.slane %v9905_v54, %v9831_v43  ;;  %v4421_v22 = vrot.slane %v9905_v54, %v9834_v44  ;;  %v4429_v56 = vrot.slane %v9905_v54, %v9837_v45 }
 0x667   :  { %6051 = vmatpush1.bf16.msra.mxu0 %v9253_v57  ;;  %6133 = vmatpush1.bf16.msra.mxu1 %v9256_v59 }
 0x668   :  { %6052 = vmatprep.subr.bf16.mxu0 %v9261_v60  ;;  %6134 = vmatprep.subr.bf16.mxu1 %v9264_v62 }
 0x66b   :  { %6053 = vmatpush1.bf16.msra.mxu0 %v9259_v63  ;;  %6135 = vmatpush1.bf16.msra.mxu1 %v9262_v0 }
 0x66c   :  { %6054 = vmatprep.subr.bf16.mxu0 %v9267_v1  ;;  %6136 = vmatprep.subr.bf16.mxu1 %v9270_v41 }
 0x66f   :  { %6055 = vmatpush1.bf16.msra.mxu0 %v9265_v3  ;;  %6137 = vmatpush1.bf16.msra.mxu1 %v9268_v33 }
 0x670   :  { %6056 = vmatprep.subr.bf16.mxu0 %v9273_v4  ;;  %6138 = vmatprep.subr.bf16.mxu1 %v9276_v5 }
 0x673   :  { %6057 = vmatpush1.bf16.msra.mxu0 %v9271_v6  ;;  %6139 = vmatpush1.bf16.msra.mxu1 %v9274_v7 }
 0x674   :  { %6058 = vmatprep.subr.bf16.mxu0 %v9279_v39  ;;  %6140 = vmatprep.subr.bf16.mxu1 %v9282_v8 }
 0x677   :  { %6059 = vmatpush1.bf16.msra.mxu0 %v9277_v42  ;;  %6141 = vmatpush1.bf16.msra.mxu1 %v9280_v9  ;;  %v9337_v9 = vld [vmem:[#allocation6 + $0x1600] ss:$16 sps:$4 sm:$0xff]  }
 0x678   :  { %6060 = vmatprep.subr.bf16.mxu0 %v9285_v10  ;;  %6142 = vmatprep.subr.bf16.mxu1 %v9288_v12  ;;  %v9340_v10 = vld [vmem:[#allocation6 + $0x1608] ss:$16 sps:$4 sm:$0xff]  }
 0x67b   :  { %6061 = vmatpush1.bf16.msra.mxu0 %v9283_v49  ;;  %6143 = vmatpush1.bf16.msra.mxu1 %v9286_v13  ;;  %v9345_v13 = vld [vmem:[#allocation6 + $0x1624] ss:$16 sps:$4 sm:$0xff]  }
 0x67c   :  { %6062 = vmatprep.subr.bf16.mxu0 %v9291_v14  ;;  %6144 = vmatprep.subr.bf16.mxu1 %v9294_v16  ;;  %v9348_v14 = vld [vmem:[#allocation6 + $0x162c] ss:$16 sps:$4 sm:$0xff]  }
 0x67f   :  { %6063 = vmatpush1.bf16.msra.mxu0 %v9289_v18  ;;  %6145 = vmatpush1.bf16.msra.mxu1 %v9292_v19  ;;  %v9343_v18 = vld [vmem:[#allocation6 + $0x1620] ss:$16 sps:$4 sm:$0xff]   ;;  %v9346_v19 = vld [vmem:[#allocation6 + $0x1628] ss:$16 sps:$4 sm:$0xff]  }
 0x680   :  { %6064 = vmatprep.subr.bf16.mxu0 %v9297_v20  ;;  %6146 = vmatprep.subr.bf16.mxu1 %v9300_v21  ;;  %v9351_v20 = vld [vmem:[#allocation6 + $0x1644] ss:$16 sps:$4 sm:$0xff]   ;;  %v9354_v21 = vld [vmem:[#allocation6 + $0x164c] ss:$16 sps:$4 sm:$0xff]  }
 0x683   :  { %6065 = vmatpush1.bf16.msra.mxu0 %v9295_v23  ;;  %6147 = vmatpush1.bf16.msra.mxu1 %v9298_v24  ;;  %v9349_v23 = vld [vmem:[#allocation6 + $0x1640] ss:$16 sps:$4 sm:$0xff]   ;;  %v9352_v24 = vld [vmem:[#allocation6 + $0x1648] ss:$16 sps:$4 sm:$0xff]  }
 0x684   :  { %6066 = vmatprep.subr.bf16.mxu0 %v9303_v61  ;;  %6148 = vmatprep.subr.bf16.mxu1 %v9306_v25  ;;  %v9357_v61 = vld [vmem:[#allocation6 + $0x1664] ss:$16 sps:$4 sm:$0xff]   ;;  %v9360_v25 = vld [vmem:[#allocation6 + $0x166c] ss:$16 sps:$4 sm:$0xff]  }
 0x687   :  { %6067 = vmatpush1.bf16.msra.mxu0 %v9301_v26  ;;  %6149 = vmatpush1.bf16.msra.mxu1 %v9304_v27  ;;  %v9355_v26 = vld [vmem:[#allocation6 + $0x1660] ss:$16 sps:$4 sm:$0xff]   ;;  %v9358_v27 = vld [vmem:[#allocation6 + $0x1668] ss:$16 sps:$4 sm:$0xff]  }
 0x688   :  { %6068 = vmatprep.subr.bf16.mxu0 %v9309_v28  ;;  %6150 = vmatprep.subr.bf16.mxu1 %v9312_v2  ;;  %v9363_v28 = vld [vmem:[#allocation6 + $0x1684] ss:$16 sps:$4 sm:$0xff]   ;;  %v9366_v2 = vld [vmem:[#allocation6 + $0x168c] ss:$16 sps:$4 sm:$0xff]  }
 0x68b   :  { %6069 = vmatpush1.bf16.msra.mxu0 %v9307_v29  ;;  %6151 = vmatpush1.bf16.msra.mxu1 %v9310_v30  ;;  %v9361_v29 = vld [vmem:[#allocation6 + $0x1680] ss:$16 sps:$4 sm:$0xff]   ;;  %v9364_v30 = vld [vmem:[#allocation6 + $0x1688] ss:$16 sps:$4 sm:$0xff]  }
 0x68c   :  { %6070 = vmatprep.subr.bf16.mxu0 %v9315_v31  ;;  %6152 = vmatprep.subr.bf16.mxu1 %v9318_v32  ;;  %v9369_v31 = vld [vmem:[#allocation6 + $0x16a4] ss:$16 sps:$4 sm:$0xff]   ;;  %v9372_v32 = vld [vmem:[#allocation6 + $0x16ac] ss:$16 sps:$4 sm:$0xff]  }
 0x68f   :  { %6071 = vmatpush1.bf16.msra.mxu0 %v9313_v34  ;;  %6153 = vmatpush1.bf16.msra.mxu1 %v9316_v35  ;;  %v9367_v34 = vld [vmem:[#allocation6 + $0x16a0] ss:$16 sps:$4 sm:$0xff]   ;;  %v9370_v35 = vld [vmem:[#allocation6 + $0x16a8] ss:$16 sps:$4 sm:$0xff]  }
 0x690   :  { %6072 = vmatprep.subr.bf16.mxu0 %v9321_v37  ;;  %6154 = vmatprep.subr.bf16.mxu1 %v9324_v38  ;;  %v9375_v37 = vld [vmem:[#allocation6 + $0x16c4] ss:$16 sps:$4 sm:$0xff]   ;;  %v9378_v38 = vld [vmem:[#allocation6 + $0x16cc] ss:$16 sps:$4 sm:$0xff]  }
 0x693   :  { %6073 = vmatpush1.bf16.msra.mxu0 %v9319_v40  ;;  %6155 = vmatpush1.bf16.msra.mxu1 %v9322_v46  ;;  %v9373_v40 = vld [vmem:[#allocation6 + $0x16c0] ss:$16 sps:$4 sm:$0xff]   ;;  %v9376_v46 = vld [vmem:[#allocation6 + $0x16c8] ss:$16 sps:$4 sm:$0xff]  }
 0x694   :  { %6074 = vmatprep.subr.bf16.mxu0 %v9327_v11  ;;  %6156 = vmatprep.subr.bf16.mxu1 %v9330_v47  ;;  %v9381_v11 = vld [vmem:[#allocation6 + $0x16e4] ss:$16 sps:$4 sm:$0xff]   ;;  %v9384_v47 = vld [vmem:[#allocation6 + $0x16ec] ss:$16 sps:$4 sm:$0xff]  }
 0x697   :  { %6075 = vmatpush1.bf16.msra.mxu0 %v9325_v36  ;;  %6157 = vmatpush1.bf16.msra.mxu1 %v9328_v48  ;;  %v9379_v36 = vld [vmem:[#allocation6 + $0x16e0] ss:$16 sps:$4 sm:$0xff]   ;;  %v9382_v48 = vld [vmem:[#allocation6 + $0x16e8] ss:$16 sps:$4 sm:$0xff]  }
 0x698   :  { %6076 = vmatprep.subr.bf16.mxu0 %v9333_v50  ;;  %6158 = vmatprep.subr.bf16.mxu1 %v9336_v15  ;;  %v9387_v50 = vld [vmem:[#allocation6 + $0x1704] ss:$16 sps:$4 sm:$0xff]   ;;  %v9390_v15 = vld [vmem:[#allocation6 + $0x170c] ss:$16 sps:$4 sm:$0xff]  }
 0x69b   :  { %6077 = vmatpush1.bf16.msra.mxu0 %v9331_v51  ;;  %6159 = vmatpush1.bf16.msra.mxu1 %v9334_v17  ;;  %v9385_v51 = vld [vmem:[#allocation6 + $0x1700] ss:$16 sps:$4 sm:$0xff]   ;;  %v9388_v17 = vld [vmem:[#allocation6 + $0x1708] ss:$16 sps:$4 sm:$0xff]  }
 0x69c   :  { %6087 = vmatprep.subr.bf16.mxu0 %v9339_v52  ;;  %6169 = vmatprep.subr.bf16.mxu1 %v9342_v53  ;;  %v9393_v52 = vld [vmem:[#allocation6 + $0x1724] ss:$16 sps:$4 sm:$0xff]   ;;  %v9396_v53 = vld [vmem:[#allocation6 + $0x172c] ss:$16 sps:$4 sm:$0xff]  }
 0x731   :  { %v5149_v57 = vpop.f32.mrb[20].mxu0  ;;  %v9913_v59 = vpop.f32.mrb[20].mxu1 }
 0x732   :  { %v8154_v60 = vadd.f32 %v5149_v57, %v4417_v55  ;;  %v5151_v62 = vpop.f32.mrb[21].mxu0  ;;  %v5233_v63 = vpop.f32.mrb[21].mxu1  ;;  %v9391_v55 = vld [vmem:[#allocation6 + $0x1720] ss:$16 sps:$4 sm:$0xff]   ;;  %v9402_v57 = vld [vmem:[#allocation6 + $0x174c] ss:$16 sps:$4 sm:$0xff]  }
 0x733   :  { %v8155_v0 = vadd.f32 %v5151_v62, %v4421_v22  ;;  %v8157_v1 = vadd.f32 %v5233_v63, %v4429_v56  ;;  %v5153_v41 = vpop.f32.mrb[22].mxu0  ;;  %v5235_v3 = vpop.f32.mrb[22].mxu1  ;;  %v9394_v22 = vld [vmem:[#allocation6 + $0x1728] ss:$16 sps:$4 sm:$0xff]   ;;  %v9399_v56 = vld [vmem:[#allocation6 + $0x1744] ss:$16 sps:$4 sm:$0xff]  }
 0x734   :  { %vm5238_vm6 = vcmp.ge.f32.partialorder %v8154_v60, 0.0  ;;  %v5242_v33 = vmul.f32 0.2, %v8154_v60  ;;  %v5154_v7 = vpop.f32.mrb[23].mxu0  ;;  %v5236_v39 = vpop.f32.mrb[23].mxu1 }
 0x735   :  { %vm5239_vm7 = vcmp.ge.f32.partialorder %v8155_v0, 0.0  ;;  %v5243_v4 = vmul.f32 0.2, %v8155_v0  ;;  %vm5241_vm8 = vcmp.ge.f32.partialorder %v8157_v1, 0.0  ;;  %v5245_v5 = vmul.f32 0.2, %v8157_v1 }
 0x736   :  { %v5246_v6 = vsel %vm5238_vm6, %v8154_v60, %v5242_v33  ;;  %v9397_v60 = vld [vmem:[#allocation6 + $0x1740] ss:$16 sps:$4 sm:$0xff]   ;;  %v9400_v62 = vld [vmem:[#allocation6 + $0x1748] ss:$16 sps:$4 sm:$0xff]   ;;  %v9405_v63 = vld [vmem:[#allocation6 + $0x1764] ss:$16 sps:$4 sm:$0xff]   ;;  %v4425_v39 = vrot.slane %v9905_v54, %v9848_v58 }
 0x737   :  { %v5247_v8 = vsel %vm5239_vm7, %v8155_v0, %v5243_v4  ;;  %v5249_v12 = vsel %vm5241_vm8, %v8157_v1, %v5245_v5  ;;  %v5250_v49 = vpack.c.bf16 %v5246_v6, %v5246_v6  ;;  %v9408_v0 = vld [vmem:[#allocation6 + $0x176c] ss:$16 sps:$4 sm:$0xff]   ;;  %v9403_v1 = vld [vmem:[#allocation6 + $0x1760] ss:$16 sps:$4 sm:$0xff]   ;;  %v9406_v41 = vld [vmem:[#allocation6 + $0x1768] ss:$16 sps:$4 sm:$0xff]  }
 0x738   :  { %v5251_v42 = vpack.c.bf16 %v5247_v8, %v5247_v8  ;;  %v5253_v16 = vpack.c.bf16 %v5249_v12, %v5249_v12  ;;  %v9411_v3 = vld [vmem:[#allocation6 + $0x1784] ss:$16 sps:$4 sm:$0xff]   ;;  %v9414_v33 = vld [vmem:[#allocation6 + $0x178c] ss:$16 sps:$4 sm:$0xff]   ;;  %v9409_v4 = vld [vmem:[#allocation6 + $0x1780] ss:$16 sps:$4 sm:$0xff]   ;;  %v8156_v12 = vadd.f32 %v9913_v59, %v4425_v39 }
 0x739   :  { %v9412_v5 = vld [vmem:[#allocation6 + $0x1788] ss:$16 sps:$4 sm:$0xff]   ;;  %v9417_v6 = vld [vmem:[#allocation6 + $0x17a4] ss:$16 sps:$4 sm:$0xff]   ;;  %v9420_v7 = vld [vmem:[#allocation6 + $0x17ac] ss:$16 sps:$4 sm:$0xff]  }
 0x73a   :  { %6078 = vmatprep.mubr.bf16.mxu0 %v5251_v42  ;;  %6160 = vmatprep.mubr.bf16.mxu1 %v5251_v42  ;;  %v9415_v8 = vld [vmem:[#allocation6 + $0x17a0] ss:$16 sps:$4 sm:$0xff]   ;;  %v9418_v42 = vld [vmem:[#allocation6 + $0x17a8] ss:$16 sps:$4 sm:$0xff]   ;;  %vm5240_vm9 = vcmp.ge.f32.partialorder %v8156_v12, 0.0 }
 0x73b   :  { %6079 = vmatmul.mubr.bf16.vlgmr.msra.gmra.mrb[24].mxu0 %v5250_v49  ;;  %6161 = vmatmul.mubr.bf16.vlgmr.msra.gmra.mrb[24].mxu1 %v5250_v49  ;;  %v9421_v49 = vld [vmem:[#allocation6 + $0x17c0] ss:$16 sps:$4 sm:$0xff]   ;;  %v9504_v39 = vld [vmem:[#allocation6 + $0x196c] ss:$16 sps:$4 sm:$0xff]  }
 0x73c   :  { %6088 = vmatpush1.bf16.msra.mxu0 %v9337_v9  ;;  %6170 = vmatpush1.bf16.msra.mxu1 %v9340_v10  ;;  %v9423_v9 = vld [vmem:[#allocation6 + $0x17c4] ss:$16 sps:$4 sm:$0xff]   ;;  %v9426_v10 = vld [vmem:[#allocation6 + $0x17cc] ss:$16 sps:$4 sm:$0xff]   ;;  %v9427_v54 = vld [vmem:[#allocation6 + $0x17e0] ss:$16 sps:$4 sm:$0xff]  }
 0x73d   :  { %6119 = vmatprep.mubr.bf16.mxu0 %v5253_v16  ;;  %6201 = vmatprep.mubr.bf16.mxu1 %v5253_v16  ;;  %v9432_v16 = vld [vmem:[#allocation6 + $0x17ec] ss:$16 sps:$4 sm:$0xff]   ;;  %v9433_v59 = vld [vmem:[#allocation6 + $0x1800] ss:$16 sps:$4 sm:$0xff]  }
 0x73e   :  { %6089 = vmatprep.subr.bf16.mxu0 %v9345_v13  ;;  %6171 = vmatprep.subr.bf16.mxu1 %v9348_v14  ;;  %v9424_v13 = vld [vmem:[#allocation6 + $0x17c8] ss:$16 sps:$4 sm:$0xff]   ;;  %v9429_v14 = vld [vmem:[#allocation6 + $0x17e4] ss:$16 sps:$4 sm:$0xff]  }
 0x740   :  { %6090 = vmatpush1.bf16.msra.mxu0 %v9343_v18  ;;  %6172 = vmatpush1.bf16.msra.mxu1 %v9346_v19  ;;  %v5244_v18 = vmul.f32 0.2, %v8156_v12  ;;  %v9430_v19 = vld [vmem:[#allocation6 + $0x17e8] ss:$16 sps:$4 sm:$0xff]  }
 0x741   :  { %6091 = vmatprep.subr.bf16.mxu0 %v9351_v20  ;;  %6173 = vmatprep.subr.bf16.mxu1 %v9354_v21  ;;  %v9435_v20 = vld [vmem:[#allocation6 + $0x1804] ss:$16 sps:$4 sm:$0xff]   ;;  %v9438_v21 = vld [vmem:[#allocation6 + $0x180c] ss:$16 sps:$4 sm:$0xff]  }
 0x744   :  { %6092 = vmatpush1.bf16.msra.mxu0 %v9349_v23  ;;  %6174 = vmatpush1.bf16.msra.mxu1 %v9352_v24  ;;  %v5248_v23 = vsel %vm5240_vm9, %v8156_v12, %v5244_v18  ;;  %v9436_v24 = vld [vmem:[#allocation6 + $0x1808] ss:$16 sps:$4 sm:$0xff]   ;;  %v9505_v12 = vld [vmem:[#allocation6 + $0x1980] ss:$16 sps:$4 sm:$0xff]  }
 0x745   :  { %6093 = vmatprep.subr.bf16.mxu0 %v9357_v61  ;;  %6175 = vmatprep.subr.bf16.mxu1 %v9360_v25  ;;  %v5252_v61 = vpack.c.bf16 %v5248_v23, %v5248_v23  ;;  %v9441_v25 = vld [vmem:[#allocation6 + $0x1824] ss:$16 sps:$4 sm:$0xff]   ;;  %v9514_v18 = vld [vmem:[#allocation6 + $0x19a8] ss:$16 sps:$4 sm:$0xff]  }
 0x746   :  { %v9525_v23 = vld [vmem:[#allocation6 + $0x19e4] ss:$16 sps:$4 sm:$0xff]  }
 0x748   :  { %6094 = vmatpush1.bf16.msra.mxu0 %v9355_v26  ;;  %6176 = vmatpush1.bf16.msra.mxu1 %v9358_v27  ;;  %v9444_v26 = vld [vmem:[#allocation6 + $0x182c] ss:$16 sps:$4 sm:$0xff]   ;;  %v9439_v27 = vld [vmem:[#allocation6 + $0x1820] ss:$16 sps:$4 sm:$0xff]  }
 0x749   :  { %6095 = vmatprep.subr.bf16.mxu0 %v9363_v28  ;;  %6177 = vmatprep.subr.bf16.mxu1 %v9366_v2  ;;  %v9442_v28 = vld [vmem:[#allocation6 + $0x1828] ss:$16 sps:$4 sm:$0xff]   ;;  %v9447_v2 = vld [vmem:[#allocation6 + $0x1844] ss:$16 sps:$4 sm:$0xff]  }
 0x74c   :  { %6096 = vmatpush1.bf16.msra.mxu0 %v9361_v29  ;;  %6178 = vmatpush1.bf16.msra.mxu1 %v9364_v30  ;;  %v9450_v29 = vld [vmem:[#allocation6 + $0x184c] ss:$16 sps:$4 sm:$0xff]   ;;  %v9445_v30 = vld [vmem:[#allocation6 + $0x1840] ss:$16 sps:$4 sm:$0xff]  }
 0x74d   :  { %6097 = vmatprep.subr.bf16.mxu0 %v9369_v31  ;;  %6179 = vmatprep.subr.bf16.mxu1 %v9372_v32  ;;  %v9448_v31 = vld [vmem:[#allocation6 + $0x1848] ss:$16 sps:$4 sm:$0xff]   ;;  %v9453_v32 = vld [vmem:[#allocation6 + $0x1864] ss:$16 sps:$4 sm:$0xff]  }
 0x750   :  { %6098 = vmatpush1.bf16.msra.mxu0 %v9367_v34  ;;  %6180 = vmatpush1.bf16.msra.mxu1 %v9370_v35  ;;  %v9456_v34 = vld [vmem:[#allocation6 + $0x186c] ss:$16 sps:$4 sm:$0xff]   ;;  %v9451_v35 = vld [vmem:[#allocation6 + $0x1860] ss:$16 sps:$4 sm:$0xff]  }
 0x751   :  { %6099 = vmatprep.subr.bf16.mxu0 %v9375_v37  ;;  %6181 = vmatprep.subr.bf16.mxu1 %v9378_v38  ;;  %v9454_v37 = vld [vmem:[#allocation6 + $0x1868] ss:$16 sps:$4 sm:$0xff]   ;;  %v9459_v38 = vld [vmem:[#allocation6 + $0x1884] ss:$16 sps:$4 sm:$0xff]  }
 0x754   :  { %6100 = vmatpush1.bf16.msra.mxu0 %v9373_v40  ;;  %6182 = vmatpush1.bf16.msra.mxu1 %v9376_v46  ;;  %v9462_v40 = vld [vmem:[#allocation6 + $0x188c] ss:$16 sps:$4 sm:$0xff]   ;;  %v9457_v46 = vld [vmem:[#allocation6 + $0x1880] ss:$16 sps:$4 sm:$0xff]  }
 0x755   :  { %6101 = vmatprep.subr.bf16.mxu0 %v9381_v11  ;;  %6183 = vmatprep.subr.bf16.mxu1 %v9384_v47  ;;  %v9460_v11 = vld [vmem:[#allocation6 + $0x1888] ss:$16 sps:$4 sm:$0xff]   ;;  %v9465_v47 = vld [vmem:[#allocation6 + $0x18a4] ss:$16 sps:$4 sm:$0xff]  }
 0x758   :  { %6102 = vmatpush1.bf16.msra.mxu0 %v9379_v36  ;;  %6184 = vmatpush1.bf16.msra.mxu1 %v9382_v48  ;;  %v9468_v36 = vld [vmem:[#allocation6 + $0x18ac] ss:$16 sps:$4 sm:$0xff]   ;;  %v9463_v48 = vld [vmem:[#allocation6 + $0x18a0] ss:$16 sps:$4 sm:$0xff]  }
 0x759   :  { %6103 = vmatprep.subr.bf16.mxu0 %v9387_v50  ;;  %6185 = vmatprep.subr.bf16.mxu1 %v9390_v15  ;;  %v9466_v50 = vld [vmem:[#allocation6 + $0x18a8] ss:$16 sps:$4 sm:$0xff]   ;;  %v9471_v15 = vld [vmem:[#allocation6 + $0x18c4] ss:$16 sps:$4 sm:$0xff]  }
 0x75c   :  { %6104 = vmatpush1.bf16.msra.mxu0 %v9385_v51  ;;  %6186 = vmatpush1.bf16.msra.mxu1 %v9388_v17  ;;  %v9474_v51 = vld [vmem:[#allocation6 + $0x18cc] ss:$16 sps:$4 sm:$0xff]   ;;  %v9469_v17 = vld [vmem:[#allocation6 + $0x18c0] ss:$16 sps:$4 sm:$0xff]  }
 0x75d   :  { %6105 = vmatprep.subr.bf16.mxu0 %v9393_v52  ;;  %6187 = vmatprep.subr.bf16.mxu1 %v9396_v53  ;;  %v9472_v52 = vld [vmem:[#allocation6 + $0x18c8] ss:$16 sps:$4 sm:$0xff]   ;;  %v9477_v53 = vld [vmem:[#allocation6 + $0x18e4] ss:$16 sps:$4 sm:$0xff]  }
 0x760   :  { %6106 = vmatpush1.bf16.msra.mxu0 %v9391_v55  ;;  %6188 = vmatpush1.bf16.msra.mxu1 %v9394_v22  ;;  %v9480_v55 = vld [vmem:[#allocation6 + $0x18ec] ss:$16 sps:$4 sm:$0xff]   ;;  %v9475_v22 = vld [vmem:[#allocation6 + $0x18e0] ss:$16 sps:$4 sm:$0xff]  }
 0x761   :  { %6107 = vmatprep.subr.bf16.mxu0 %v9399_v56  ;;  %6189 = vmatprep.subr.bf16.mxu1 %v9402_v57  ;;  %v9478_v56 = vld [vmem:[#allocation6 + $0x18e8] ss:$16 sps:$4 sm:$0xff]   ;;  %v9483_v57 = vld [vmem:[#allocation6 + $0x1904] ss:$16 sps:$4 sm:$0xff]  }
 0x764   :  { %6108 = vmatpush1.bf16.msra.mxu0 %v9397_v60  ;;  %6190 = vmatpush1.bf16.msra.mxu1 %v9400_v62  ;;  %v9486_v60 = vld [vmem:[#allocation6 + $0x190c] ss:$16 sps:$4 sm:$0xff]   ;;  %v9481_v62 = vld [vmem:[#allocation6 + $0x1900] ss:$16 sps:$4 sm:$0xff]  }
 0x765   :  { %6109 = vmatprep.subr.bf16.mxu0 %v9405_v63  ;;  %6191 = vmatprep.subr.bf16.mxu1 %v9408_v0  ;;  %v9484_v63 = vld [vmem:[#allocation6 + $0x1908] ss:$16 sps:$4 sm:$0xff]   ;;  %v9489_v0 = vld [vmem:[#allocation6 + $0x1924] ss:$16 sps:$4 sm:$0xff]  }
 0x768   :  { %6110 = vmatpush1.bf16.msra.mxu0 %v9403_v1  ;;  %6192 = vmatpush1.bf16.msra.mxu1 %v9406_v41  ;;  %v9492_v1 = vld [vmem:[#allocation6 + $0x192c] ss:$16 sps:$4 sm:$0xff]   ;;  %v9487_v41 = vld [vmem:[#allocation6 + $0x1920] ss:$16 sps:$4 sm:$0xff]  }
 0x769   :  { %6111 = vmatprep.subr.bf16.mxu0 %v9411_v3  ;;  %6193 = vmatprep.subr.bf16.mxu1 %v9414_v33  ;;  %v9490_v3 = vld [vmem:[#allocation6 + $0x1928] ss:$16 sps:$4 sm:$0xff]   ;;  %v9495_v33 = vld [vmem:[#allocation6 + $0x1944] ss:$16 sps:$4 sm:$0xff]  }
 0x76c   :  { %6112 = vmatpush1.bf16.msra.mxu0 %v9409_v4  ;;  %6194 = vmatpush1.bf16.msra.mxu1 %v9412_v5  ;;  %v9498_v4 = vld [vmem:[#allocation6 + $0x194c] ss:$16 sps:$4 sm:$0xff]   ;;  %v9493_v5 = vld [vmem:[#allocation6 + $0x1940] ss:$16 sps:$4 sm:$0xff]  }
 0x76d   :  { %6113 = vmatprep.subr.bf16.mxu0 %v9417_v6  ;;  %6195 = vmatprep.subr.bf16.mxu1 %v9420_v7  ;;  %v9496_v6 = vld [vmem:[#allocation6 + $0x1948] ss:$16 sps:$4 sm:$0xff]   ;;  %v9501_v7 = vld [vmem:[#allocation6 + $0x1964] ss:$16 sps:$4 sm:$0xff]  }
 0x770   :  { %6114 = vmatpush1.bf16.msra.mxu0 %v9415_v8  ;;  %6196 = vmatpush1.bf16.msra.mxu1 %v9418_v42  ;;  %v9499_v8 = vld [vmem:[#allocation6 + $0x1960] ss:$16 sps:$4 sm:$0xff]   ;;  %v9502_v42 = vld [vmem:[#allocation6 + $0x1968] ss:$16 sps:$4 sm:$0xff]  }
 0x771   :  { %6115 = vmatprep.subr.bf16.mxu0 %v9423_v9  ;;  %6197 = vmatprep.subr.bf16.mxu1 %v9426_v10  ;;  %v9507_v9 = vld [vmem:[#allocation6 + $0x1984] ss:$16 sps:$4 sm:$0xff]   ;;  %v9510_v10 = vld [vmem:[#allocation6 + $0x198c] ss:$16 sps:$4 sm:$0xff]  }
 0x774   :  { %6116 = vmatpush1.bf16.msra.mxu0 %v9421_v49  ;;  %6198 = vmatpush1.bf16.msra.mxu1 %v9424_v13  ;;  %v9508_v49 = vld [vmem:[#allocation6 + $0x1988] ss:$16 sps:$4 sm:$0xff]   ;;  %v9513_v13 = vld [vmem:[#allocation6 + $0x19a4] ss:$16 sps:$4 sm:$0xff]  }
 0x775   :  { %6117 = vmatprep.subr.bf16.mxu0 %v9429_v14  ;;  %6199 = vmatprep.subr.bf16.mxu1 %v9432_v16  ;;  %v9516_v14 = vld [vmem:[#allocation6 + $0x19ac] ss:$16 sps:$4 sm:$0xff]   ;;  %v9511_v16 = vld [vmem:[#allocation6 + $0x19a0] ss:$16 sps:$4 sm:$0xff]  }
 0x778   :  { %6118 = vmatpush1.bf16.msra.mxu0 %v9427_v54  ;;  %6200 = vmatpush1.bf16.msra.mxu1 %v9430_v19  ;;  %v9519_v54 = vld [vmem:[#allocation6 + $0x19c4] ss:$16 sps:$4 sm:$0xff]   ;;  %v9522_v19 = vld [vmem:[#allocation6 + $0x19cc] ss:$16 sps:$4 sm:$0xff]  }
 0x779   :  { %7018 = vmatprep.subr.bf16.mxu0 %v9435_v20  ;;  %7100 = vmatprep.subr.bf16.mxu1 %v9438_v21  ;;  %v9517_v20 = vld [vmem:[#allocation6 + $0x19c0] ss:$16 sps:$4 sm:$0xff]   ;;  %v9520_v21 = vld [vmem:[#allocation6 + $0x19c8] ss:$16 sps:$4 sm:$0xff]  }
 0x77b   :  { %6120 = vmatmul.mubr.bf16.vlgmr.msra.gmra.mrb[24].mxu0 %v5252_v61  ;;  %6202 = vmatmul.mubr.bf16.vlgmr.msra.gmra.mrb[24].mxu1 %v5252_v61  ;;  %v9526_v61 = vld [vmem:[#allocation6 + $0x19e8] ss:$16 sps:$4 sm:$0xff]  }
 0x77c   :  { %7019 = vmatpush1.bf16.msra.mxu0 %v9433_v59  ;;  %7101 = vmatpush1.bf16.msra.mxu1 %v9436_v24  ;;  %v9528_v59 = vld [vmem:[#allocation6 + $0x19ec] ss:$16 sps:$4 sm:$0xff]   ;;  %v9523_v24 = vld [vmem:[#allocation6 + $0x19e0] ss:$16 sps:$4 sm:$0xff]  }
 0x77d   :  { %7020 = vmatprep.subr.bf16.mxu0 %v9441_v25  ;;  %7102 = vmatprep.subr.bf16.mxu1 %v9444_v26  ;;  %v9531_v25 = vld [vmem:[#allocation6 + $0x1a04] ss:$16 sps:$4 sm:$0xff]   ;;  %v9534_v26 = vld [vmem:[#allocation6 + $0x1a0c] ss:$16 sps:$4 sm:$0xff]  }
 0x780   :  { %7021 = vmatpush1.bf16.msra.mxu0 %v9439_v27  ;;  %7103 = vmatpush1.bf16.msra.mxu1 %v9442_v28  ;;  %v9918_v27 = vld [vmem:[#allocation7 + $0x14] sm:$0xf] }
 0x781   :  { %7022 = vmatprep.subr.bf16.mxu0 %v9447_v2  ;;  %7104 = vmatprep.subr.bf16.mxu1 %v9450_v29  ;;  %v5389_v28 = vrot.slane %v9918_v27, %v9831_v43  ;;  %v5393_v2 = vrot.slane %v9918_v27, %v9834_v44  ;;  %v5401_v29 = vrot.slane %v9918_v27, %v9837_v45 }
 0x784   :  { %7023 = vmatpush1.bf16.msra.mxu0 %v9445_v30  ;;  %7105 = vmatpush1.bf16.msra.mxu1 %v9448_v31 }
 0x785   :  { %7024 = vmatprep.subr.bf16.mxu0 %v9453_v32  ;;  %7106 = vmatprep.subr.bf16.mxu1 %v9456_v34 }
 0x788   :  { %7025 = vmatpush1.bf16.msra.mxu0 %v9451_v35  ;;  %7107 = vmatpush1.bf16.msra.mxu1 %v9454_v37 }
 0x789   :  { %7026 = vmatprep.subr.bf16.mxu0 %v9459_v38  ;;  %7108 = vmatprep.subr.bf16.mxu1 %v9462_v40 }
 0x78c   :  { %7027 = vmatpush1.bf16.msra.mxu0 %v9457_v46  ;;  %7109 = vmatpush1.bf16.msra.mxu1 %v9460_v11 }
 0x78d   :  { %7028 = vmatprep.subr.bf16.mxu0 %v9465_v47  ;;  %7110 = vmatprep.subr.bf16.mxu1 %v9468_v36 }
 0x790   :  { %7029 = vmatpush1.bf16.msra.mxu0 %v9463_v48  ;;  %7111 = vmatpush1.bf16.msra.mxu1 %v9466_v50 }
 0x791   :  { %7030 = vmatprep.subr.bf16.mxu0 %v9471_v15  ;;  %7112 = vmatprep.subr.bf16.mxu1 %v9474_v51 }
 0x794   :  { %7031 = vmatpush1.bf16.msra.mxu0 %v9469_v17  ;;  %7113 = vmatpush1.bf16.msra.mxu1 %v9472_v52  ;;  %v9529_v52 = vld [vmem:[#allocation6 + $0x1a00] ss:$16 sps:$4 sm:$0xff]  }
 0x795   :  { %7032 = vmatprep.subr.bf16.mxu0 %v9477_v53  ;;  %7114 = vmatprep.subr.bf16.mxu1 %v9480_v55  ;;  %v9532_v53 = vld [vmem:[#allocation6 + $0x1a08] ss:$16 sps:$4 sm:$0xff]  }
 0x798   :  { %7033 = vmatpush1.bf16.msra.mxu0 %v9475_v22  ;;  %7115 = vmatpush1.bf16.msra.mxu1 %v9478_v56  ;;  %v9537_v56 = vld [vmem:[#allocation6 + $0x1a24] ss:$16 sps:$4 sm:$0xff]  }
 0x799   :  { %7034 = vmatprep.subr.bf16.mxu0 %v9483_v57  ;;  %7116 = vmatprep.subr.bf16.mxu1 %v9486_v60  ;;  %v9540_v57 = vld [vmem:[#allocation6 + $0x1a2c] ss:$16 sps:$4 sm:$0xff]  }
 0x79c   :  { %7035 = vmatpush1.bf16.msra.mxu0 %v9481_v62  ;;  %7117 = vmatpush1.bf16.msra.mxu1 %v9484_v63  ;;  %v9535_v62 = vld [vmem:[#allocation6 + $0x1a20] ss:$16 sps:$4 sm:$0xff]   ;;  %v9538_v63 = vld [vmem:[#allocation6 + $0x1a28] ss:$16 sps:$4 sm:$0xff]  }
 0x79d   :  { %7036 = vmatprep.subr.bf16.mxu0 %v9489_v0  ;;  %7118 = vmatprep.subr.bf16.mxu1 %v9492_v1  ;;  %v9543_v0 = vld [vmem:[#allocation6 + $0x1a44] ss:$16 sps:$4 sm:$0xff]   ;;  %v9546_v1 = vld [vmem:[#allocation6 + $0x1a4c] ss:$16 sps:$4 sm:$0xff]  }
 0x7a0   :  { %7037 = vmatpush1.bf16.msra.mxu0 %v9487_v41  ;;  %7119 = vmatpush1.bf16.msra.mxu1 %v9490_v3  ;;  %v9541_v41 = vld [vmem:[#allocation6 + $0x1a40] ss:$16 sps:$4 sm:$0xff]   ;;  %v9544_v3 = vld [vmem:[#allocation6 + $0x1a48] ss:$16 sps:$4 sm:$0xff]  }
 0x7a1   :  { %7038 = vmatprep.subr.bf16.mxu0 %v9495_v33  ;;  %7120 = vmatprep.subr.bf16.mxu1 %v9498_v4  ;;  %v9549_v33 = vld [vmem:[#allocation6 + $0x1a64] ss:$16 sps:$4 sm:$0xff]   ;;  %v9552_v4 = vld [vmem:[#allocation6 + $0x1a6c] ss:$16 sps:$4 sm:$0xff]  }
 0x7a4   :  { %7039 = vmatpush1.bf16.msra.mxu0 %v9493_v5  ;;  %7121 = vmatpush1.bf16.msra.mxu1 %v9496_v6  ;;  %v9547_v5 = vld [vmem:[#allocation6 + $0x1a60] ss:$16 sps:$4 sm:$0xff]   ;;  %v9550_v6 = vld [vmem:[#allocation6 + $0x1a68] ss:$16 sps:$4 sm:$0xff]  }
 0x7a5   :  { %7040 = vmatprep.subr.bf16.mxu0 %v9501_v7  ;;  %7122 = vmatprep.subr.bf16.mxu1 %v9504_v39  ;;  %v9555_v7 = vld [vmem:[#allocation6 + $0x1a84] ss:$16 sps:$4 sm:$0xff]   ;;  %v9558_v39 = vld [vmem:[#allocation6 + $0x1a8c] ss:$16 sps:$4 sm:$0xff]  }
 0x7a8   :  { %7041 = vmatpush1.bf16.msra.mxu0 %v9499_v8  ;;  %7123 = vmatpush1.bf16.msra.mxu1 %v9502_v42  ;;  %v9553_v8 = vld [vmem:[#allocation6 + $0x1a80] ss:$16 sps:$4 sm:$0xff]   ;;  %v9556_v42 = vld [vmem:[#allocation6 + $0x1a88] ss:$16 sps:$4 sm:$0xff]  }
 0x7a9   :  { %7042 = vmatprep.subr.bf16.mxu0 %v9507_v9  ;;  %7124 = vmatprep.subr.bf16.mxu1 %v9510_v10  ;;  %v9561_v9 = vld [vmem:[#allocation6 + $0x1aa4] ss:$16 sps:$4 sm:$0xff]   ;;  %v9564_v10 = vld [vmem:[#allocation6 + $0x1aac] ss:$16 sps:$4 sm:$0xff]  }
 0x7ac   :  { %7043 = vmatpush1.bf16.msra.mxu0 %v9505_v12  ;;  %7125 = vmatpush1.bf16.msra.mxu1 %v9508_v49  ;;  %v9559_v12 = vld [vmem:[#allocation6 + $0x1aa0] ss:$16 sps:$4 sm:$0xff]   ;;  %v9562_v49 = vld [vmem:[#allocation6 + $0x1aa8] ss:$16 sps:$4 sm:$0xff]  }
 0x7ad   :  { %7044 = vmatprep.subr.bf16.mxu0 %v9513_v13  ;;  %7126 = vmatprep.subr.bf16.mxu1 %v9516_v14  ;;  %v9567_v13 = vld [vmem:[#allocation6 + $0x1ac4] ss:$16 sps:$4 sm:$0xff]   ;;  %v9570_v14 = vld [vmem:[#allocation6 + $0x1acc] ss:$16 sps:$4 sm:$0xff]  }
 0x7b0   :  { %7045 = vmatpush1.bf16.msra.mxu0 %v9511_v16  ;;  %7127 = vmatpush1.bf16.msra.mxu1 %v9514_v18  ;;  %v9565_v16 = vld [vmem:[#allocation6 + $0x1ac0] ss:$16 sps:$4 sm:$0xff]   ;;  %v9568_v18 = vld [vmem:[#allocation6 + $0x1ac8] ss:$16 sps:$4 sm:$0xff]  }
 0x7b1   :  { %7046 = vmatprep.subr.bf16.mxu0 %v9519_v54  ;;  %7128 = vmatprep.subr.bf16.mxu1 %v9522_v19  ;;  %v9573_v54 = vld [vmem:[#allocation6 + $0x1ae4] ss:$16 sps:$4 sm:$0xff]   ;;  %v9576_v19 = vld [vmem:[#allocation6 + $0x1aec] ss:$16 sps:$4 sm:$0xff]  }
 0x7b4   :  { %7047 = vmatpush1.bf16.msra.mxu0 %v9517_v20  ;;  %7129 = vmatpush1.bf16.msra.mxu1 %v9520_v21  ;;  %v9571_v20 = vld [vmem:[#allocation6 + $0x1ae0] ss:$16 sps:$4 sm:$0xff]   ;;  %v9574_v21 = vld [vmem:[#allocation6 + $0x1ae8] ss:$16 sps:$4 sm:$0xff]  }
 0x7b5   :  { %7048 = vmatprep.subr.bf16.mxu0 %v9525_v23  ;;  %7130 = vmatprep.subr.bf16.mxu1 %v9528_v59  ;;  %v9579_v23 = vld [vmem:[#allocation6 + $0x1b04] ss:$16 sps:$4 sm:$0xff]   ;;  %v9582_v59 = vld [vmem:[#allocation6 + $0x1b0c] ss:$16 sps:$4 sm:$0xff]  }
 0x7b8   :  { %7049 = vmatpush1.bf16.msra.mxu0 %v9523_v24  ;;  %7131 = vmatpush1.bf16.msra.mxu1 %v9526_v61  ;;  %v9577_v24 = vld [vmem:[#allocation6 + $0x1b00] ss:$16 sps:$4 sm:$0xff]   ;;  %v9580_v61 = vld [vmem:[#allocation6 + $0x1b08] ss:$16 sps:$4 sm:$0xff]  }
 0x7b9   :  { %7059 = vmatprep.subr.bf16.mxu0 %v9531_v25  ;;  %7141 = vmatprep.subr.bf16.mxu1 %v9534_v26  ;;  %v9585_v25 = vld [vmem:[#allocation6 + $0x1b24] ss:$16 sps:$4 sm:$0xff]   ;;  %v9588_v26 = vld [vmem:[#allocation6 + $0x1b2c] ss:$16 sps:$4 sm:$0xff]  }
 0x84e   :  { %v6121_v30 = vpop.f32.mrb[24].mxu0  ;;  %v9926_v31 = vpop.f32.mrb[24].mxu1 }
 0x84f   :  { %v8158_v32 = vadd.f32 %v6121_v30, %v5389_v28  ;;  %v6123_v34 = vpop.f32.mrb[25].mxu0  ;;  %v6205_v35 = vpop.f32.mrb[25].mxu1  ;;  %v9583_v28 = vld [vmem:[#allocation6 + $0x1b20] ss:$16 sps:$4 sm:$0xff]   ;;  %v9594_v30 = vld [vmem:[#allocation6 + $0x1b4c] ss:$16 sps:$4 sm:$0xff]  }
 0x850   :  { %v8159_v37 = vadd.f32 %v6123_v34, %v5393_v2  ;;  %v8161_v38 = vadd.f32 %v6205_v35, %v5401_v29  ;;  %v6125_v40 = vpop.f32.mrb[26].mxu0  ;;  %v6207_v46 = vpop.f32.mrb[26].mxu1  ;;  %v9586_v2 = vld [vmem:[#allocation6 + $0x1b28] ss:$16 sps:$4 sm:$0xff]   ;;  %v9591_v29 = vld [vmem:[#allocation6 + $0x1b44] ss:$16 sps:$4 sm:$0xff]  }
 0x851   :  { %vm6210_vm10 = vcmp.ge.f32.partialorder %v8158_v32, 0.0  ;;  %v6214_v11 = vmul.f32 0.2, %v8158_v32  ;;  %v6126_v50 = vpop.f32.mrb[27].mxu0  ;;  %v6208_v15 = vpop.f32.mrb[27].mxu1 }
 0x852   :  { %vm6211_vm11 = vcmp.ge.f32.partialorder %v8159_v37, 0.0  ;;  %v6215_v47 = vmul.f32 0.2, %v8159_v37  ;;  %vm6213_vm12 = vcmp.ge.f32.partialorder %v8161_v38, 0.0  ;;  %v6217_v36 = vmul.f32 0.2, %v8161_v38 }
 0x853   :  { %v6218_v48 = vsel %vm6210_vm10, %v8158_v32, %v6214_v11  ;;  %v9589_v32 = vld [vmem:[#allocation6 + $0x1b40] ss:$16 sps:$4 sm:$0xff]   ;;  %v9592_v34 = vld [vmem:[#allocation6 + $0x1b48] ss:$16 sps:$4 sm:$0xff]   ;;  %v9597_v35 = vld [vmem:[#allocation6 + $0x1b64] ss:$16 sps:$4 sm:$0xff]   ;;  %v5397_v15 = vrot.slane %v9918_v27, %v9848_v58 }
 0x854   :  { %v6219_v51 = vsel %vm6211_vm11, %v8159_v37, %v6215_v47  ;;  %v6221_v55 = vsel %vm6213_vm12, %v8161_v38, %v6217_v36  ;;  %v6222_v22 = vpack.c.bf16 %v6218_v48, %v6218_v48  ;;  %v9600_v37 = vld [vmem:[#allocation6 + $0x1b6c] ss:$16 sps:$4 sm:$0xff]   ;;  %v9595_v38 = vld [vmem:[#allocation6 + $0x1b60] ss:$16 sps:$4 sm:$0xff]   ;;  %v9598_v40 = vld [vmem:[#allocation6 + $0x1b68] ss:$16 sps:$4 sm:$0xff]  }
 0x855   :  { %v6223_v17 = vpack.c.bf16 %v6219_v51, %v6219_v51  ;;  %v6225_v60 = vpack.c.bf16 %v6221_v55, %v6221_v55  ;;  %v9603_v46 = vld [vmem:[#allocation6 + $0x1b84] ss:$16 sps:$4 sm:$0xff]   ;;  %v9606_v11 = vld [vmem:[#allocation6 + $0x1b8c] ss:$16 sps:$4 sm:$0xff]   ;;  %v9601_v47 = vld [vmem:[#allocation6 + $0x1b80] ss:$16 sps:$4 sm:$0xff]   ;;  %v8160_v55 = vadd.f32 %v9926_v31, %v5397_v15 }
 0x856   :  { %v9604_v36 = vld [vmem:[#allocation6 + $0x1b88] ss:$16 sps:$4 sm:$0xff]   ;;  %v9609_v48 = vld [vmem:[#allocation6 + $0x1ba4] ss:$16 sps:$4 sm:$0xff]   ;;  %v9612_v50 = vld [vmem:[#allocation6 + $0x1bac] ss:$16 sps:$4 sm:$0xff]  }
 0x857   :  { %7050 = vmatprep.mubr.bf16.mxu0 %v6223_v17  ;;  %7132 = vmatprep.mubr.bf16.mxu1 %v6223_v17  ;;  %v9607_v51 = vld [vmem:[#allocation6 + $0x1ba0] ss:$16 sps:$4 sm:$0xff]   ;;  %v9610_v17 = vld [vmem:[#allocation6 + $0x1ba8] ss:$16 sps:$4 sm:$0xff]   ;;  %vm6212_vm13 = vcmp.ge.f32.partialorder %v8160_v55, 0.0 }
 0x858   :  { %7051 = vmatmul.mubr.bf16.vlgmr.msra.gmra.mrb[28].mxu0 %v6222_v22  ;;  %7133 = vmatmul.mubr.bf16.vlgmr.msra.gmra.mrb[28].mxu1 %v6222_v22  ;;  %v9613_v22 = vld [vmem:[#allocation6 + $0x1bc0] ss:$16 sps:$4 sm:$0xff]  }
 0x859   :  { %7060 = vmatpush1.bf16.msra.mxu0 %v9529_v52  ;;  %7142 = vmatpush1.bf16.msra.mxu1 %v9532_v53  ;;  %v9615_v52 = vld [vmem:[#allocation6 + $0x1bc4] ss:$16 sps:$4 sm:$0xff]   ;;  %v9618_v53 = vld [vmem:[#allocation6 + $0x1bcc] ss:$16 sps:$4 sm:$0xff]   ;;  %v9619_v27 = vld [vmem:[#allocation6 + $0x1be0] ss:$16 sps:$4 sm:$0xff]  }
 0x85a   :  { %7091 = vmatprep.mubr.bf16.mxu0 %v6225_v60  ;;  %7173 = vmatprep.mubr.bf16.mxu1 %v6225_v60  ;;  %v9624_v60 = vld [vmem:[#allocation6 + $0x1bec] ss:$16 sps:$4 sm:$0xff]  }
 0x85b   :  { %7061 = vmatprep.subr.bf16.mxu0 %v9537_v56  ;;  %7143 = vmatprep.subr.bf16.mxu1 %v9540_v57  ;;  %v9616_v56 = vld [vmem:[#allocation6 + $0x1bc8] ss:$16 sps:$4 sm:$0xff]   ;;  %v9621_v57 = vld [vmem:[#allocation6 + $0x1be4] ss:$16 sps:$4 sm:$0xff]  }
 0x85d   :  { %7062 = vmatpush1.bf16.msra.mxu0 %v9535_v62  ;;  %7144 = vmatpush1.bf16.msra.mxu1 %v9538_v63  ;;  %v6216_v62 = vmul.f32 0.2, %v8160_v55  ;;  %v9622_v63 = vld [vmem:[#allocation6 + $0x1be8] ss:$16 sps:$4 sm:$0xff]  }
 0x85e   :  { %7063 = vmatprep.subr.bf16.mxu0 %v9543_v0  ;;  %7145 = vmatprep.subr.bf16.mxu1 %v9546_v1  ;;  %v6356_v1 = vld [vmem:[#allocation7 + $0x18] sm:$0xf] }
 0x85f   :  { %v6220_v0 = vsel %vm6212_vm13, %v8160_v55, %v6216_v62 }
 0x860   :  { %v6224_v31 = vpack.c.bf16 %v6220_v0, %v6220_v0 }
 0x861   :  { %7064 = vmatpush1.bf16.msra.mxu0 %v9541_v41  ;;  %7146 = vmatpush1.bf16.msra.mxu1 %v9544_v3  ;;  %v6361_v41 = vrot.slane %v6356_v1, %v9831_v43  ;;  %v6369_v3 = vrot.slane %v6356_v1, %v9848_v58 }
 0x862   :  { %7065 = vmatprep.subr.bf16.mxu0 %v9549_v33  ;;  %7147 = vmatprep.subr.bf16.mxu1 %v9552_v4  ;;  %v6365_v33 = vrot.slane %v6356_v1, %v9834_v44  ;;  %v6373_v4 = vrot.slane %v6356_v1, %v9837_v45 }
 0x865   :  { %7066 = vmatpush1.bf16.msra.mxu0 %v9547_v5  ;;  %7148 = vmatpush1.bf16.msra.mxu1 %v9550_v6 }
 0x866   :  { %7067 = vmatprep.subr.bf16.mxu0 %v9555_v7  ;;  %7149 = vmatprep.subr.bf16.mxu1 %v9558_v39 }
 0x869   :  { %7068 = vmatpush1.bf16.msra.mxu0 %v9553_v8  ;;  %7150 = vmatpush1.bf16.msra.mxu1 %v9556_v42 }
 0x86a   :  { %7069 = vmatprep.subr.bf16.mxu0 %v9561_v9  ;;  %7151 = vmatprep.subr.bf16.mxu1 %v9564_v10 }
 0x86d   :  { %7070 = vmatpush1.bf16.msra.mxu0 %v9559_v12  ;;  %7152 = vmatpush1.bf16.msra.mxu1 %v9562_v49 }
 0x86e   :  { %7071 = vmatprep.subr.bf16.mxu0 %v9567_v13  ;;  %7153 = vmatprep.subr.bf16.mxu1 %v9570_v14 }
 0x871   :  { %7072 = vmatpush1.bf16.msra.mxu0 %v9565_v16  ;;  %7154 = vmatpush1.bf16.msra.mxu1 %v9568_v18 }
 0x872   :  { %7073 = vmatprep.subr.bf16.mxu0 %v9573_v54  ;;  %7155 = vmatprep.subr.bf16.mxu1 %v9576_v19 }
 0x875   :  { %7074 = vmatpush1.bf16.msra.mxu0 %v9571_v20  ;;  %7156 = vmatpush1.bf16.msra.mxu1 %v9574_v21 }
 0x876   :  { %7075 = vmatprep.subr.bf16.mxu0 %v9579_v23  ;;  %7157 = vmatprep.subr.bf16.mxu1 %v9582_v59 }
 0x879   :  { %7076 = vmatpush1.bf16.msra.mxu0 %v9577_v24  ;;  %7158 = vmatpush1.bf16.msra.mxu1 %v9580_v61 }
 0x87a   :  { %7077 = vmatprep.subr.bf16.mxu0 %v9585_v25  ;;  %7159 = vmatprep.subr.bf16.mxu1 %v9588_v26 }
 0x87d   :  { %7078 = vmatpush1.bf16.msra.mxu0 %v9583_v28  ;;  %7160 = vmatpush1.bf16.msra.mxu1 %v9586_v2 }
 0x87e   :  { %7079 = vmatprep.subr.bf16.mxu0 %v9591_v29  ;;  %7161 = vmatprep.subr.bf16.mxu1 %v9594_v30 }
 0x881   :  { %7080 = vmatpush1.bf16.msra.mxu0 %v9589_v32  ;;  %7162 = vmatpush1.bf16.msra.mxu1 %v9592_v34 }
 0x882   :  { %7081 = vmatprep.subr.bf16.mxu0 %v9597_v35  ;;  %7163 = vmatprep.subr.bf16.mxu1 %v9600_v37 }
 0x885   :  { %7082 = vmatpush1.bf16.msra.mxu0 %v9595_v38  ;;  %7164 = vmatpush1.bf16.msra.mxu1 %v9598_v40 }
 0x886   :  { %7083 = vmatprep.subr.bf16.mxu0 %v9603_v46  ;;  %7165 = vmatprep.subr.bf16.mxu1 %v9606_v11 }
 0x889   :  { %7084 = vmatpush1.bf16.msra.mxu0 %v9601_v47  ;;  %7166 = vmatpush1.bf16.msra.mxu1 %v9604_v36 }
 0x88a   :  { %7085 = vmatprep.subr.bf16.mxu0 %v9609_v48  ;;  %7167 = vmatprep.subr.bf16.mxu1 %v9612_v50 }
 0x88d   :  { %7086 = vmatpush1.bf16.msra.mxu0 %v9607_v51  ;;  %7168 = vmatpush1.bf16.msra.mxu1 %v9610_v17 }
 0x88e   :  { %7087 = vmatprep.subr.bf16.mxu0 %v9615_v52  ;;  %7169 = vmatprep.subr.bf16.mxu1 %v9618_v53 }
 0x891   :  { %7088 = vmatpush1.bf16.msra.mxu0 %v9613_v22  ;;  %7170 = vmatpush1.bf16.msra.mxu1 %v9616_v56 }
 0x892   :  { %7089 = vmatprep.subr.bf16.mxu0 %v9621_v57  ;;  %7171 = vmatprep.subr.bf16.mxu1 %v9624_v60 }
 0x895   :  { %7090 = vmatpush1.bf16.msra.mxu0 %v9619_v27  ;;  %7172 = vmatpush1.bf16.msra.mxu1 %v9622_v63 }
 0x898   :  { %7092 = vmatmul.mubr.bf16.vlgmr.msra.gmra.mrb[28].mxu0 %v6224_v31  ;;  %7174 = vmatmul.mubr.bf16.vlgmr.msra.gmra.mrb[28].mxu1 %v6224_v31 }
 0x96b   :  { %v7093_v5 = vpop.f32.mrb[28].mxu0  ;;  %v7175_v6 = vpop.f32.mrb[28].mxu1 }
 0x96c   :  { %v8162_v7 = vadd.f32 %v7093_v5, %v6361_v41  ;;  %v8164_v39 = vadd.f32 %v7175_v6, %v6369_v3  ;;  %v7095_v8 = vpop.f32.mrb[29].mxu0  ;;  %v7177_v42 = vpop.f32.mrb[29].mxu1 }
 0x96d   :  { %v8163_v9 = vadd.f32 %v7095_v8, %v6365_v33  ;;  %v8165_v10 = vadd.f32 %v7177_v42, %v6373_v4  ;;  %v7097_v12 = vpop.f32.mrb[30].mxu0  ;;  %v7179_v49 = vpop.f32.mrb[30].mxu1 }
 0x96e   :  { %vm7182_vm14 = vcmp.ge.f32.partialorder %v8162_v7, 0.0  ;;  %v7186_v13 = vmul.f32 0.2, %v8162_v7  ;;  %vm7184_vm15 = vcmp.ge.f32.partialorder %v8164_v39, 0.0  ;;  %v7188_v43 = vmul.f32 0.2, %v8164_v39 }
 0x96f   :  { %vm7183_vm0 = vcmp.ge.f32.partialorder %v8163_v9, 0.0  ;;  %v7187_v58 = vmul.f32 0.2, %v8163_v9  ;;  %vm7185_vm1 = vcmp.ge.f32.partialorder %v8165_v10, 0.0  ;;  %v7189_v44 = vmul.f32 0.2, %v8165_v10 }
 0x970   :  { %v7190_v14 = vsel %vm7182_vm14, %v8162_v7, %v7186_v13  ;;  %v7192_v45 = vsel %vm7184_vm15, %v8164_v39, %v7188_v43  ;;  %v7098_v16 = vpop.f32.mrb[31].mxu0  ;;  %v7180_v18 = vpop.f32.mrb[31].mxu1 }
 0x971   :  { %7194 = vst [vmem:[%s9952_s5] sm:$0xff] %v7190_v14  ;;  %7196 = vst [vmem:[%s9952_s5 + $0x10] sm:$0xff] %v7192_v45  ;;  %v7191_v54 = vsel %vm7183_vm0, %v8163_v9, %v7187_v58  ;;  %v7193_v19 = vsel %vm7185_vm1, %v8165_v10, %v7189_v44 }
 0x972   :  { %7195 = vst [vmem:[%s9952_s5 + $0x8] sm:$0xff] %v7191_v54  ;;  %7197 = vst [vmem:[%s9952_s5 + $0x18] sm:$0xff] %v7193_v19 }
 0x973   :  { %7202 = vsyncpa [#allocation3], 1 }
 0x974   :  { %7203 = vsyncpa [#allocation5], 1 }
 0x975   :  { %7204 = vsyncpa [#allocation8], 1 }

</bundles_post_ra>
